<compile_context>
chip_gen: v7x
topology: tpu7x:2x2x1
jax: 0.10.0
libtpu: 0.0.40
codegen_flags: <defaults>
</compile_context>

<pallas_src>
import numpy as np

import jax
import jax.numpy as jnp
from jax import lax
from jax.experimental import pallas as pl
from jax.experimental.pallas import tpu as pltpu

# ---- module hyper-parameters (small, consistent with the PyTorch module) ----
IN_DIM = 2            # LFF always takes 2-D coordinates
HIDDEN = 128          # hidden_size (lane-dense: multiple of 128)
BATCH = 2
SPATIAL = 16          # 16x16 coordinate grid -> 256 points per image

TILE_N_DEFAULT = 1024  # rows per grid step once N grows (multiple of 128)


def _round_up(x, m):
    return (x + m - 1) // m * m


def lff_kernel(xt_ref, w_ref, b_ref, o_ref):
    """y = sin(x @ W_t + b), with x supplied lane-dense as (2, TN).

    xt_ref: (2, TN)   coordinate block, lane-dense
    w_ref : (2, H)    pre-transposed weight (resident across the grid)
    b_ref : (1, H)    bias row            (resident across the grid)
    o_ref : (TN, H)   output block
    """
    y = lax.dot_general(
        xt_ref[...], w_ref[...],
        dimension_numbers=(((0,), (0,)), ((), ())),   # contract dim 0 of both
        preferred_element_type=jnp.float32,
    )                                                  # (TN, H)
    o_ref[...] = jnp.sin(y + b_ref[...])


def init_params(key):
    """Matches ConLinear(is_first=True) + default nn.Linear bias init.

    Weight is returned pre-transposed as (in, hidden) so the kernel never
    transposes (one-time layout plumbing at init).
    """
    kw, kb = jax.random.split(key, 2)
    w_bound = np.sqrt(9.0 / IN_DIM)             # is_first=True init range
    b_bound = 1.0 / np.sqrt(IN_DIM)             # default nn.Linear bias init
    w = jax.random.uniform(kw, (HIDDEN, IN_DIM), jnp.float32, -w_bound, w_bound)
    b = jax.random.uniform(kb, (HIDDEN,), jnp.float32, -b_bound, b_bound)
    w_t = jnp.transpose(w)                      # (2, hidden), folded at init
    return w_t, b


def lff_pallas(x, params, *, tile_n=TILE_N_DEFAULT):
    """x: (..., 2) coordinates -> (..., HIDDEN)."""
    w_t, b = params                               # (2, H), (H,)
    hidden = w_t.shape[1]
    lead = x.shape[:-1]

    x2 = x.reshape(-1, IN_DIM).astype(jnp.float32)        # (N, 2)
    n = x2.shape[0]

    # Tile the row dimension: one block if small, TILE_N-row blocks otherwise.
    tn = min(tile_n, _round_up(n, 128))
    n_pad = _round_up(n, tn)
    if n_pad != n:
        x2 = jnp.pad(x2, ((0, n_pad - n), (0, 0)))        # pad rows -> sin(b), sliced off
    x_t = x2.T                                            # (2, n_pad) lane-dense

    grid = (n_pad // tn,)
    itemsize = 4
    cost = pl.CostEstimate(
        flops=2 * n_pad * IN_DIM * hidden,
        transcendentals=n_pad * hidden,
        bytes_accessed=(x_t.size + w_t.size + hidden + n_pad * hidden) * itemsize,
    )

    out = pl.pallas_call(
        lff_kernel,
        out_shape=jax.ShapeDtypeStruct((n_pad, hidden), jnp.float32),
        grid=grid,
        in_specs=[
            pl.BlockSpec((IN_DIM, tn), lambda i: (0, i)),       # x streams
            pl.BlockSpec((IN_DIM, hidden), lambda i: (0, 0)),   # W_t resident
            pl.BlockSpec((1, hidden), lambda i: (0, 0)),        # b resident
        ],
        out_specs=pl.BlockSpec((tn, hidden), lambda i: (i, 0)),
        compiler_params=pltpu.CompilerParams(
            dimension_semantics=("parallel",),                  # split rows on v7x TCs
        ),
        cost_estimate=cost,
    )(x_t, w_t, b.reshape(1, hidden))

    return out[:n].reshape(*lead, hidden)


def lff_ref(x, params):
    """Pure-JAX reference mirroring the PyTorch forward."""
    w_t, b = params
    return jnp.sin(x.astype(jnp.float32) @ w_t + b)


def make_coord_grid(batch, size):
    """Typical LFF input: per-pixel (x, y) coordinates in [-1, 1]."""
    coords = jnp.linspace(-1.0, 1.0, size, dtype=jnp.float32)
    yy, xx = jnp.meshgrid(coords, coords, indexing="ij")
    grid = jnp.stack([xx, yy], axis=-1).reshape(1, size * size, IN_DIM)
    return jnp.broadcast_to(grid, (batch, size * size, IN_DIM))


if __name__ == "__main__":
    key = jax.random.PRNGKey(0)
    params = init_params(key)

    x = make_coord_grid(BATCH, SPATIAL)              # (2, 256, 2), batch-invariant
    ref = lff_ref(x, params)                         # (2, 256, 128)

    # 1) Batch-invariant path: run the kernel once on the (S*S, 2) grid and
    #    broadcast across batch in XLA (B-fold reduction in kernel work).
    out_single = lff_pallas(x[0], params)                            # (256, 128)
    out = jnp.broadcast_to(out_single[None], (BATCH,) + out_single.shape)
    out = jax.block_until_ready(out)
    assert out.shape == (BATCH, SPATIAL * SPATIAL, HIDDEN)
    np.testing.assert_allclose(np.asarray(out), np.asarray(ref), rtol=1e-5, atol=1e-5)

    # 2) General path on the full batched input with a small tile to exercise
    #    the multi-block grid + parallel semantics (grid = 512 / 128 = 4).
    out_full = jax.block_until_ready(lff_pallas(x, params, tile_n=128))
    np.testing.assert_allclose(np.asarray(out_full), np.asarray(ref), rtol=1e-5, atol=1e-5)

    print("KERNEL_OK")
</pallas_src>

<mosaic_0001>
module attributes {stable_mosaic.version = 11 : i64} {
  func.func @lff_kernel(%arg0: i32, %arg1: memref<2x256xf32, #tpu.memory_space<vmem>>, %arg2: memref<2x128xf32, #tpu.memory_space<vmem>>, %arg3: memref<1x128xf32, #tpu.memory_space<vmem>>, %arg4: memref<256x128xf32, #tpu.memory_space<vmem>>) attributes {dimension_semantics = [#tpu.dimension_semantics<parallel>], iteration_bounds = array<i64: 1>, scalar_prefetch = 0 : i64, scratch_operands = 0 : i64, tpu.core_type = #tpu.core_type<tc>, window_params = [{transform_indices = @transform_0, window_bounds = array<i64: 2, 256>}, {pipeline_mode = #tpu.pipeline_mode<synchronous>, transform_indices = @transform_1, window_bounds = array<i64: 2, 128>}, {pipeline_mode = #tpu.pipeline_mode<synchronous>, transform_indices = @transform_2, window_bounds = array<i64: 1, 128>}, {transform_indices = @transform_3, window_bounds = array<i64: 256, 128>}]} {
    %c0 = arith.constant 0 : index
    %c0_0 = arith.constant 0 : index
    %0 = vector.load %arg1[%c0, %c0_0] : memref<2x256xf32, #tpu.memory_space<vmem>>, vector<2x256xf32>
    %c0_1 = arith.constant 0 : index
    %c0_2 = arith.constant 0 : index
    %1 = vector.load %arg2[%c0_1, %c0_2] : memref<2x128xf32, #tpu.memory_space<vmem>>, vector<2x128xf32>
    %cst = arith.constant dense<0.000000e+00> : vector<256x128xf32>
    %2 = tpu.matmul %0, %1, %cst {dimension_numbers = #tpu.dot_dimension_numbers<[0], [0], [1], [1], [0, 1, 1, 1], [], []>} : vector<2x256xf32>, vector<2x128xf32>, vector<256x128xf32> -> vector<256x128xf32>
    %c0_3 = arith.constant 0 : index
    %c0_4 = arith.constant 0 : index
    %3 = vector.load %arg3[%c0_3, %c0_4] : memref<1x128xf32, #tpu.memory_space<vmem>>, vector<1x128xf32>
    %4 = vector.broadcast %3 : vector<1x128xf32> to vector<256x128xf32>
    %5 = arith.addf %2, %4 : vector<256x128xf32>
    %6 = math.sin %5 : vector<256x128xf32>
    %c0_5 = arith.constant 0 : index
    %c0_6 = arith.constant 0 : index
    %7 = vector.load %arg4[%c0_5, %c0_6] : memref<256x128xf32, #tpu.memory_space<vmem>>, vector<256x128xf32>
    tpu.vector_store %arg4[%c0_5, %c0_6], %6 {strides = array<i32>} : memref<256x128xf32, #tpu.memory_space<vmem>>, vector<256x128xf32>,
    return
  }
  func.func @transform_0(%arg0: i32) -> (i32, i32) {
    %c0_i32 = arith.constant 0 : i32
    %c0_i32_0 = arith.constant 0 : i32
    return %c0_i32, %arg0 : i32, i32
  }
  func.func @transform_1(%arg0: i32) -> (i32, i32) {
    %c0_i32 = arith.constant 0 : i32
    %c0_i32_0 = arith.constant 0 : i32
    %c0_i32_1 = arith.constant 0 : i32
    return %c0_i32, %c0_i32_0 : i32, i32
  }
  func.func @transform_2(%arg0: i32) -> (i32, i32) {
    %c0_i32 = arith.constant 0 : i32
    %c0_i32_0 = arith.constant 0 : i32
    %c0_i32_1 = arith.constant 0 : i32
    return %c0_i32, %c0_i32_0 : i32, i32
  }
  func.func @transform_3(%arg0: i32) -> (i32, i32) {
    %c0_i32 = arith.constant 0 : i32
    %c0_i32_0 = arith.constant 0 : i32
    return %arg0, %c0_i32 : i32, i32
  }
}

</mosaic_0001>

<bundles_post_ra>
// kernel: tpu_custom_call.1
= control target key start
LH: loop header
LB: loop body
LE: loop exit
PB: predicated region body
PF: predicated region fallthrough
CT: control target
= control target key end

     0   :  { %8 = vsyncpa [#allocation3], 0  ;;  %s7094_s0 = inlined_call_operand.hbm [shape: f32[2,256], index: 0, kind: input, shape index: {}]   ;;  %s7095_s1 = inlined_call_operand.vmem [shape: f32[2,128], index: 1, kind: input, shape index: {}]   ;;  %s7096_s2 = inlined_call_operand.vmem [shape: f32[1,128], index: 2, kind: input, shape index: {}]   ;;  %s7097_s3 = inlined_call_operand.hbm [shape: f32[256,128], index: 3, kind: output, shape index: {}]  }
   0x1   :  { %9 = vsyncpa [#allocation4], 0  ;;  %s4382_s12 = smov [#allocation2]   ;;  %s4334_s16 = scalar_lea.hbm %s7094_s0, 64 }
   0x2   :  { %s16_s13 = sshll.u32 %s4382_s12, 4  ;;  %p4335_p0 = scmp.ne.s32.totalorder %s7094_s0, %s4334_s16  ;;  %s17_s13 = int_to_ptr.vmem [resolvable:$true] %s16_s13 }
   0x3   :  { %p4338_p1 = scmp.lt.u32.totalorder %s4334_s16, %s7094_s0 }
   0x5   :  { %p4340_p2 = pnand %p4338_p1, %p4335_p0 }
   0x7   :  { %4343 = shalt.err (!%p4340_p2)
}
   0x8   :  { %s4344_s21 = scalar_lea.vmem %s17_s13, 64  ;;  %p4349_p4 = scmp.lt.s32.totalorder %s17_s13, %s17_s13 }
   0x9   :  { %p4345_p3 = scmp.ne.s32.totalorder %s17_s13, %s4344_s21  ;;  %p4350_p5 = scmp.lt.s32.totalorder %s4344_s21, %s4344_s21 }
   0xb   :  { %p4351_p6 = por %p4350_p5, %p4349_p4 }
   0xd   :  { %p4352_p7 = pnand %p4351_p6, %p4345_p3 }
   0xf   :  { %4355 = shalt.err (!%p4352_p7)
}
  0x10   :  { %19 = dma.hbm_to_vmem [thread:$0]  %s7094_s0, 64, %s17_s13, [#allocation3]  }
  0x11   :  { %4378 = dma.done.wait [#allocation3], 64  }
  0x12   :  { %4379 = vsyncadd [#allocation3], 4294967232  ;;  %v3815_v0 = vld.sshfl [vmem:[#allocation2] sm:$0x33 pattern:$0x76325410] }
  0x13   :  { %47 = vxpose.xlu0.b32.start.end [1/1] (short) %v3815_v0, 128  ;;  %v28_v1 = vld [vmem:[%s7095_s1] sm:$0x3]  ;;  %vm208_vm0 = vcmask 1041408   ;;  %v44_v2 = vcombine.high %v3815_v0, %v3815_v0  ;;  %vm111_vm1 = vcmask 15360  }
  0x14   :  { %4010 = vmatprep.subr.msk.mxu0 %vm208_vm0, %v28_v1  ;;  %4060 = vmatprep.subr.msk.mxu1 %vm208_vm0, %v28_v1  ;;  %v4462_v35 = vld [vmem:[%s7096_s2] ss:$0 sm:$0xff] }
  0x15   :  { %4011 = vmatpush3.msk.msra.mxu0 %vm208_vm0, %v28_v1  ;;  %4061 = vmatpush3.msk.msra.mxu1 %vm208_vm0, %v28_v1 }
  0x50   :  { %79 = vxpose.xlu0.b32.start.end [1/1] (short) %v44_v2, 128 }
  0x93   :  { %v63_v3 = vpop.trf.xlu0 }
  0x94   :  { %4012 = vmatprep.mubr.msk.f32.mxu0 %vm111_vm1, %v63_v3 }
  0x97   :  { %v64_v4 = vpop.trf.xlu0 }
  0x98   :  { %4013 = vmatmul.mubr.msk.f32.vlgmr.msra.gmra.mrb[0].mxu0 %vm111_vm1, %v64_v4  ;;  %v4383_v4 = vmov 683565275  }
  0x9b   :  { %v65_v5 = vpop.trf.xlu0 }
  0x9c   :  { %4015 = vmatprep.mubr.msk.f32.mxu0 %vm111_vm1, %v65_v5 }
  0x9f   :  { %v66_v6 = vpop.trf.xlu0 }
  0xa0   :  { %4016 = vmatmul.mubr.msk.f32.gmra.mrb[2].mxu0 %vm111_vm1, %v66_v6 }
  0xa3   :  { %v67_v7 = vpop.trf.xlu0 }
  0xa4   :  { %4018 = vmatprep.mubr.msk.f32.mxu0 %vm111_vm1, %v67_v7 }
  0xa7   :  { %v68_v8 = vpop.trf.xlu0 }
  0xa8   :  { %4019 = vmatmul.mubr.msk.f32.gmra.mrb[4].mxu0 %vm111_vm1, %v68_v8  ;;  %v4384_v8 = vmov 2475754826  }
  0xab   :  { %v69_v9 = vpop.trf.xlu0 }
  0xac   :  { %4021 = vmatprep.mubr.msk.f32.mxu0 %vm111_vm1, %v69_v9 }
  0xaf   :  { %v70_v10 = vpop.trf.xlu0 }
  0xb0   :  { %4022 = vmatmul.mubr.msk.f32.gmra.mrb[6].mxu0 %vm111_vm1, %v70_v10  ;;  %v4385_v10 = vmov 2131351028  }
  0xb3   :  { %v71_v11 = vpop.trf.xlu0 }
  0xb4   :  { %4024 = vmatprep.mubr.msk.f32.mxu0 %vm111_vm1, %v71_v11 }
  0xb7   :  { %v72_v12 = vpop.trf.xlu0 }
  0xb8   :  { %4025 = vmatmul.mubr.msk.f32.gmra.mrb[8].mxu0 %vm111_vm1, %v72_v12  ;;  %v4386_v12 = vmov 2102212464  }
  0xbb   :  { %v73_v13 = vpop.trf.xlu0 }
  0xbc   :  { %4027 = vmatprep.mubr.msk.f32.mxu0 %vm111_vm1, %v73_v13 }
  0xbf   :  { %v74_v14 = vpop.trf.xlu0 }
  0xc0   :  { %4028 = vmatmul.mubr.msk.f32.gmra.mrb[10].mxu0 %vm111_vm1, %v74_v14  ;;  %v4387_v14 = vmov 920167782  }
  0xc3   :  { %v75_v15 = vpop.trf.xlu0 }
  0xc4   :  { %4030 = vmatprep.mubr.msk.f32.mxu0 %vm111_vm1, %v75_v15 }
  0xc7   :  { %v76_v16 = vpop.trf.xlu0 }
  0xc8   :  { %4031 = vmatmul.mubr.msk.f32.gmra.mrb[12].mxu0 %vm111_vm1, %v76_v16 }
  0xcb   :  { %v77_v17 = vpop.trf.xlu0 }
  0xcc   :  { %4033 = vmatprep.mubr.msk.f32.mxu0 %vm111_vm1, %v77_v17 }
  0xcf   :  { %v78_v18 = vpop.trf.xlu0 }
  0xd0   :  { %4034 = vmatmul.mubr.msk.f32.gmra.mrb[14].mxu0 %vm111_vm1, %v78_v18 }
  0xd3   :  { %v95_v19 = vpop.trf.xlu0 }
  0xd4   :  { %4036 = vmatprep.mubr.msk.f32.mxu1 %vm111_vm1, %v95_v19 }
  0xd7   :  { %v96_v20 = vpop.trf.xlu0 }
  0xd8   :  { %4037 = vmatmul.mubr.msk.f32.vlgmr.msra.gmra.mrb[0].mxu1 %vm111_vm1, %v96_v20 }
  0xdb   :  { %v97_v21 = vpop.trf.xlu0 }
  0xdc   :  { %4039 = vmatprep.mubr.msk.f32.mxu1 %vm111_vm1, %v97_v21 }
  0xdf   :  { %v98_v22 = vpop.trf.xlu0 }
  0xe0   :  { %4040 = vmatmul.mubr.msk.f32.gmra.mrb[2].mxu1 %vm111_vm1, %v98_v22 }
  0xe3   :  { %v99_v23 = vpop.trf.xlu0 }
  0xe4   :  { %4042 = vmatprep.mubr.msk.f32.mxu1 %vm111_vm1, %v99_v23  ;;  %v4388_v23 = vmov 1326507024  }
  0xe7   :  { %v100_v24 = vpop.trf.xlu0 }
  0xe8   :  { %4043 = vmatmul.mubr.msk.f32.gmra.mrb[4].mxu1 %vm111_vm1, %v100_v24 }
  0xeb   :  { %v101_v25 = vpop.trf.xlu0 }
  0xec   :  { %4045 = vmatprep.mubr.msk.f32.mxu1 %vm111_vm1, %v101_v25 }
  0xef   :  { %v102_v26 = vpop.trf.xlu0 }
  0xf0   :  { %4046 = vmatmul.mubr.msk.f32.gmra.mrb[6].mxu1 %vm111_vm1, %v102_v26 }
  0xf3   :  { %v103_v27 = vpop.trf.xlu0 }
  0xf4   :  { %4048 = vmatprep.mubr.msk.f32.mxu1 %vm111_vm1, %v103_v27 }
  0xf7   :  { %v104_v28 = vpop.trf.xlu0 }
  0xf8   :  { %4049 = vmatmul.mubr.msk.f32.gmra.mrb[8].mxu1 %vm111_vm1, %v104_v28 }
  0xfb   :  { %v105_v29 = vpop.trf.xlu0 }
  0xfc   :  { %4051 = vmatprep.mubr.msk.f32.mxu1 %vm111_vm1, %v105_v29 }
  0xff   :  { %v106_v30 = vpop.trf.xlu0 }
 0x100   :  { %4052 = vmatmul.mubr.msk.f32.gmra.mrb[10].mxu1 %vm111_vm1, %v106_v30 }
 0x103   :  { %v107_v31 = vpop.trf.xlu0 }
 0x104   :  { %4054 = vmatprep.mubr.msk.f32.mxu1 %vm111_vm1, %v107_v31 }
 0x107   :  { %v108_v32 = vpop.trf.xlu0 }
 0x108   :  { %4055 = vmatmul.mubr.msk.f32.gmra.mrb[12].mxu1 %vm111_vm1, %v108_v32 }
 0x10b   :  { %v109_v33 = vpop.trf.xlu0 }
 0x10c   :  { %4057 = vmatprep.mubr.msk.f32.mxu1 %vm111_vm1, %v109_v33 }
 0x10f   :  { %v110_v34 = vpop.trf.xlu0 }
 0x110   :  { %4058 = vmatmul.mubr.msk.f32.gmra.mrb[14].mxu1 %vm111_vm1, %v110_v34 }
 0x16b   :  { %v4014_v36 = vpop.f32.mrb[0].mxu0 }
 0x16c   :  { %v4465_v37 = vadd.f32 %v4014_v36, %v4462_v35  ;;  %v278_v38 = vpop.f32.mrb[1].mxu0 }
 0x16d   :  { %v4468_v39 = vadd.f32 %v4462_v35, %v278_v38 }
 0x16e   :  { %v541_v40 = vand.u32 2147483647, %v4465_v37  ;;  %v544_v41 = vand.u32 2139095040, %v4465_v37  ;;  %vm543_vm15 = vcmp.lt.s32.totalorder %v4465_v37, 0 }
 0x16f   :  { %v437_v42 = vand.u32 2147483647, %v4468_v39  ;;  %v440_v43 = vand.u32 2139095040, %v4468_v39  ;;  %vm439_vm1 = vcmp.lt.s32.totalorder %v4468_v39, 0 }
 0x170   :  { %v545_v44 = vshrl.u32 %v544_v41, 23  ;;  %v548_v45 = vand.u32 8388607, %v541_v40  ;;  %vm4587_vm0 = vcmp.le.f32.partialorder %v541_v40, 0.7853982 }
 0x171   :  { %v441_v46 = vshrl.u32 %v440_v43, 23  ;;  %v444_v47 = vand.u32 8388607, %v437_v42 }
 0x172   :  { %v3853_v48 = vadd.s32 4294967169, %v545_v44  ;;  %v549_v51 = vor.u32 8388608, %v548_v45 }
 0x173   :  { %v3849_v49 = vadd.s32 4294967169, %v441_v46  ;;  %v4017_v50 = vpop.f32.mrb[2].mxu0  ;;  %v445_v55 = vor.u32 8388608, %v444_v47 }
 0x174   :  { %v551_v52 = vadd.s32 1, %v3853_v48  ;;  %v4479_v53 = vadd.f32 %v4017_v50, %v4462_v35  ;;  %v288_v54 = vpop.f32.mrb[3].mxu0  ;;  %v4482_v61 = vshll.u32 %v549_v51, 8 }
 0x175   :  { %v447_v56 = vadd.s32 1, %v3849_v49  ;;  %v4486_v0 = vshll.u32 %v445_v55, 8  ;;  %v4490_v2 = vadd.f32 %v4462_v35, %v288_v54 }
 0x176   :  { %vm552_vm2 = vcmp.gt.s32.totalorder %v551_v52, 0  ;;  %v752_v57 = vand.u32 2139095040, %v4479_v53  ;;  %v749_v1 = vand.u32 2147483647, %v4479_v53 }
 0x177   :  { %v553_v58 = vsel %vm552_vm2, %v551_v52, 0  ;;  %vm448_vm3 = vcmp.gt.s32.totalorder %v447_v56, 0 }
 0x178   :  { %v554_v59 = vshrl.u32 %v553_v58, 5  ;;  %v555_v60 = vand.u32 31, %v553_v58  ;;  %v449_v62 = vsel %vm448_vm3, %v447_v56, 0  ;;  %v4493_v7 = vshrl.u32 %v752_v57, 23 }
 0x179   :  { %v4484_v63 = vshrl.u32 %v449_v62, 5  ;;  %v451_v6 = vand.u32 31, %v449_v62 }
 0x17a   :  { %v556_v3 = vsub.s32 32, %v555_v60  ;;  %v558_v5 = vshll.u32 %v4383_v4, %v555_v60  ;;  %v561_v9 = vshll.u32 %v4384_v8, %v555_v60  ;;  %v564_v11 = vshll.u32 %v4385_v10, %v555_v60 }
 0x17b   :  { %v567_v13 = vshll.u32 %v4386_v12, %v555_v60  ;;  %v570_v15 = vshll.u32 %v4387_v14, %v555_v60  ;;  %v4499_v16 = vpop.f32.mrb[4].mxu0  ;;  %vm573_vm4 = vcmp.lt.s32.totalorder %v554_v59, 1  ;;  %vm574_vm5 = vcmp.lt.s32.totalorder %v554_v59, 2 }
 0x17c   :  { %v559_v17 = vshrl.u32 %v4384_v8, %v556_v3  ;;  %v562_v18 = vshrl.u32 %v4385_v10, %v556_v3  ;;  %v565_v19 = vshrl.u32 %v4386_v12, %v556_v3  ;;  %v4504_v20 = vpop.f32.mrb[5].mxu0  ;;  %v557_v21 = vshrl.u32 %v4383_v4, %v556_v3 }
 0x17d   :  { %v568_v22 = vshrl.u32 %v4387_v14, %v556_v3  ;;  %v571_v24 = vshrl.u32 %v4388_v23, %v556_v3  ;;  %v452_v28 = vsub.s32 32, %v451_v6  ;;  %vm575_vm6 = vcmp.lt.s32.totalorder %v554_v59, 3 }
 0x17e   :  { %v560_v25 = vor.u32 %v559_v17, %v558_v5  ;;  %v563_v26 = vor.u32 %v562_v18, %v561_v9  ;;  %v566_v27 = vor.u32 %v565_v19, %v564_v11  ;;  %vm576_vm7 = vcmp.lt.s32.totalorder %v554_v59, 4 }
 0x17f   :  { %v569_v29 = vor.u32 %v568_v22, %v567_v13  ;;  %v572_v30 = vor.u32 %v571_v24, %v570_v15  ;;  %v454_v43 = vshll.u32 %v4383_v4, %v451_v6  ;;  %v455_v46 = vshrl.u32 %v4384_v8, %v452_v28 }
 0x180   :  { %v577_v31 = vsel %vm573_vm4, %v557_v21, %v560_v25  ;;  %v578_v32 = vsel %vm576_vm7, %v566_v27, 2102212464  ;;  %v581_v33 = vsel %vm573_vm4, %v560_v25, %v563_v26  ;;  %v585_v34 = vsel %vm573_vm4, %v563_v26, %v566_v27 }
 0x181   :  { %v579_v36 = vsel %vm575_vm6, %v563_v26, %v578_v32  ;;  %v582_v38 = vsel %vm576_vm7, %v569_v29, 920167782  ;;  %v586_v41 = vsel %vm576_vm7, %v572_v30, 1326507024  ;;  %v457_v47 = vshll.u32 %v4384_v8, %v451_v6 }
 0x182   :  { %v583_v44 = vsel %vm575_vm6, %v566_v27, %v582_v38  ;;  %v587_v45 = vsel %vm575_vm6, %v569_v29, %v586_v41  ;;  %v580_v48 = vsel %vm574_vm5, %v577_v31, %v579_v36  ;;  %v458_v51 = vshrl.u32 %v4385_v10, %v452_v28 }
 0x183   :  { %v584_v49 = vsel %vm574_vm5, %v581_v33, %v583_v44  ;;  %v588_v50 = vsel %vm574_vm5, %v585_v34, %v587_v45  ;;  %v4519_v52 = vpop.f32.mrb[6].mxu0  ;;  %v456_v60 = vor.u32 %v455_v46, %v454_v43  ;;  %v460_v59 = vshll.u32 %v4385_v10, %v451_v6 }
 0x184   :  { %v4522_v54 = vmul.u32.u64.low %v4482_v61, %v588_v50  ;;  %v4523_v55 = vmul.u32.u64.high %v4482_v61, %v588_v50, %v4522_v54  ;;  %v4526_v56 = vmul.u32.u64.low %v4482_v61, %v584_v49  ;;  %v4527_v57 = vmul.u32.u64.high %v4482_v61, %v584_v49, %v4526_v56  ;;  %v4530_v58 = vpop.f32.mrb[7].mxu0 }
 0x185   :  { %v459_v62 = vor.u32 %v458_v51, %v457_v47  ;;  %v461_v3 = vshrl.u32 %v4386_v12, %v452_v28  ;;  %v453_v5 = vshrl.u32 %v4383_v4, %v452_v28  ;;  %v463_v9 = vshll.u32 %v4386_v12, %v451_v6 }
 0x186   :  { %v464_v11 = vshrl.u32 %v4387_v14, %v452_v28  ;;  %v467_v13 = vshrl.u32 %v4388_v23, %v452_v28  ;;  %v596_v15 = vmul.u32 %v4482_v61, %v580_v48  ;;  %v466_v18 = vshll.u32 %v4387_v14, %v451_v6 }
 0x187   :  { %v462_v17 = vor.u32 %v461_v3, %v460_v59  ;;  %vm469_vm8 = vcmp.lt.s32.totalorder %v4484_v63, 1  ;;  %vm598_vm9 = vc.u32 %v4523_v55, %v4526_v56  ;;  %v599_v19 = vadd.s32 1, %v4527_v57 }
 0x188   :  { %v465_v21 = vor.u32 %v464_v11, %v463_v9  ;;  %vm470_vm10 = vcmp.lt.s32.totalorder %v4484_v63, 2  ;;  %v468_v22 = vor.u32 %v467_v13, %v466_v18  ;;  %vm471_vm11 = vcmp.lt.s32.totalorder %v4484_v63, 3 }
 0x189   :  { %vm472_vm12 = vcmp.lt.s32.totalorder %v4484_v63, 4  ;;  %v477_v24 = vsel %vm469_vm8, %v456_v60, %v459_v62  ;;  %v600_v61 = vsel %vm598_vm9, %v599_v19, %v4527_v57  ;;  %v481_v26 = vsel %vm469_vm8, %v459_v62, %v462_v17 }
 0x18a   :  { %v474_v25 = vsel %vm472_vm12, %v462_v17, 2102212464  ;;  %v478_v6 = vsel %vm472_vm12, %v465_v21, 920167782  ;;  %v601_v27 = vadd.s32 %v600_v61, %v596_v15  ;;  %v473_v28 = vsel %vm469_vm8, %v453_v5, %v456_v60 }
 0x18b   :  { %v479_v29 = vsel %vm471_vm11, %v462_v17, %v478_v6  ;;  %v482_v30 = vsel %vm472_vm12, %v468_v22, 1326507024  ;;  %v475_v31 = vsel %vm471_vm11, %v459_v62, %v474_v25  ;;  %v3861_v34 = vadd.s32 4294967169, %v4493_v7  ;;  %v4577_v15 = vpop.f32.mrb[8].mxu0 }
 0x18c   :  { %v480_v32 = vsel %vm470_vm10, %v477_v24, %v479_v29  ;;  %v483_v33 = vsel %vm471_vm11, %v465_v21, %v482_v30  ;;  %v602_v36 = vadd.s32 536870912, %v601_v27  ;;  %v476_v47 = vsel %vm470_vm10, %v473_v28, %v475_v31 }
 0x18d   :  { %v484_v38 = vsel %vm470_vm10, %v481_v26, %v483_v33  ;;  %v4554_v41 = vmul.u32.u64.low %v4486_v0, %v480_v32  ;;  %v4555_v43 = vmul.u32.u64.high %v4486_v0, %v480_v32, %v4554_v41  ;;  %v759_v48 = vadd.s32 1, %v3861_v34 }
 0x18e   :  { %v4559_v44 = vmul.u32.u64.low %v4486_v0, %v484_v38  ;;  %v4560_v45 = vmul.u32.u64.high %v4486_v0, %v484_v38, %v4559_v44  ;;  %v603_v46 = vshrl.u32 %v602_v36, 30  ;;  %v756_v7 = vand.u32 8388607, %v749_v1 }
 0x18f   :  { %v495_v50 = vadd.s32 1, %v4555_v43  ;;  %vm760_vm13 = vcmp.gt.s32.totalorder %v759_v48, 0  ;;  %v648_v51 = vand.u32 2139095040, %v4490_v2  ;;  %v492_v57 = vmul.u32 %v4486_v0, %v476_v47 }
 0x190   :  { %v604_v49 = vshll.u32 %v603_v46, 30  ;;  %v627_v54 = vsub.s32 4, %v603_v46  ;;  %vm494_vm14 = vc.u32 %v4560_v45, %v4554_v41  ;;  %v761_v60 = vsel %vm760_vm13, %v759_v48, 0 }
 0x191   :  { %v496_v63 = vsel %vm494_vm14, %v495_v50, %v4555_v43  ;;  %v757_v3 = vor.u32 8388608, %v756_v7  ;;  %v763_v5 = vand.u32 31, %v761_v60  ;;  %v645_v9 = vand.u32 2147483647, %v4490_v2 }
 0x192   :  { %v4571_v62 = vsub.s32 %v601_v27, %v604_v49  ;;  %v497_v59 = vadd.s32 %v496_v63, %v492_v57  ;;  %v649_v13 = vshrl.u32 %v648_v51, 23  ;;  %v4581_v0 = vsel %vm543_vm15, %v627_v54, %v603_v46 }
 0x193   :  { %v4583_v18 = vshrl.u32 %v761_v60, 5  ;;  %v764_v19 = vsub.s32 32, %v763_v5  ;;  %v597_v24 = vadd.s32 %v4526_v56, %v4523_v55  ;;  %v4595_v25 = vshll.u32 %v757_v3, 8 }
 0x194   :  { %v607_v11 = vsub.s32 0, %v4571_v62  ;;  %v498_v17 = vadd.s32 536870912, %v497_v59  ;;  %v4599_v6 = vand.u32 8388607, %v645_v9  ;;  %v630_v40 = vsel %vm4587_vm0, 0, %v4581_v0 }
 0x195   :  { %v767_v27 = vshrl.u32 %v4384_v8, %v764_v19  ;;  %v4605_v28 = vadd.s32 4294967169, %v649_v13  ;;  %v766_v55 = vshll.u32 %v4383_v4, %v763_v5  ;;  %v770_v56 = vshrl.u32 %v4385_v10, %v764_v19 }
 0x196   :  { %v3854_v22 = vmin.u32 %v607_v11, %v4571_v62  ;;  %v499_v61 = vshrl.u32 %v498_v17, 30  ;;  %vm781_vm2 = vcmp.lt.s32.totalorder %v4583_v18, 1  ;;  %v772_v31 = vshll.u32 %v4385_v10, %v763_v5 }
 0x197   :  { %v773_v32 = vshrl.u32 %v4386_v12, %v764_v19  ;;  %v776_v33 = vshrl.u32 %v4387_v14, %v764_v19  ;;  %v769_v36 = vshll.u32 %v4384_v8, %v763_v5  ;;  %v775_v38 = vshll.u32 %v4386_v12, %v763_v5 }
 0x198   :  { %v609_v26 = vclz %v3854_v22  ;;  %v500_v29 = vshll.u32 %v499_v61, 30  ;;  %v779_v43 = vshrl.u32 %v4388_v23, %v764_v19  ;;  %vm782_vm3 = vcmp.lt.s32.totalorder %v4583_v18, 2 }
 0x199   :  { %v523_v44 = vsub.s32 4, %v499_v61  ;;  %v768_v46 = vor.u32 %v767_v27, %v766_v55  ;;  %v774_v47 = vor.u32 %v773_v32, %v772_v31  ;;  %v771_v49 = vor.u32 %v770_v56, %v769_v36 }
 0x19a   :  { %v3855_v30 = vadd.s32 4294967294, %v609_v26  ;;  %v4613_v34 = vsub.s32 %v497_v59, %v500_v29  ;;  %v778_v50 = vshll.u32 %v4387_v14, %v763_v5  ;;  %v777_v57 = vor.u32 %v776_v33, %v775_v38 }
 0x19b   :  { %vm784_vm5 = vcmp.lt.s32.totalorder %v4583_v18, 4  ;;  %vm4624_vm6 = vcmp.le.f32.partialorder %v437_v42, 0.7853982  ;;  %v765_v59 = vshrl.u32 %v4383_v4, %v764_v19  ;;  %v524_v22 = vsel %vm439_vm1, %v523_v44, %v499_v61 }
 0x19c   :  { %vm3856_vm4 = vcmp.lt.s32.totalorder %v3855_v30, 0  ;;  %v503_v7 = vsub.s32 0, %v4613_v34  ;;  %v780_v3 = vor.u32 %v779_v43, %v778_v50  ;;  %v786_v11 = vsel %vm784_vm5, %v774_v47, 2102212464 }
 0x19d   :  { %v612_v48 = vsel %vm3856_vm4, 0, %v3855_v30  ;;  %vm783_vm7 = vcmp.lt.s32.totalorder %v4583_v18, 3  ;;  %v785_v42 = vsel %vm781_vm2, %v765_v59, %v768_v46  ;;  %v789_v19 = vsel %vm781_vm2, %v768_v46, %v771_v49  ;;  %v4655_v46 = vpop.f32.mrb[9].mxu0 }
 0x19e   :  { %v613_v51 = vsub.s32 32, %v612_v48  ;;  %v617_v54 = vsub.s32 4294967266, %v612_v48  ;;  %v3850_v63 = vmin.u32 %v503_v7, %v4613_v34  ;;  %v614_v5 = vshll.u32 %v4571_v62, %v612_v48 }
 0x19f   :  { %v787_v55 = vsel %vm783_vm7, %v771_v49, %v786_v11  ;;  %v790_v62 = vsel %vm784_vm5, %v777_v57, 920167782  ;;  %v793_v61 = vsel %vm781_vm2, %v771_v49, %v774_v47  ;;  %v794_v30 = vsel %vm784_vm5, %v780_v3, 1326507024 }
 0x1a0   :  { %v615_v13 = vshrl.u32 %v597_v24, %v613_v51  ;;  %v618_v17 = vadd.s32 127, %v617_v54  ;;  %v505_v26 = vclz %v3850_v63  ;;  %v791_v56 = vsel %vm783_vm7, %v774_v47, %v790_v62 }
 0x1a1   :  { %v792_v33 = vsel %vm782_vm3, %v789_v19, %v791_v56  ;;  %v795_v36 = vsel %vm783_vm7, %v777_v57, %v794_v30  ;;  %v493_v50 = vadd.s32 %v4554_v41, %v4560_v45  ;;  %v788_v57 = vsel %vm782_vm3, %v785_v42, %v787_v55 }
 0x1a2   :  { %v616_v27 = vor.u32 %v615_v13, %v614_v5  ;;  %v619_v29 = vshll.u32 %v618_v17, 23  ;;  %v3851_v24 = vadd.s32 4294967294, %v505_v26  ;;  %v796_v38 = vsel %vm782_vm3, %v793_v61, %v795_v36 }
 0x1a3   :  { %v4651_v43 = vmul.u32.u64.low %v4595_v25, %v792_v33  ;;  %v4652_v44 = vmul.u32.u64.high %v4595_v25, %v792_v33, %v4651_v43  ;;  %v4658_v7 = vmul.u32.u64.low %v4595_v25, %v796_v38  ;;  %v4659_v49 = vmul.u32.u64.high %v4595_v25, %v796_v38, %v4658_v7 }
 0x1a4   :  { %v620_v31 = vor.u32 4788187, %v619_v29  ;;  %v623_v32 = vcvt.s32.f32 %v616_v27  ;;  %vm3852_vm8 = vcmp.lt.s32.totalorder %v3851_v24, 0  ;;  %v634_v59 = vadd.s32 3, %v630_v40 }
 0x1a5   :  { %v508_v48 = vsel %vm3852_vm8, 0, %v3851_v24  ;;  %v526_v3 = vsel %vm4624_vm6, 0, %v524_v22  ;;  %v655_v11 = vadd.s32 1, %v4605_v28  ;;  %v807_v45 = vadd.s32 1, %v4652_v44 }
 0x1a6   :  { %v621_v47 = vand.u32 2147483647, %v620_v31  ;;  %v509_v51 = vsub.s32 32, %v508_v48  ;;  %v513_v54 = vsub.s32 4294967266, %v508_v48  ;;  %v510_v5 = vshll.u32 %v4613_v34, %v508_v48 }
 0x1a7   :  { %v804_v18 = vmul.u32 %v4595_v25, %v788_v57  ;;  %vm806_vm9 = vc.u32 %v4659_v49, %v4651_v43  ;;  %vm656_vm10 = vcmp.gt.s32.totalorder %v655_v11, 0  ;;  %v530_v34 = vadd.s32 3, %v526_v3 }
 0x1a8   :  { %v624_v63 = vmul.f32 %v623_v32, %v621_v47  ;;  %v511_v13 = vshrl.u32 %v493_v50, %v509_v51  ;;  %v514_v41 = vadd.s32 127, %v513_v54  ;;  %v808_v26 = vsel %vm806_vm9, %v807_v45, %v4652_v44 }
 0x1a9   :  { %v657_v22 = vsel %vm656_vm10, %v655_v11, 0  ;;  %v809_v42 = vadd.s32 %v808_v26, %v804_v18  ;;  %v4683_v29 = vand.u32 3, %v634_v59  ;;  %v4685_v61 = vand.u32 3, %v530_v34 }
 0x1aa   :  { %v625_v17 = vxor.u32 2147483648, %v624_v63  ;;  %v512_v0 = vor.u32 %v511_v13, %v510_v5  ;;  %v515_v40 = vshll.u32 %v514_v41, 23  ;;  %v659_v19 = vand.u32 31, %v657_v22 }
 0x1ab   :  { %v810_v55 = vadd.s32 536870912, %v809_v42  ;;  %v653_v31 = vor.u32 8388608, %v4599_v6  ;;  %vm640_vm11 = vcmp.eq.s32.totalorder %v4683_v29, 2  ;;  %v4696_v47 = vshrl.u32 %v657_v22, 5 }
 0x1ac   :  { %v626_v28 = vsel %vm543_vm15, %v625_v17, %v624_v63  ;;  %v516_v25 = vor.u32 4788187, %v515_v40  ;;  %v660_v62 = vsub.s32 32, %v659_v19  ;;  %v519_v56 = vcvt.s32.f32 %v512_v0 }
 0x1ad   :  { %v629_v27 = vsel %vm4587_vm0, %v4465_v37, %v626_v28  ;;  %v4687_v30 = vshrl.u32 %v810_v55, 30  ;;  %v668_v48 = vshll.u32 %v4385_v10, %v659_v19  ;;  %v4701_v6 = vadd.f32 %v4499_v16, %v4462_v35 }
 0x1ae   :  { %4201 = vcosq.f32 %v629_v27  ;;  %v517_v24 = vand.u32 2147483647, %v516_v25  ;;  %v663_v32 = vshrl.u32 %v4384_v8, %v660_v62  ;;  %v666_v21 = vshrl.u32 %v4385_v10, %v660_v62 }
 0x1af   :  { %4203 = vsinq.f32 %v629_v27  ;;  %v669_v36 = vshrl.u32 %v4386_v12, %v660_v62  ;;  %v672_v38 = vshrl.u32 %v4387_v14, %v660_v62  ;;  %v812_v44 = vshll.u32 %v4687_v30, 30 }
 0x1b0   :  { %v520_v33 = vmul.f32 %v519_v56, %v517_v24  ;;  %vm637_vm12 = vcmp.eq.s32.totalorder %v4683_v29, 0  ;;  %v662_v50 = vshll.u32 %v4383_v4, %v659_v19  ;;  %v665_v51 = vshll.u32 %v4384_v8, %v659_v19 }
 0x1b1   :  { %v671_v54 = vshll.u32 %v4386_v12, %v659_v19  ;;  %vm636_vm13 = vcmp.lt.s32.totalorder %v4683_v29, 2  ;;  %v4708_v57 = vsub.s32 %v809_v42, %v812_v44  ;;  %v670_v63 = vor.u32 %v669_v36, %v668_v48 }
 0x1b2   :  { %v521_v7 = vxor.u32 2147483648, %v520_v33  ;;  %v675_v59 = vshrl.u32 %v4388_v23, %v660_v62  ;;  %v4711_v3 = vshll.u32 %v653_v31, 8  ;;  %vm633_vm14 = vweird.f32 %v4465_v37 }
 0x1b3   :  { %vm751_vm15 = vcmp.lt.s32.totalorder %v4479_v53, 0  ;;  %v664_v11 = vor.u32 %v663_v32, %v662_v50  ;;  %v667_v5 = vor.u32 %v666_v21, %v665_v51  ;;  %v673_v13 = vor.u32 %v672_v38, %v671_v54 }
 0x1b4   :  { %v522_v16 = vsel %vm439_vm1, %v521_v7, %v520_v33  ;;  %v815_v45 = vsub.s32 0, %v4708_v57  ;;  %v661_v17 = vshrl.u32 %v4383_v4, %v660_v62  ;;  %v674_v18 = vshll.u32 %v4387_v14, %v659_v19 }
 0x1b5   :  { %v525_v41 = vsel %vm4624_vm6, %v4468_v39, %v522_v16  ;;  %v835_v0 = vsub.s32 4, %v4687_v30  ;;  %vm677_vm0 = vcmp.lt.s32.totalorder %v4696_v47, 1  ;;  %vm680_vm1 = vcmp.lt.s32.totalorder %v4696_v47, 4 }
 0x1b6   :  { %4205 = vcosq.f32 %v525_v41  ;;  %vm4728_vm2 = vcmp.le.f32.partialorder %v749_v1, 0.7853982  ;;  %v3862_v26 = vmin.u32 %v815_v45, %v4708_v57  ;;  %v676_v22 = vor.u32 %v675_v59, %v674_v18 }
 0x1b7   :  { %4207 = vsinq.f32 %v525_v41  ;;  %v682_v28 = vsel %vm680_vm1, %v670_v63, 2102212464  ;;  %vm678_vm3 = vcmp.lt.s32.totalorder %v4696_v47, 2  ;;  %v685_v19 = vsel %vm677_vm0, %v664_v11, %v667_v5 }
 0x1b8   :  { %v4202_v40 = vpop.eup %4201  ;;  %v686_v27 = vsel %vm680_vm1, %v673_v13, 920167782  ;;  %v817_v25 = vclz %v3862_v26  ;;  %vm679_vm4 = vcmp.lt.s32.totalorder %v4696_v47, 3  ;;  %v681_v55 = vsel %vm677_vm0, %v661_v17, %v664_v11 }
 0x1b9   :  { %v4204_v34 = vpop.eup %4203  ;;  %v641_v42 = vxor.u32 2147483648, %v4202_v40  ;;  %v683_v24 = vsel %vm679_vm4, %v667_v5, %v682_v28  ;;  %v687_v56 = vsel %vm679_vm4, %v670_v63, %v686_v27  ;;  %v689_v31 = vsel %vm677_vm0, %v667_v5, %v670_v63 }
 0x1ba   :  { %v638_v1 = vxor.u32 2147483648, %v4204_v34  ;;  %v3863_v33 = vadd.s32 4294967294, %v817_v25  ;;  %v688_v21 = vsel %vm678_vm3, %v685_v19, %v687_v56  ;;  %v690_v36 = vsel %vm680_vm1, %v676_v22, 1326507024 }
 0x1bb   :  { %v642_v62 = vsel %vm640_vm11, %v641_v42, %v4204_v34  ;;  %vm532_vm5 = vcmp.lt.s32.totalorder %v4685_v61, 2  ;;  %v691_v44 = vsel %vm679_vm4, %v673_v13, %v690_v36  ;;  %v836_v51 = vsel %vm751_vm15, %v835_v0, %v4687_v30 }
 0x1bc   :  { %v639_v32 = vsel %vm637_vm12, %v4202_v40, %v638_v1  ;;  %v4757_v48 = vmul.u32.u64.low %v4711_v3, %v688_v21  ;;  %v4758_v7 = vmul.u32.u64.high %v4711_v3, %v688_v21, %v4757_v48  ;;  %vm3864_vm6 = vcmp.lt.s32.totalorder %v3863_v33, 0 }
 0x1bd   :  { %v643_v38 = vsel %vm636_vm13, %v639_v32, %v642_v62  ;;  %v692_v54 = vsel %vm678_vm3, %v689_v31, %v691_v44  ;;  %vm533_vm7 = vcmp.eq.s32.totalorder %v4685_v61, 0  ;;  %v820_v29 = vsel %vm3864_vm6, 0, %v3863_v33  ;;  %v4795_v62 = vpop.f32.mrb[10].mxu0 }
 0x1be   :  { %v644_v50 = vsel %vm633_vm14, nan, %v643_v38  ;;  %v4769_v63 = vmul.u32.u64.low %v4711_v3, %v692_v54  ;;  %v4770_v59 = vmul.u32.u64.high %v4711_v3, %v692_v54, %v4769_v63  ;;  %v805_v37 = vadd.s32 %v4651_v43, %v4659_v49 }
 0x1bf   :  { %3766 = vst [vmem:[#allocation5 + $0x8] sm:$0xff] %v644_v50  ;;  %v821_v16 = vsub.s32 32, %v820_v29  ;;  %v825_v11 = vsub.s32 4294967266, %v820_v29  ;;  %v684_v5 = vsel %vm678_vm3, %v681_v55, %v683_v24  ;;  %vm536_vm8 = vcmp.eq.s32.totalorder %v4685_v61, 2 }
 0x1c0   :  { %v4206_v30 = vpop.eup %4205  ;;  %v838_v13 = vsel %vm4728_vm2, 0, %v836_v51  ;;  %v703_v41 = vadd.s32 1, %v4758_v7  ;;  %v960_v45 = vand.u32 2139095040, %v4701_v6  ;;  %v822_v0 = vshll.u32 %v4708_v57, %v820_v29 }
 0x1c1   :  { %v4208_v17 = vpop.eup %4207  ;;  %v537_v18 = vxor.u32 2147483648, %v4206_v30  ;;  %v823_v43 = vshrl.u32 %v805_v37, %v821_v16  ;;  %v826_v49 = vadd.s32 127, %v825_v11  ;;  %v700_v47 = vmul.u32 %v4711_v3, %v684_v5 }
 0x1c2   :  { %v534_v40 = vxor.u32 2147483648, %v4208_v17  ;;  %vm702_vm9 = vc.u32 %v4770_v59, %v4757_v48  ;;  %v961_v26 = vshrl.u32 %v960_v45, 23  ;;  %v957_v1 = vand.u32 2147483647, %v4701_v6 }
 0x1c3   :  { %v538_v22 = vsel %vm536_vm8, %v537_v18, %v4208_v17  ;;  %v824_v28 = vor.u32 %v823_v43, %v822_v0  ;;  %v827_v34 = vshll.u32 %v826_v49, 23  ;;  %v704_v42 = vsel %vm702_vm9, %v703_v41, %v4758_v7 }
 0x1c4   :  { %v535_v19 = vsel %vm533_vm7, %v4206_v30, %v534_v40  ;;  %v705_v27 = vadd.s32 %v704_v42, %v700_v47  ;;  %v3869_v57 = vadd.s32 4294967169, %v961_v26  ;;  %vm529_vm10 = vweird.f32 %v4468_v39 }
 0x1c5   :  { %v539_v3 = vsel %vm532_vm5, %v535_v19, %v538_v22  ;;  %v828_v25 = vor.u32 4788187, %v827_v34  ;;  %v4793_v55 = vadd.f32 %v4462_v35, %v4504_v20  ;;  %v831_v33 = vcvt.s32.f32 %v824_v28 }
 0x1c6   :  { %v540_v24 = vsel %vm529_vm10, nan, %v539_v3  ;;  %v706_v56 = vadd.s32 536870912, %v705_v27  ;;  %v967_v31 = vadd.s32 1, %v3869_v57  ;;  %v842_v21 = vadd.s32 3, %v838_v13 }
 0x1c7   :  { %3765 = vst [vmem:[#allocation5] sm:$0xff] %v540_v24  ;;  %v829_v32 = vand.u32 2147483647, %v828_v25  ;;  %v964_v39 = vand.u32 8388607, %v957_v1  ;;  %v856_v44 = vand.u32 2139095040, %v4793_v55  ;;  %v4804_v54 = vadd.s32 %v4757_v48, %v4770_v59 }
 0x1c8   :  { %v707_v36 = vshrl.u32 %v706_v56, 30  ;;  %vm968_vm11 = vcmp.gt.s32.totalorder %v967_v31, 0  ;;  %v4800_v51 = vand.u32 3, %v842_v21  ;;  %vm647_vm12 = vcmp.lt.s32.totalorder %v4490_v2, 0 }
 0x1c9   :  { %v832_v61 = vmul.f32 %v831_v33, %v829_v32  ;;  %v969_v38 = vsel %vm968_vm11, %v967_v31, 0  ;;  %v965_v63 = vor.u32 8388608, %v964_v39  ;;  %v857_v30 = vshrl.u32 %v856_v44, 23 }
 0x1ca   :  { %v708_v20 = vshll.u32 %v707_v36, 30  ;;  %v971_v7 = vand.u32 31, %v969_v38  ;;  %v731_v11 = vsub.s32 4, %v707_v36  ;;  %v970_v43 = vshrl.u32 %v969_v38, 5 }
 0x1cb   :  { %v833_v50 = vxor.u32 2147483648, %v832_v61  ;;  %v4823_v28 = vshll.u32 %v965_v63, 8  ;;  %v853_v34 = vand.u32 2147483647, %v4793_v55  ;;  %v3865_v42 = vadd.s32 4294967169, %v857_v30  ;;  %v4844_v30 = vpop.f32.mrb[11].mxu0 }
 0x1cc   :  { %v4806_v29 = vsub.s32 %v705_v27, %v708_v20  ;;  %v972_v37 = vsub.s32 32, %v971_v7  ;;  %v974_v5 = vshll.u32 %v4383_v4, %v971_v7  ;;  %v977_v48 = vshll.u32 %v4384_v8, %v971_v7 }
 0x1cd   :  { %v834_v16 = vsel %vm751_vm15, %v833_v50, %v832_v61  ;;  %v980_v59 = vshll.u32 %v4385_v10, %v971_v7  ;;  %v983_v60 = vshll.u32 %v4386_v12, %v971_v7  ;;  %vm848_vm13 = vcmp.eq.s32.totalorder %v4800_v51, 2 }
 0x1ce   :  { %v837_v13 = vsel %vm4728_vm2, %v4479_v53, %v834_v16  ;;  %v711_v41 = vsub.s32 0, %v4806_v29  ;;  %v975_v45 = vshrl.u32 %v4384_v8, %v972_v37  ;;  %v978_v17 = vshrl.u32 %v4385_v10, %v972_v37 }
 0x1cf   :  { %4209 = vcosq.f32 %v837_v13  ;;  %v981_v18 = vshrl.u32 %v4386_v12, %v972_v37  ;;  %v984_v26 = vshrl.u32 %v4387_v14, %v972_v37  ;;  %v4829_v19 = vsel %vm647_vm12, %v731_v11, %v707_v36 }
 0x1d0   :  { %4211 = vsinq.f32 %v837_v13  ;;  %v3858_v0 = vmin.u32 %v711_v41, %v4806_v29  ;;  %v976_v49 = vor.u32 %v975_v45, %v974_v5  ;;  %v979_v40 = vor.u32 %v978_v17, %v977_v48 }
 0x1d1   :  { %v982_v47 = vor.u32 %v981_v18, %v980_v59  ;;  %v985_v27 = vor.u32 %v984_v26, %v983_v60  ;;  %v986_v57 = vshll.u32 %v4387_v14, %v971_v7  ;;  %v987_v3 = vshrl.u32 %v4388_v23, %v972_v37 }
 0x1d2   :  { %v713_v22 = vclz %v3858_v0  ;;  %vm845_vm14 = vcmp.eq.s32.totalorder %v4800_v51, 0  ;;  %v973_v24 = vshrl.u32 %v4383_v4, %v972_v37  ;;  %vm989_vm15 = vcmp.lt.s32.totalorder %v970_v43, 1 }
 0x1d3   :  { %vm992_vm0 = vcmp.lt.s32.totalorder %v970_v43, 4  ;;  %vm844_vm1 = vcmp.lt.s32.totalorder %v4800_v51, 2  ;;  %v988_v56 = vor.u32 %v987_v3, %v986_v57  ;;  %vm990_vm2 = vcmp.lt.s32.totalorder %v970_v43, 2 }
 0x1d4   :  { %v3859_v25 = vadd.s32 4294967294, %v713_v22  ;;  %v994_v31 = vsel %vm992_vm0, %v982_v47, 2102212464  ;;  %v997_v32 = vsel %vm989_vm15, %v976_v49, %v979_v40  ;;  %vm841_vm3 = vweird.f32 %v4479_v53 }
 0x1d5   :  { %vm991_vm5 = vcmp.lt.s32.totalorder %v970_v43, 3  ;;  %v993_v33 = vsel %vm989_vm15, %v973_v24, %v976_v49  ;;  %v998_v21 = vsel %vm992_vm0, %v985_v27, 920167782  ;;  %v1001_v61 = vsel %vm989_vm15, %v979_v40, %v982_v47 }
 0x1d6   :  { %vm3860_vm4 = vcmp.lt.s32.totalorder %v3859_v25, 0  ;;  %v999_v39 = vsel %vm991_vm5, %v982_v47, %v998_v21  ;;  %v1002_v38 = vsel %vm992_vm0, %v988_v56, 1326507024  ;;  %v995_v7 = vsel %vm991_vm5, %v979_v40, %v994_v31 }
 0x1d7   :  { %v716_v36 = vsel %vm3860_vm4, 0, %v3859_v25  ;;  %v1000_v50 = vsel %vm990_vm2, %v997_v32, %v999_v39  ;;  %v1003_v16 = vsel %vm991_vm5, %v985_v27, %v1002_v38  ;;  %v996_v47 = vsel %vm990_vm2, %v993_v33, %v995_v7 }
 0x1d8   :  { %v717_v44 = vsub.s32 32, %v716_v36  ;;  %v721_v20 = vsub.s32 4294967266, %v716_v36  ;;  %v718_v37 = vshll.u32 %v4806_v29, %v716_v36  ;;  %v1004_v45 = vsel %vm990_vm2, %v1001_v61, %v1003_v16 }
 0x1d9   :  { %v4210_v63 = vpop.eup %4209  ;;  %v4840_v11 = vmul.u32.u64.low %v4823_v28, %v1000_v50  ;;  %v4841_v5 = vmul.u32.u64.high %v4823_v28, %v1000_v50, %v4840_v11  ;;  %v4849_v18 = vmul.u32.u64.low %v4823_v28, %v1004_v45  ;;  %v4850_v0 = vmul.u32.u64.high %v4823_v28, %v1004_v45, %v4849_v18 }
 0x1da   :  { %v4212_v13 = vpop.eup %4211  ;;  %v849_v41 = vxor.u32 2147483648, %v4210_v63  ;;  %v719_v48 = vshrl.u32 %v4804_v54, %v717_v44  ;;  %v722_v59 = vadd.s32 127, %v721_v20  ;;  %v863_v29 = vadd.s32 1, %v3865_v42 }
 0x1db   :  { %v846_v17 = vxor.u32 2147483648, %v4212_v13  ;;  %v1015_v54 = vadd.s32 1, %v4841_v5  ;;  %v860_v22 = vand.u32 8388607, %v853_v34  ;;  %vm4864_vm7 = vcmp.le.f32.partialorder %v645_v9, 0.7853982 }
 0x1dc   :  { %v850_v60 = vsel %vm848_vm13, %v849_v41, %v4212_v13  ;;  %v720_v49 = vor.u32 %v719_v48, %v718_v37  ;;  %v723_v40 = vshll.u32 %v722_v59, 23  ;;  %vm864_vm6 = vcmp.gt.s32.totalorder %v863_v29, 0 }
 0x1dd   :  { %v847_v26 = vsel %vm845_vm14, %v4210_v63, %v846_v17  ;;  %v865_v57 = vsel %vm864_vm6, %v863_v29, 0  ;;  %v734_v25 = vsel %vm4864_vm7, 0, %v4829_v19  ;;  %v1012_v24 = vmul.u32 %v4823_v28, %v996_v47 }
 0x1de   :  { %v851_v27 = vsel %vm844_vm1, %v847_v26, %v850_v60  ;;  %v724_v43 = vor.u32 4788187, %v723_v40  ;;  %vm1014_vm8 = vc.u32 %v4850_v0, %v4840_v11  ;;  %v727_v9 = vcvt.s32.f32 %v720_v49 }
 0x1df   :  { %v852_v3 = vsel %vm841_vm3, nan, %v851_v27  ;;  %v1016_v56 = vsel %vm1014_vm8, %v1015_v54, %v4841_v5  ;;  %v867_v31 = vand.u32 31, %v865_v57  ;;  %v861_v33 = vor.u32 8388608, %v860_v22 }
 0x1e0   :  { %3768 = vst [vmem:[#allocation5 + $0x18] sm:$0xff] %v852_v3  ;;  %v725_v51 = vand.u32 2147483647, %v724_v43  ;;  %v1017_v32 = vadd.s32 %v1016_v56, %v1012_v24  ;;  %v4879_v53 = vadd.f32 %v4519_v52, %v4462_v35  ;;  %v738_v36 = vadd.s32 3, %v734_v25 }
 0x1e1   :  { %v4881_v19 = vshrl.u32 %v865_v57, 5  ;;  %v868_v28 = vsub.s32 32, %v867_v31  ;;  %v870_v61 = vshll.u32 %v4383_v4, %v867_v31  ;;  %v873_v38 = vshll.u32 %v4384_v8, %v867_v31 }
 0x1e2   :  { %v728_v21 = vmul.f32 %v727_v9, %v725_v51  ;;  %v1018_v39 = vadd.s32 536870912, %v1017_v32  ;;  %v876_v44 = vshll.u32 %v4385_v10, %v867_v31  ;;  %vm959_vm9 = vcmp.lt.s32.totalorder %v4701_v6, 0 }
 0x1e3   :  { %v871_v7 = vshrl.u32 %v4384_v8, %v868_v28  ;;  %v874_v35 = vshrl.u32 %v4385_v10, %v868_v28  ;;  %v879_v52 = vshll.u32 %v4386_v12, %v867_v31  ;;  %v877_v63 = vshrl.u32 %v4386_v12, %v868_v28 }
 0x1e4   :  { %v729_v20 = vxor.u32 2147483648, %v728_v21  ;;  %v1019_v50 = vshrl.u32 %v1018_v39, 30  ;;  %v880_v37 = vshrl.u32 %v4387_v14, %v868_v28  ;;  %v883_v16 = vshrl.u32 %v4388_v23, %v868_v28 }
 0x1e5   :  { %v872_v13 = vor.u32 %v871_v7, %v870_v61  ;;  %v875_v41 = vor.u32 %v874_v35, %v873_v38  ;;  %v882_v48 = vshll.u32 %v4387_v14, %v867_v31  ;;  %v4899_v45 = vand.u32 3, %v738_v36 }
 0x1e6   :  { %v730_v5 = vsel %vm647_vm12, %v729_v20, %v728_v21  ;;  %v1020_v17 = vshll.u32 %v1019_v50, 30  ;;  %v878_v18 = vor.u32 %v877_v63, %v876_v44  ;;  %v881_v29 = vor.u32 %v880_v37, %v879_v52 }
 0x1e7   :  { %v733_v59 = vsel %vm4864_vm7, %v4490_v2, %v730_v5  ;;  %v884_v60 = vor.u32 %v883_v16, %v882_v48  ;;  %vm885_vm10 = vcmp.lt.s32.totalorder %v4881_v19, 1  ;;  %v1043_v40 = vsub.s32 4, %v1019_v50 }
 0x1e8   :  { %4213 = vcosq.f32 %v733_v59  ;;  %v4902_v49 = vsub.s32 %v1017_v32, %v1020_v17  ;;  %vm888_vm11 = vcmp.lt.s32.totalorder %v4881_v19, 4  ;;  %vm887_vm12 = vcmp.lt.s32.totalorder %v4881_v19, 3 }
 0x1e9   :  { %4215 = vsinq.f32 %v733_v59  ;;  %v893_v47 = vsel %vm885_vm10, %v872_v13, %v875_v41  ;;  %v894_v26 = vsel %vm888_vm11, %v881_v29, 920167782  ;;  %v901_v54 = vshll.u32 %v861_v33, 8 }
 0x1ea   :  { %v1023_v22 = vsub.s32 0, %v4902_v49  ;;  %v869_v27 = vshrl.u32 %v4383_v4, %v868_v28  ;;  %vm886_vm13 = vcmp.lt.s32.totalorder %v4881_v19, 2  ;;  %v895_v42 = vsel %vm887_vm12, %v878_v18, %v894_v26 }
 0x1eb   :  { %v890_v43 = vsel %vm888_vm11, %v878_v18, 2102212464  ;;  %v896_v57 = vsel %vm886_vm13, %v893_v47, %v895_v42  ;;  %v897_v3 = vsel %vm885_vm10, %v875_v41, %v878_v18  ;;  %v898_v25 = vsel %vm888_vm11, %v884_v60, 1326507024  ;;  %v4958_v60 = vpop.f32.mrb[12].mxu0 }
 0x1ec   :  { %v3870_v24 = vmin.u32 %v1023_v22, %v4902_v49  ;;  %v1044_v51 = vsel %vm959_vm9, %v1043_v40, %v1019_v50  ;;  %v899_v9 = vsel %vm887_vm12, %v881_v29, %v898_v25  ;;  %v1168_v56 = vand.u32 2139095040, %v4879_v53 }
 0x1ed   :  { %vm4925_vm14 = vcmp.le.f32.partialorder %v957_v1, 0.7853982  ;;  %v900_v32 = vsel %vm886_vm13, %v897_v3, %v899_v9  ;;  %v4931_v33 = vmul.u32.u64.low %v901_v54, %v896_v57  ;;  %v4932_v21 = vmul.u32.u64.high %v901_v54, %v896_v57, %v4931_v33  ;;  %v4971_v57 = vld [vmem:[%s7096_s2] ss:$0 sm:$0xff] }
 0x1ee   :  { %v1025_v36 = vclz %v3870_v24  ;;  %v889_v28 = vsel %vm885_vm10, %v869_v27, %v872_v13  ;;  %v891_v39 = vsel %vm887_vm12, %v875_v41, %v890_v43  ;;  %v1165_v61 = vand.u32 2147483647, %v4879_v53 }
 0x1ef   :  { %v1046_v1 = vsel %vm4925_vm14, 0, %v1044_v51  ;;  %v4942_v38 = vmul.u32.u64.low %v901_v54, %v900_v32  ;;  %v4943_v44 = vmul.u32.u64.high %v901_v54, %v900_v32, %v4942_v38  ;;  %v1169_v20 = vshrl.u32 %v1168_v56, 23 }
 0x1f0   :  { %vm737_vm15 = vweird.f32 %v4490_v2  ;;  %vm740_vm0 = vcmp.lt.s32.totalorder %v4899_v45, 2  ;;  %vm741_vm1 = vcmp.eq.s32.totalorder %v4899_v45, 0  ;;  %v3871_v7 = vadd.s32 4294967294, %v1025_v36 }
 0x1f1   :  { %vm744_vm2 = vcmp.eq.s32.totalorder %v4899_v45, 2  ;;  %v892_v52 = vsel %vm886_vm13, %v889_v28, %v891_v39  ;;  %v911_v50 = vadd.s32 1, %v4932_v21  ;;  %v3877_v63 = vadd.s32 4294967169, %v1169_v20 }
 0x1f2   :  { %v4214_v35 = vpop.eup %4213  ;;  %v1013_v5 = vadd.s32 %v4840_v11, %v4850_v0  ;;  %vm3872_vm3 = vcmp.lt.s32.totalorder %v3871_v7, 0  ;;  %v1050_v13 = vadd.s32 3, %v1046_v1  ;;  %vm910_vm4 = vc.u32 %v4943_v44, %v4931_v33 }
 0x1f3   :  { %v4216_v37 = vpop.eup %4215  ;;  %v745_v16 = vxor.u32 2147483648, %v4214_v35  ;;  %v1028_v48 = vsel %vm3872_vm3, 0, %v3871_v7  ;;  %v1172_v59 = vand.u32 8388607, %v1165_v61  ;;  %v908_v29 = vmul.u32 %v901_v54, %v892_v52 }
 0x1f4   :  { %v742_v41 = vxor.u32 2147483648, %v4216_v37  ;;  %v1029_v17 = vsub.s32 32, %v1028_v48  ;;  %v1033_v18 = vsub.s32 4294967266, %v1028_v48  ;;  %v1030_v11 = vshll.u32 %v4902_v49, %v1028_v48 }
 0x1f5   :  { %v746_v19 = vsel %vm744_vm2, %v745_v16, %v4216_v37  ;;  %v912_v0 = vsel %vm910_vm4, %v911_v50, %v4932_v21  ;;  %v1175_v47 = vadd.s32 1, %v3877_v63  ;;  %v1173_v54 = vor.u32 8388608, %v1172_v59 }
 0x1f6   :  { %v743_v40 = vsel %vm741_vm1, %v4214_v35, %v742_v41  ;;  %v1031_v22 = vshrl.u32 %v1013_v5, %v1029_v17  ;;  %v1034_v27 = vadd.s32 127, %v1033_v18  ;;  %v913_v42 = vadd.s32 %v912_v0, %v908_v29 }
 0x1f7   :  { %v747_v26 = vsel %vm740_vm0, %v743_v40, %v746_v19  ;;  %vm1176_vm5 = vcmp.gt.s32.totalorder %v1175_v47, 0  ;;  %v4975_v49 = vadd.f32 %v4971_v57, %v4530_v58  ;;  %v4977_v56 = vand.u32 3, %v1050_v13 }
 0x1f8   :  { %v748_v43 = vsel %vm737_vm15, nan, %v747_v26  ;;  %v1032_v45 = vor.u32 %v1031_v22, %v1030_v11  ;;  %v1035_v3 = vshll.u32 %v1034_v27, 23  ;;  %v914_v25 = vadd.s32 536870912, %v913_v42 }
 0x1f9   :  { %3767 = vst [vmem:[#allocation5 + $0x10] sm:$0xff] %v748_v43  ;;  %v1177_v24 = vsel %vm1176_vm5, %v1175_v47, 0  ;;  %vm855_vm6 = vcmp.lt.s32.totalorder %v4793_v55, 0  ;;  %v4980_v21 = vshll.u32 %v1173_v54, 8  ;;  %v1061_v58 = vand.u32 2147483647, %v4975_v49 }
 0x1fa   :  { %v1179_v51 = vand.u32 31, %v1177_v24  ;;  %v1036_v9 = vor.u32 4788187, %v1035_v3  ;;  %v915_v2 = vshrl.u32 %v914_v25, 30  ;;  %v1039_v28 = vcvt.s32.f32 %v1032_v45 }
 0x1fb   :  { %v1064_v7 = vand.u32 2139095040, %v4975_v49  ;;  %v1178_v16 = vshrl.u32 %v1177_v24, 5  ;;  %vm5001_vm7 = vcmp.le.f32.partialorder %v853_v34, 0.7853982  ;;  %vm1052_vm13 = vcmp.lt.s32.totalorder %v4977_v56, 2 }
 0x1fc   :  { %v1180_v32 = vsub.s32 32, %v1179_v51  ;;  %v1037_v36 = vand.u32 2147483647, %v1036_v9  ;;  %v916_v39 = vshll.u32 %v915_v2, 30  ;;  %v1182_v50 = vshll.u32 %v4383_v4, %v1179_v51 }
 0x1fd   :  { %v939_v37 = vsub.s32 4, %v915_v2  ;;  %v1185_v5 = vshll.u32 %v4384_v8, %v1179_v51  ;;  %v1188_v13 = vshll.u32 %v4385_v10, %v1179_v51  ;;  %v1191_v19 = vshll.u32 %v4386_v12, %v1179_v51 }
 0x1fe   :  { %v1183_v1 = vshrl.u32 %v4384_v8, %v1180_v32  ;;  %v1186_v38 = vshrl.u32 %v4385_v10, %v1180_v32  ;;  %v1189_v20 = vshrl.u32 %v4386_v12, %v1180_v32  ;;  %v1040_v35 = vmul.f32 %v1039_v28, %v1037_v36 }
 0x1ff   :  { %v4987_v52 = vsub.s32 %v913_v42, %v916_v39  ;;  %v1192_v63 = vshrl.u32 %v4387_v14, %v1180_v32  ;;  %v1194_v29 = vshll.u32 %v4387_v14, %v1179_v51  ;;  %v1195_v40 = vshrl.u32 %v4388_v23, %v1180_v32 }
 0x200   :  { %v1041_v41 = vxor.u32 2147483648, %v1040_v35  ;;  %v1184_v59 = vor.u32 %v1183_v1, %v1182_v50  ;;  %v1187_v17 = vor.u32 %v1186_v38, %v1185_v5  ;;  %v1190_v18 = vor.u32 %v1189_v20, %v1188_v13 }
 0x201   :  { %v919_v48 = vsub.s32 0, %v4987_v52  ;;  %v1193_v26 = vor.u32 %v1192_v63, %v1191_v19  ;;  %v1065_v22 = vshrl.u32 %v1064_v7, 23  ;;  %v940_v42 = vsel %vm855_vm6, %v939_v37, %v915_v2  ;;  %v5012_v2 = vpop.f32.mrb[13].mxu0 }
 0x202   :  { %v1042_v11 = vsel %vm959_vm9, %v1041_v41, %v1040_v35  ;;  %v1181_v43 = vshrl.u32 %v4383_v4, %v1180_v32  ;;  %v1196_v54 = vor.u32 %v1195_v40, %v1194_v29  ;;  %vm1197_vm8 = vcmp.lt.s32.totalorder %v1178_v16, 1 }
 0x203   :  { %v3866_v47 = vmin.u32 %v919_v48, %v4987_v52  ;;  %v1045_v27 = vsel %vm4925_vm14, %v4701_v6, %v1042_v11  ;;  %vm1200_vm9 = vcmp.lt.s32.totalorder %v1178_v16, 4  ;;  %vm1198_vm10 = vcmp.lt.s32.totalorder %v1178_v16, 2 }
 0x204   :  { %4217 = vcosq.f32 %v1045_v27  ;;  %v1202_v34 = vsel %vm1200_vm9, %v1190_v18, 2102212464  ;;  %v1205_v3 = vsel %vm1197_vm8, %v1184_v59, %v1187_v17  ;;  %vm1199_vm11 = vcmp.lt.s32.totalorder %v1178_v16, 3 }
 0x205   :  { %v921_v45 = vclz %v3866_v47  ;;  %4219 = vsinq.f32 %v1045_v27  ;;  %v1206_v24 = vsel %vm1200_vm9, %v1193_v26, 920167782  ;;  %v1209_v51 = vsel %vm1197_vm8, %v1187_v17, %v1190_v18 }
 0x206   :  { %v1201_v31 = vsel %vm1197_vm8, %v1181_v43, %v1184_v59  ;;  %v1207_v9 = vsel %vm1199_vm11, %v1190_v18, %v1206_v24  ;;  %v1210_v36 = vsel %vm1200_vm9, %v1196_v54, 1326507024  ;;  %v3873_v28 = vadd.s32 4294967169, %v1065_v22 }
 0x207   :  { %v3867_v25 = vadd.s32 4294967294, %v921_v45  ;;  %v1203_v32 = vsel %vm1199_vm11, %v1187_v17, %v1202_v34  ;;  %v1208_v39 = vsel %vm1198_vm10, %v1205_v3, %v1207_v9  ;;  %v1211_v1 = vsel %vm1199_vm11, %v1193_v26, %v1210_v36 }
 0x208   :  { %v1212_v20 = vsel %vm1198_vm10, %v1209_v51, %v1211_v1  ;;  %v5017_v7 = vmul.u32.u64.low %v4980_v21, %v1208_v39  ;;  %v5018_v35 = vmul.u32.u64.high %v4980_v21, %v1208_v39, %v5017_v7  ;;  %v909_v50 = vadd.s32 %v4931_v33, %v4943_v44 }
 0x209   :  { %vm3868_vm12 = vcmp.lt.s32.totalorder %v3867_v25, 0  ;;  %v1071_v5 = vadd.s32 1, %v3873_v28  ;;  %vm1049_vm14 = vweird.f32 %v4701_v6  ;;  %v942_v13 = vsel %vm5001_vm7, 0, %v940_v42 }
 0x20a   :  { %v924_v38 = vsel %vm3868_vm12, 0, %v3867_v25  ;;  %v1204_v41 = vsel %vm1198_vm10, %v1201_v31, %v1203_v32  ;;  %v5029_v48 = vmul.u32.u64.low %v4980_v21, %v1212_v20  ;;  %v5030_v59 = vmul.u32.u64.high %v4980_v21, %v1212_v20, %v5029_v48 }
 0x20b   :  { %v925_v63 = vsub.s32 32, %v924_v38  ;;  %v929_v37 = vsub.s32 4294967266, %v924_v38  ;;  %v926_v19 = vshll.u32 %v4987_v52, %v924_v38  ;;  %vm1072_vm15 = vcmp.gt.s32.totalorder %v1071_v5, 0 }
 0x20c   :  { %vm1053_vm0 = vcmp.eq.s32.totalorder %v4977_v56, 0  ;;  %v1223_v33 = vadd.s32 1, %v5018_v35  ;;  %v1068_v44 = vand.u32 8388607, %v1061_v58  ;;  %v1073_v29 = vsel %vm1072_vm15, %v1071_v5, 0 }
 0x20d   :  { %v927_v17 = vshrl.u32 %v909_v50, %v925_v63  ;;  %v930_v18 = vadd.s32 127, %v929_v37  ;;  %v946_v47 = vadd.s32 3, %v942_v13  ;;  %v1075_v26 = vand.u32 31, %v1073_v29 }
 0x20e   :  { %v4218_v40 = vpop.eup %4217  ;;  %v1220_v52 = vmul.u32 %v4980_v21, %v1204_v41  ;;  %vm1222_vm1 = vc.u32 %v5030_v59, %v5017_v7  ;;  %v5042_v42 = vadd.f32 %v4971_v57, %v4577_v15  ;;  %vm1056_vm2 = vcmp.eq.s32.totalorder %v4977_v56, 2 }
 0x20f   :  { %v928_v16 = vor.u32 %v927_v17, %v926_v19  ;;  %v931_v11 = vshll.u32 %v930_v18, 23  ;;  %v4220_v22 = vpop.eup %4219  ;;  %v1057_v27 = vxor.u32 2147483648, %v4218_v40  ;;  %v1224_v45 = vsel %vm1222_vm1, %v1223_v33, %v5018_v35 }
 0x210   :  { %v1054_v43 = vxor.u32 2147483648, %v4220_v22  ;;  %v1225_v3 = vadd.s32 %v1224_v45, %v1220_v52  ;;  %v1069_v25 = vor.u32 8388608, %v1068_v44  ;;  %v1076_v24 = vsub.s32 32, %v1075_v26 }
 0x211   :  { %v932_v54 = vor.u32 4788187, %v931_v11  ;;  %v1058_v34 = vsel %vm1056_vm2, %v1057_v27, %v4220_v22  ;;  %v935_v31 = vcvt.s32.f32 %v928_v16  ;;  %v5048_v9 = vand.u32 3, %v946_v47 }
 0x212   :  { %v1055_v21 = vsel %vm1053_vm0, %v4218_v40, %v1054_v43  ;;  %v1226_v36 = vadd.s32 536870912, %v1225_v3  ;;  %v1079_v28 = vshrl.u32 %v4384_v8, %v1076_v24  ;;  %v1376_v32 = vand.u32 2139095040, %v5042_v42 }
 0x213   :  { %v933_v51 = vand.u32 2147483647, %v932_v54  ;;  %v1059_v15 = vsel %vm1052_vm13, %v1055_v21, %v1058_v34  ;;  %v1082_v38 = vshrl.u32 %v4385_v10, %v1076_v24  ;;  %v1085_v20 = vshrl.u32 %v4386_v12, %v1076_v24 }
 0x214   :  { %v1060_v39 = vsel %vm1049_vm14, nan, %v1059_v15  ;;  %v5058_v35 = vshrl.u32 %v1226_v36, 30  ;;  %v1078_v50 = vshll.u32 %v4383_v4, %v1075_v26  ;;  %v1084_v56 = vshll.u32 %v4385_v10, %v1075_v26 }
 0x215   :  { %v936_v1 = vmul.f32 %v935_v31, %v933_v51  ;;  %3770 = vst [vmem:[#allocation5 + $0x28] sm:$0xff] %v1060_v39  ;;  %v1088_v63 = vshrl.u32 %v4387_v14, %v1076_v24  ;;  %v1074_v5 = vshrl.u32 %v1073_v29, 5  ;;  %v1081_v13 = vshll.u32 %v4384_v8, %v1075_v26 }
 0x216   :  { %v1087_v6 = vshll.u32 %v4386_v12, %v1075_v26  ;;  %v1228_v41 = vshll.u32 %v5058_v35, 30  ;;  %v1080_v48 = vor.u32 %v1079_v28, %v1078_v50  ;;  %v1086_v19 = vor.u32 %v1085_v20, %v1084_v56 }
 0x217   :  { %v937_v37 = vxor.u32 2147483648, %v936_v1  ;;  %v1091_v17 = vshrl.u32 %v4388_v23, %v1076_v24  ;;  %v1083_v33 = vor.u32 %v1082_v38, %v1081_v13  ;;  %v1090_v40 = vshll.u32 %v4387_v14, %v1075_v26 }
 0x218   :  { %v1089_v44 = vor.u32 %v1088_v63, %v1087_v6  ;;  %v5073_v16 = vsub.s32 %v1225_v3, %v1228_v41  ;;  %v1109_v11 = vshll.u32 %v1069_v25, 8  ;;  %v1377_v47 = vshrl.u32 %v1376_v32, 23 }
 0x219   :  { %v938_v18 = vsel %vm855_vm6, %v937_v37, %v936_v1  ;;  %v1077_v22 = vshrl.u32 %v4383_v4, %v1076_v24  ;;  %v1092_v27 = vor.u32 %v1091_v17, %v1090_v40  ;;  %vm1096_vm3 = vcmp.lt.s32.totalorder %v1074_v5, 4 }
 0x21a   :  { %v941_v29 = vsel %vm5001_vm7, %v4793_v55, %v938_v18  ;;  %v1231_v52 = vsub.s32 0, %v5073_v16  ;;  %vm1093_vm4 = vcmp.lt.s32.totalorder %v1074_v5, 1  ;;  %v1098_v43 = vsel %vm1096_vm3, %v1086_v19, 2102212464 }
 0x21b   :  { %4221 = vcosq.f32 %v941_v29  ;;  %vm1094_vm5 = vcmp.lt.s32.totalorder %v1074_v5, 2  ;;  %vm1095_vm6 = vcmp.lt.s32.totalorder %v1074_v5, 3  ;;  %v1101_v26 = vsel %vm1093_vm4, %v1080_v48, %v1083_v33 }
 0x21c   :  { %4223 = vsinq.f32 %v941_v29  ;;  %v1102_v54 = vsel %vm1096_vm3, %v1089_v44, 920167782  ;;  %v3878_v0 = vmin.u32 %v1231_v52, %v5073_v16  ;;  %v1097_v45 = vsel %vm1093_vm4, %v1077_v22, %v1080_v48  ;;  %v5114_v52 = vpop.f32.mrb[14].mxu0 }
 0x21d   :  { %v1099_v34 = vsel %vm1095_vm6, %v1083_v33, %v1098_v43  ;;  %v1103_v3 = vsel %vm1095_vm6, %v1086_v19, %v1102_v54  ;;  %v1105_v21 = vsel %vm1093_vm4, %v1083_v33, %v1086_v19  ;;  %v1106_v24 = vsel %vm1096_vm3, %v1092_v27, 1326507024 }
 0x21e   :  { %v1104_v25 = vsel %vm1094_vm5, %v1101_v26, %v1103_v3  ;;  %v3885_v51 = vadd.s32 4294967169, %v1377_v47  ;;  %v1233_v31 = vclz %v3878_v0  ;;  %v1107_v15 = vsel %vm1095_vm6, %v1089_v44, %v1106_v24 }
 0x21f   :  { %v5079_v36 = vmul.u32.u64.low %v1109_v11, %v1104_v25  ;;  %v5080_v28 = vmul.u32.u64.high %v1109_v11, %v1104_v25, %v5079_v36  ;;  %vm945_vm7 = vweird.f32 %v4793_v55  ;;  %vm1167_vm8 = vcmp.lt.s32.totalorder %v4879_v53, 0 }
 0x220   :  { %v3879_v32 = vadd.s32 4294967294, %v1233_v31  ;;  %v1100_v39 = vsel %vm1094_vm5, %v1097_v45, %v1099_v34  ;;  %v1108_v1 = vsel %vm1094_vm5, %v1105_v21, %v1107_v15  ;;  %v1383_v38 = vadd.s32 1, %v3885_v51 }
 0x221   :  { %vm949_vm9 = vcmp.eq.s32.totalorder %v5048_v9, 0  ;;  %v5088_v20 = vmul.u32.u64.low %v1109_v11, %v1108_v1  ;;  %v5089_v50 = vmul.u32.u64.high %v1109_v11, %v1108_v1, %v5088_v20  ;;  %v1373_v56 = vand.u32 2147483647, %v5042_v42 }
 0x222   :  { %vm952_vm10 = vcmp.eq.s32.totalorder %v5048_v9, 2  ;;  %v1221_v63 = vadd.s32 %v5017_v7, %v5030_v59  ;;  %vm3880_vm11 = vcmp.lt.s32.totalorder %v3879_v32, 0  ;;  %vm1384_vm12 = vcmp.gt.s32.totalorder %v1383_v38, 0 }
 0x223   :  { %v1236_v13 = vsel %vm3880_vm11, 0, %v3879_v32  ;;  %v1251_v5 = vsub.s32 4, %v5058_v35  ;;  %v1116_v6 = vmul.u32 %v1109_v11, %v1100_v39  ;;  %v1119_v41 = vadd.s32 1, %v5080_v28 }
 0x224   :  { %vm5099_vm13 = vcmp.le.f32.partialorder %v1165_v61, 0.7853982  ;;  %v1237_v18 = vsub.s32 32, %v1236_v13  ;;  %v1241_v33 = vsub.s32 4294967266, %v1236_v13  ;;  %v1385_v7 = vsel %vm1384_vm12, %v1383_v38, 0 }
 0x225   :  { %v4222_v37 = vpop.eup %4221  ;;  %v1238_v44 = vshll.u32 %v5073_v16, %v1236_v13  ;;  %vm1118_vm14 = vc.u32 %v5089_v50, %v5079_v36  ;;  %v1380_v40 = vand.u32 8388607, %v1373_v56  ;;  %vm948_vm15 = vcmp.lt.s32.totalorder %v5048_v9, 2 }
 0x226   :  { %v4224_v48 = vpop.eup %4223  ;;  %v953_v19 = vxor.u32 2147483648, %v4222_v37  ;;  %v1239_v11 = vshrl.u32 %v1221_v63, %v1237_v18  ;;  %v1242_v61 = vadd.s32 127, %v1241_v33  ;;  %v1120_v47 = vsel %vm1118_vm14, %v1119_v41, %v5080_v28 }
 0x227   :  { %v950_v59 = vxor.u32 2147483648, %v4224_v48  ;;  %v1121_v27 = vadd.s32 %v1120_v47, %v1116_v6  ;;  %v1387_v16 = vand.u32 31, %v1385_v7  ;;  %v5118_v0 = vadd.f32 %v4971_v57, %v4655_v46 }
 0x228   :  { %v954_v29 = vsel %vm952_vm10, %v953_v19, %v4224_v48  ;;  %v1240_v26 = vor.u32 %v1239_v11, %v1238_v44  ;;  %v1243_v54 = vshll.u32 %v1242_v61, 23  ;;  %v1252_v34 = vsel %vm1167_vm8, %v1251_v5, %v5058_v35 }
 0x229   :  { %v951_v22 = vsel %vm949_vm9, %v4222_v37, %v950_v59  ;;  %v1122_v9 = vadd.s32 536870912, %v1121_v27  ;;  %v1388_v3 = vsub.s32 32, %v1387_v16  ;;  %v1381_v24 = vor.u32 8388608, %v1380_v40 }
 0x22a   :  { %v955_v43 = vsel %vm948_vm15, %v951_v22, %v954_v29  ;;  %v1244_v25 = vor.u32 4788187, %v1243_v54  ;;  %v1247_v21 = vcvt.s32.f32 %v1240_v26  ;;  %v1390_v51 = vshll.u32 %v4383_v4, %v1387_v16 }
 0x22b   :  { %v956_v45 = vsel %vm945_vm7, nan, %v955_v43  ;;  %v1123_v31 = vshrl.u32 %v1122_v9, 30  ;;  %v1391_v15 = vshrl.u32 %v4384_v8, %v1388_v3  ;;  %v1393_v46 = vshll.u32 %v4384_v8, %v1387_v16 }
 0x22c   :  { %3769 = vst [vmem:[#allocation5 + $0x20] sm:$0xff] %v956_v45  ;;  %v1394_v55 = vshrl.u32 %v4385_v10, %v1388_v3  ;;  %v1245_v28 = vand.u32 2147483647, %v1244_v25  ;;  %v1397_v32 = vshrl.u32 %v4386_v12, %v1388_v3  ;;  %v1399_v35 = vshll.u32 %v4386_v12, %v1387_v16 }
 0x22d   :  { %v1400_v39 = vshrl.u32 %v4387_v14, %v1388_v3  ;;  %v1254_v1 = vsel %vm5099_vm13, 0, %v1252_v34  ;;  %v1124_v38 = vshll.u32 %v1123_v31, 30  ;;  %v1386_v20 = vshrl.u32 %v1385_v7, 5 }
 0x22e   :  { %v1396_v63 = vshll.u32 %v4385_v10, %v1387_v16  ;;  %v1248_v37 = vmul.f32 %v1247_v21, %v1245_v28  ;;  %v1392_v13 = vor.u32 %v1391_v15, %v1390_v51  ;;  %v1395_v5 = vor.u32 %v1394_v55, %v1393_v46 }
 0x22f   :  { %v1401_v6 = vor.u32 %v1400_v39, %v1399_v35  ;;  %v5135_v41 = vsub.s32 %v1121_v27, %v1124_v38  ;;  %v1402_v19 = vshll.u32 %v4387_v14, %v1387_v16  ;;  %v1403_v18 = vshrl.u32 %v4388_v23, %v1388_v3 }
 0x230   :  { %v1398_v48 = vor.u32 %v1397_v32, %v1396_v63  ;;  %v1249_v33 = vxor.u32 2147483648, %v1248_v37  ;;  %v1258_v59 = vadd.s32 3, %v1254_v1  ;;  %v1421_v44 = vshll.u32 %v1381_v24, 8 }
 0x231   :  { %v1272_v40 = vand.u32 2139095040, %v5118_v0  ;;  %v1127_v7 = vsub.s32 0, %v5135_v41  ;;  %v1404_v29 = vor.u32 %v1403_v18, %v1402_v19  ;;  %vm1405_vm0 = vcmp.lt.s32.totalorder %v1386_v20, 1 }
 0x232   :  { %vm1408_vm1 = vcmp.lt.s32.totalorder %v1386_v20, 4  ;;  %v1250_v11 = vsel %vm1167_vm8, %v1249_v33, %v1248_v37  ;;  %v1389_v61 = vshrl.u32 %v4383_v4, %v1388_v3  ;;  %vm1407_vm2 = vcmp.lt.s32.totalorder %v1386_v20, 3 }
 0x233   :  { %v1414_v47 = vsel %vm1408_vm1, %v1401_v6, 920167782  ;;  %v1253_v22 = vsel %vm5099_vm13, %v4879_v53, %v1250_v11  ;;  %v3874_v27 = vmin.u32 %v1127_v7, %v5135_v41  ;;  %v1410_v16 = vsel %vm1408_vm1, %v1398_v48, 2102212464 }
 0x234   :  { %v1413_v43 = vsel %vm1405_vm0, %v1392_v13, %v1395_v5  ;;  %4225 = vcosq.f32 %v1253_v22  ;;  %v1415_v26 = vsel %vm1407_vm2, %v1398_v48, %v1414_v47  ;;  %v1417_v54 = vsel %vm1405_vm0, %v1395_v5, %v1398_v48 }
 0x235   :  { %v1418_v45 = vsel %vm1408_vm1, %v1404_v29, 1326507024  ;;  %4227 = vsinq.f32 %v1253_v22  ;;  %v1129_v34 = vclz %v3874_v27  ;;  %v1147_v9 = vsub.s32 4, %v1123_v31 }
 0x236   :  { %vm1406_vm3 = vcmp.lt.s32.totalorder %v1386_v20, 2  ;;  %v1409_v3 = vsel %vm1405_vm0, %v1389_v61, %v1392_v13  ;;  %v1411_v17 = vsel %vm1407_vm2, %v1395_v5, %v1410_v16  ;;  %v1419_v21 = vsel %vm1407_vm2, %v1401_v6, %v1418_v45 }
 0x237   :  { %v1416_v25 = vsel %vm1406_vm3, %v1413_v43, %v1415_v26  ;;  %v3875_v24 = vadd.s32 4294967294, %v1129_v34  ;;  %v1420_v51 = vsel %vm1406_vm3, %v1417_v54, %v1419_v21  ;;  %vm1063_vm4 = vcmp.lt.s32.totalorder %v4975_v49, 0  ;;  %v5181_v26 = vpop.f32.mrb[15].mxu0 }
 0x238   :  { %v5154_v15 = vmul.u32.u64.low %v1421_v44, %v1416_v25  ;;  %v5155_v46 = vmul.u32.u64.high %v1421_v44, %v1416_v25, %v5154_v15  ;;  %v5159_v55 = vmul.u32.u64.low %v1421_v44, %v1420_v51  ;;  %v5160_v28 = vmul.u32.u64.high %v1421_v44, %v1420_v51, %v5159_v55 }
 0x239   :  { %v1273_v32 = vshrl.u32 %v1272_v40, 23  ;;  %vm3876_vm5 = vcmp.lt.s32.totalorder %v3875_v24, 0  ;;  %v1148_v35 = vsel %vm1063_vm4, %v1147_v9, %v1123_v31  ;;  %v1412_v39 = vsel %vm1406_vm3, %v1409_v3, %v1411_v17 }
 0x23a   :  { %v1259_v1 = vand.u32 3, %v1258_v59  ;;  %vm5166_vm6 = vcmp.le.f32.partialorder %v1061_v58, 0.7853982  ;;  %v1132_v20 = vsel %vm3876_vm5, 0, %v3875_v24  ;;  %v1117_v37 = vadd.s32 %v5079_v36, %v5089_v50 }
 0x23b   :  { %v3881_v63 = vadd.s32 4294967169, %v1273_v32  ;;  %v1133_v13 = vsub.s32 32, %v1132_v20  ;;  %v1137_v5 = vsub.s32 4294967266, %v1132_v20  ;;  %v1431_v6 = vadd.s32 1, %v5155_v46 }
 0x23c   :  { %v1150_v31 = vsel %vm5166_vm6, 0, %v1148_v35  ;;  %v1428_v48 = vmul.u32 %v1421_v44, %v1412_v39  ;;  %vm1430_vm7 = vc.u32 %v5160_v28, %v5154_v15  ;;  %v1134_v19 = vshll.u32 %v5135_v41, %v1132_v20 }
 0x23d   :  { %v1279_v58 = vadd.s32 1, %v3881_v63  ;;  %v1135_v18 = vshrl.u32 %v1117_v37, %v1133_v13  ;;  %v1138_v33 = vadd.s32 127, %v1137_v5  ;;  %v1432_v59 = vsel %vm1430_vm7, %v1431_v6, %v5155_v46 }
 0x23e   :  { %v4226_v40 = vpop.eup %4225  ;;  %vm1264_vm8 = vcmp.eq.s32.totalorder %v1259_v1, 2  ;;  %v1433_v36 = vadd.s32 %v1432_v59, %v1428_v48  ;;  %v1269_v50 = vand.u32 2147483647, %v5118_v0  ;;  %v1154_v22 = vadd.s32 3, %v1150_v31 }
 0x23f   :  { %vm1280_vm9 = vcmp.gt.s32.totalorder %v1279_v58, 0  ;;  %v4228_v7 = vpop.eup %4227  ;;  %v1265_v29 = vxor.u32 2147483648, %v4226_v40  ;;  %v1136_v11 = vor.u32 %v1135_v18, %v1134_v19  ;;  %v1139_v44 = vshll.u32 %v1138_v33, 23 }
 0x240   :  { %v1281_v61 = vsel %vm1280_vm9, %v1279_v58, 0  ;;  %v1262_v47 = vxor.u32 2147483648, %v4228_v7  ;;  %v1434_v27 = vadd.s32 536870912, %v1433_v36  ;;  %vm1257_vm10 = vweird.f32 %v4879_v53 }
 0x241   :  { %v1283_v16 = vand.u32 31, %v1281_v61  ;;  %vm1261_vm11 = vcmp.eq.s32.totalorder %v1259_v1, 0  ;;  %v1266_v41 = vsel %vm1264_vm8, %v1265_v29, %v4228_v7  ;;  %v1140_v43 = vor.u32 4788187, %v1139_v44 }
 0x242   :  { %vm1260_vm12 = vcmp.lt.s32.totalorder %v1259_v1, 2  ;;  %v1263_v54 = vsel %vm1261_vm11, %v4226_v40, %v1262_v47  ;;  %v5183_v45 = vshrl.u32 %v1434_v27, 30  ;;  %v1143_v17 = vcvt.s32.f32 %v1136_v11 }
 0x243   :  { %v1284_v34 = vsub.s32 32, %v1283_v16  ;;  %v1267_v9 = vsel %vm1260_vm12, %v1263_v54, %v1266_v41  ;;  %v1141_v3 = vand.u32 2147483647, %v1140_v43  ;;  %v1276_v25 = vand.u32 8388607, %v1269_v50 }
 0x244   :  { %v1268_v21 = vsel %vm1257_vm10, nan, %v1267_v9  ;;  %v5187_v24 = vand.u32 3, %v1154_v22  ;;  %v1436_v53 = vshll.u32 %v5183_v45, 30  ;;  %v5192_v51 = vadd.f32 %v4971_v57, %v4795_v62 }
 0x245   :  { %3772 = vst [vmem:[#allocation5 + $0x38] sm:$0xff] %v1268_v21  ;;  %v1144_v46 = vmul.f32 %v1143_v17, %v1141_v3  ;;  %v1287_v55 = vshrl.u32 %v4384_v8, %v1284_v34  ;;  %v1290_v32 = vshrl.u32 %v4385_v10, %v1284_v34  ;;  %v1293_v35 = vshrl.u32 %v4386_v12, %v1284_v34 }
 0x246   :  { %v5197_v39 = vsub.s32 %v1433_v36, %v1436_v53  ;;  %v1286_v1 = vshll.u32 %v4383_v4, %v1283_v16  ;;  %v1289_v20 = vshll.u32 %v4384_v8, %v1283_v16  ;;  %v1296_v63 = vshrl.u32 %v4387_v14, %v1284_v34 }
 0x247   :  { %v1145_v37 = vxor.u32 2147483648, %v1144_v46  ;;  %v1277_v13 = vor.u32 8388608, %v1276_v25  ;;  %v1282_v62 = vshrl.u32 %v1281_v61, 5  ;;  %v1292_v5 = vshll.u32 %v4385_v10, %v1283_v16 }
 0x248   :  { %v1439_v6 = vsub.s32 0, %v5197_v39  ;;  %v1288_v31 = vor.u32 %v1287_v55, %v1286_v1  ;;  %v1291_v48 = vor.u32 %v1290_v32, %v1289_v20  ;;  %v1295_v58 = vshll.u32 %v4386_v12, %v1283_v16 }
 0x249   :  { %v1146_v19 = vsel %vm1063_vm4, %v1145_v37, %v1144_v46  ;;  %v1294_v18 = vor.u32 %v1293_v35, %v1292_v5  ;;  %v1298_v33 = vshll.u32 %v4387_v14, %v1283_v16  ;;  %v1299_v59 = vshrl.u32 %v4388_v23, %v1284_v34 }
 0x24a   :  { %v1149_v40 = vsel %vm5166_vm6, %v4975_v49, %v1146_v19  ;;  %vm1375_vm13 = vcmp.lt.s32.totalorder %v5042_v42, 0  ;;  %v1429_v36 = vadd.s32 %v5154_v15, %v5160_v28  ;;  %v3886_v7 = vmin.u32 %v1439_v6, %v5197_v39 }
 0x24b   :  { %v1297_v29 = vor.u32 %v1296_v63, %v1295_v58  ;;  %4229 = vcosq.f32 %v1149_v40  ;;  %v1459_v11 = vsub.s32 4, %v5183_v45  ;;  %v1300_v44 = vor.u32 %v1299_v59, %v1298_v33 }
 0x24c   :  { %v1317_v61 = vshll.u32 %v1277_v13, 8  ;;  %4231 = vsinq.f32 %v1149_v40  ;;  %v1441_v47 = vclz %v3886_v7  ;;  %vm1301_vm14 = vcmp.lt.s32.totalorder %v1282_v62, 1 }
 0x24d   :  { %vm1304_vm15 = vcmp.lt.s32.totalorder %v1282_v62, 4  ;;  %v1285_v38 = vshrl.u32 %v4383_v4, %v1284_v34  ;;  %vm1302_vm0 = vcmp.lt.s32.totalorder %v1282_v62, 2  ;;  %v1309_v27 = vsel %vm1301_vm14, %v1288_v31, %v1291_v48 }
 0x24e   :  { %v1306_v22 = vsel %vm1304_vm15, %v1294_v18, 2102212464  ;;  %vm5220_vm1 = vcmp.le.f32.partialorder %v1373_v56, 0.7853982  ;;  %v3887_v28 = vadd.s32 4294967294, %v1441_v47  ;;  %vm1303_vm2 = vcmp.lt.s32.totalorder %v1282_v62, 3 }
 0x24f   :  { %v1310_v16 = vsel %vm1304_vm15, %v1297_v29, 920167782  ;;  %v1313_v41 = vsel %vm1301_vm14, %v1291_v48, %v1294_v18  ;;  %v1305_v43 = vsel %vm1301_vm14, %v1285_v38, %v1288_v31  ;;  %v1314_v9 = vsel %vm1304_vm15, %v1300_v44, 1326507024 }
 0x250   :  { %v1311_v54 = vsel %vm1303_vm2, %v1294_v18, %v1310_v16  ;;  %v1584_v3 = vand.u32 2139095040, %v5192_v51  ;;  %vm3888_vm3 = vcmp.lt.s32.totalorder %v3887_v28, 0  ;;  %v1307_v34 = vsel %vm1303_vm2, %v1291_v48, %v1306_v22  ;;  %v5261_v16 = vpop.f32.mrb[0].mxu1 }
 0x251   :  { %v1312_v17 = vsel %vm1302_vm0, %v1309_v27, %v1311_v54  ;;  %v1315_v25 = vsel %vm1303_vm2, %v1297_v29, %v1314_v9  ;;  %vm1156_vm4 = vcmp.lt.s32.totalorder %v5187_v24, 2  ;;  %v1444_v56 = vsel %vm3888_vm3, 0, %v3887_v28 }
 0x252   :  { %v1316_v21 = vsel %vm1302_vm0, %v1313_v41, %v1315_v25  ;;  %v5228_v53 = vmul.u32.u64.low %v1317_v61, %v1312_v17  ;;  %v5229_v46 = vmul.u32.u64.high %v1317_v61, %v1312_v17, %v5228_v53  ;;  %vm1153_vm5 = vweird.f32 %v4975_v49 }
 0x253   :  { %v1445_v55 = vsub.s32 32, %v1444_v56  ;;  %v1449_v32 = vsub.s32 4294967266, %v1444_v56  ;;  %v1581_v35 = vand.u32 2147483647, %v5192_v51  ;;  %v1585_v1 = vshrl.u32 %v1584_v3, 23 }
 0x254   :  { %v1460_v20 = vsel %vm1375_vm13, %v1459_v11, %v5183_v45  ;;  %v1308_v63 = vsel %vm1302_vm0, %v1305_v43, %v1307_v34  ;;  %v5238_v37 = vmul.u32.u64.low %v1317_v61, %v1316_v21  ;;  %v5239_v13 = vmul.u32.u64.high %v1317_v61, %v1316_v21, %v5238_v37 }
 0x255   :  { %v1446_v5 = vshll.u32 %v5197_v39, %v1444_v56  ;;  %v1447_v6 = vshrl.u32 %v1429_v36, %v1445_v55  ;;  %v1450_v31 = vadd.s32 127, %v1449_v32  ;;  %v3893_v48 = vadd.s32 4294967169, %v1585_v1  ;;  %v4230_v58 = vpop.eup %4229 }
 0x256   :  { %vm1157_vm6 = vcmp.eq.s32.totalorder %v5187_v24, 0  ;;  %vm1160_vm7 = vcmp.eq.s32.totalorder %v5187_v24, 2  ;;  %v1327_v19 = vadd.s32 1, %v5229_v46  ;;  %v5247_v45 = vadd.f32 %v4971_v57, %v4844_v30  ;;  %v4232_v62 = vpop.eup %4231 }
 0x257   :  { %v1161_v18 = vxor.u32 2147483648, %v4230_v58  ;;  %v1448_v33 = vor.u32 %v1447_v6, %v1446_v5  ;;  %v1451_v59 = vshll.u32 %v1450_v31, 23  ;;  %v1591_v40 = vadd.s32 1, %v3893_v48 }
 0x258   :  { %v1158_v39 = vxor.u32 2147483648, %v4232_v62  ;;  %v1462_v36 = vsel %vm5220_vm1, 0, %v1460_v20  ;;  %v1324_v7 = vmul.u32 %v1317_v61, %v1308_v63  ;;  %vm1326_vm8 = vc.u32 %v5239_v13, %v5228_v53 }
 0x259   :  { %v1162_v29 = vsel %vm1160_vm7, %v1161_v18, %v4232_v62  ;;  %v1452_v11 = vor.u32 4788187, %v1451_v59  ;;  %v1328_v44 = vsel %vm1326_vm8, %v1327_v19, %v5229_v46  ;;  %v1588_v30 = vand.u32 8388607, %v1581_v35 }
 0x25a   :  { %v1159_v57 = vsel %vm1157_vm6, %v4230_v58, %v1158_v39  ;;  %v1329_v47 = vadd.s32 %v1328_v44, %v1324_v7  ;;  %vm1592_vm9 = vcmp.gt.s32.totalorder %v1591_v40, 0  ;;  %v1480_v38 = vand.u32 2139095040, %v5247_v45 }
 0x25b   :  { %v1163_v61 = vsel %vm1156_vm4, %v1159_v57, %v1162_v29  ;;  %v1453_v22 = vand.u32 2147483647, %v1452_v11  ;;  %v1455_v27 = vcvt.s32.f32 %v1448_v33  ;;  %v1593_v28 = vsel %vm1592_vm9, %v1591_v40, 0 }
 0x25c   :  { %v1164_v41 = vsel %vm1153_vm5, nan, %v1163_v61  ;;  %v1330_v43 = vadd.s32 536870912, %v1329_v47  ;;  %v1595_v54 = vand.u32 31, %v1593_v28  ;;  %v1466_v3 = vadd.s32 3, %v1462_v36 }
 0x25d   :  { %3771 = vst [vmem:[#allocation5 + $0x30] sm:$0xff] %v1164_v41  ;;  %v1456_v9 = vmul.f32 %v1455_v27, %v1453_v22  ;;  %v1589_v56 = vor.u32 8388608, %v1588_v30  ;;  %v5267_v24 = vshrl.u32 %v1593_v28, 5  ;;  %v1481_v21 = vshrl.u32 %v1480_v38, 23 }
 0x25e   :  { %v5265_v34 = vshrl.u32 %v1330_v43, 30  ;;  %v1596_v17 = vsub.s32 32, %v1595_v54  ;;  %v1598_v55 = vshll.u32 %v4383_v4, %v1595_v54  ;;  %v1601_v32 = vshll.u32 %v4384_v8, %v1595_v54 }
 0x25f   :  { %v1457_v25 = vxor.u32 2147483648, %v1456_v9  ;;  %v1604_v31 = vshll.u32 %v4385_v10, %v1595_v54  ;;  %v1607_v48 = vshll.u32 %v4386_v12, %v1595_v54  ;;  %v5285_v58 = vand.u32 3, %v1466_v3 }
 0x260   :  { %v1332_v46 = vshll.u32 %v5265_v34, 30  ;;  %v1599_v49 = vshrl.u32 %v4384_v8, %v1596_v17  ;;  %v1602_v20 = vshrl.u32 %v4385_v10, %v1596_v17  ;;  %v1605_v63 = vshrl.u32 %v4386_v12, %v1596_v17 }
 0x261   :  { %v1458_v1 = vsel %vm1375_vm13, %v1457_v25, %v1456_v9  ;;  %v1608_v37 = vshrl.u32 %v4387_v14, %v1596_v17  ;;  %v1610_v40 = vshll.u32 %v4387_v14, %v1595_v54  ;;  %v1611_v15 = vshrl.u32 %v4388_v23, %v1596_v17 }
 0x262   :  { %v1461_v5 = vsel %vm5220_vm1, %v5042_v42, %v1458_v1  ;;  %v5281_v6 = vsub.s32 %v1329_v47, %v1332_v46  ;;  %v1600_v19 = vor.u32 %v1599_v49, %v1598_v55  ;;  %v1603_v62 = vor.u32 %v1602_v20, %v1601_v32 }
 0x263   :  { %4233 = vcosq.f32 %v1461_v5  ;;  %v1606_v33 = vor.u32 %v1605_v63, %v1604_v31  ;;  %v1609_v59 = vor.u32 %v1608_v37, %v1607_v48  ;;  %v5290_v39 = vshll.u32 %v1589_v56, 8 }
 0x264   :  { %4235 = vsinq.f32 %v1461_v5  ;;  %v1335_v18 = vsub.s32 0, %v5281_v6  ;;  %vm1271_vm10 = vcmp.lt.s32.totalorder %v5118_v0, 0  ;;  %vm1613_vm11 = vcmp.lt.s32.totalorder %v5267_v24, 1 }
 0x265   :  { %vm1616_vm12 = vcmp.lt.s32.totalorder %v5267_v24, 4  ;;  %v3889_v7 = vadd.s32 4294967169, %v1481_v21  ;;  %v1355_v29 = vsub.s32 4, %v5265_v34  ;;  %v1612_v11 = vor.u32 %v1611_v15, %v1610_v40 }
 0x266   :  { %v3882_v36 = vmin.u32 %v1335_v18, %v5281_v6  ;;  %v1621_v44 = vsel %vm1613_vm11, %v1600_v19, %v1603_v62  ;;  %v1622_v30 = vsel %vm1616_vm12, %v1609_v59, 920167782  ;;  %vm1469_vm13 = vcmp.eq.s32.totalorder %v5285_v58, 0 }
 0x267   :  { %v1597_v47 = vshrl.u32 %v4383_v4, %v1596_v17  ;;  %vm1615_vm14 = vcmp.lt.s32.totalorder %v5267_v24, 3  ;;  %v1618_v38 = vsel %vm1616_vm12, %v1606_v33, 2102212464  ;;  %vm1468_vm15 = vcmp.lt.s32.totalorder %v5285_v58, 2 }
 0x268   :  { %v1337_v57 = vclz %v3882_v36  ;;  %vm1614_vm0 = vcmp.lt.s32.totalorder %v5267_v24, 2  ;;  %v1623_v61 = vsel %vm1615_vm14, %v1606_v33, %v1622_v30  ;;  %v1625_v22 = vsel %vm1613_vm11, %v1603_v62, %v1606_v33 }
 0x269   :  { %v1626_v27 = vsel %vm1616_vm12, %v1612_v11, 1326507024  ;;  %vm1465_vm1 = vweird.f32 %v5042_v42  ;;  %vm5309_vm2 = vcmp.le.f32.partialorder %v1269_v50, 0.7853982  ;;  %v1617_v43 = vsel %vm1613_vm11, %v1597_v47, %v1600_v19  ;;  %v5324_v50 = vpop.f32.mrb[1].mxu1 }
 0x26a   :  { %v3883_v41 = vadd.s32 4294967294, %v1337_v57  ;;  %v1624_v54 = vsel %vm1614_vm0, %v1621_v44, %v1623_v61  ;;  %v1627_v9 = vsel %vm1615_vm14, %v1609_v59, %v1626_v27  ;;  %v1619_v3 = vsel %vm1615_vm14, %v1603_v62, %v1618_v38  ;;  %v5360_v38 = vld [vmem:[%s7096_s2] ss:$0 sm:$0xff] }
 0x26b   :  { %v1628_v17 = vsel %vm1614_vm0, %v1625_v22, %v1627_v9  ;;  %v5320_v25 = vmul.u32.u64.low %v5290_v39, %v1624_v54  ;;  %v5321_v56 = vmul.u32.u64.high %v5290_v39, %v1624_v54, %v5320_v25  ;;  %vm1472_vm3 = vcmp.eq.s32.totalorder %v5285_v58, 2 }
 0x26c   :  { %vm3884_vm4 = vcmp.lt.s32.totalorder %v3883_v41, 0  ;;  %v5328_v21 = vmul.u32.u64.low %v5290_v39, %v1628_v17  ;;  %v5329_v46 = vmul.u32.u64.high %v5290_v39, %v1628_v17, %v5328_v21  ;;  %v1325_v49 = vadd.s32 %v5228_v53, %v5239_v13 }
 0x26d   :  { %v4234_v55 = vpop.eup %4233  ;;  %v1340_v32 = vsel %vm3884_vm4, 0, %v3883_v41  ;;  %v1477_v1 = vand.u32 2147483647, %v5247_v45  ;;  %v1487_v20 = vadd.s32 1, %v3889_v7  ;;  %v1620_v48 = vsel %vm1614_vm0, %v1617_v43, %v1619_v3 }
 0x26e   :  { %v4236_v63 = vpop.eup %4235  ;;  %v1473_v37 = vxor.u32 2147483648, %v4234_v55  ;;  %v1341_v5 = vsub.s32 32, %v1340_v32  ;;  %v1345_v31 = vsub.s32 4294967266, %v1340_v32  ;;  %v1356_v62 = vsel %vm1271_vm10, %v1355_v29, %v5265_v34 }
 0x26f   :  { %v1470_v19 = vxor.u32 2147483648, %v4236_v63  ;;  %v1639_v18 = vadd.s32 1, %v5321_v56  ;;  %vm1488_vm5 = vcmp.gt.s32.totalorder %v1487_v20, 0  ;;  %v1342_v13 = vshll.u32 %v5281_v6, %v1340_v32 }
 0x270   :  { %v1474_v53 = vsel %vm1472_vm3, %v1473_v37, %v4236_v63  ;;  %v1343_v33 = vshrl.u32 %v1325_v49, %v1341_v5  ;;  %v1346_v59 = vadd.s32 127, %v1345_v31  ;;  %v1636_v24 = vmul.u32 %v5290_v39, %v1620_v48 }
 0x271   :  { %v1471_v40 = vsel %vm1469_vm13, %v4234_v55, %v1470_v19  ;;  %vm1638_vm6 = vc.u32 %v5329_v46, %v5320_v25  ;;  %v1489_v15 = vsel %vm1488_vm5, %v1487_v20, 0  ;;  %v1358_v11 = vsel %vm5309_vm2, 0, %v1356_v62 }
 0x272   :  { %v1475_v34 = vsel %vm1468_vm15, %v1471_v40, %v1474_v53  ;;  %v1344_v36 = vor.u32 %v1343_v33, %v1342_v13  ;;  %v1347_v7 = vshll.u32 %v1346_v59, 23  ;;  %v1640_v29 = vsel %vm1638_vm6, %v1639_v18, %v5321_v56 }
 0x273   :  { %v1476_v6 = vsel %vm1465_vm1, nan, %v1475_v34  ;;  %v1641_v44 = vadd.s32 %v1640_v29, %v1636_v24  ;;  %v1491_v30 = vand.u32 31, %v1489_v15  ;;  %v1484_v47 = vand.u32 8388607, %v1477_v1 }
 0x274   :  { %3774 = vst [vmem:[#allocation5 + $0x48] sm:$0xff] %v1476_v6  ;;  %v1348_v39 = vor.u32 4788187, %v1347_v7  ;;  %v5364_v42 = vadd.f32 %v5360_v38, %v4958_v60  ;;  %v1351_v22 = vcvt.s32.f32 %v1344_v36  ;;  %v1362_v27 = vadd.s32 3, %v1358_v11 }
 0x275   :  { %v1642_v57 = vadd.s32 536870912, %v1641_v44  ;;  %v1492_v58 = vsub.s32 32, %v1491_v30  ;;  %v1490_v41 = vshrl.u32 %v1489_v15, 5  ;;  %v1503_v3 = vshll.u32 %v4386_v12, %v1491_v30 }
 0x276   :  { %v1349_v61 = vand.u32 2147483647, %v1348_v39  ;;  %v1494_v49 = vshll.u32 %v4383_v4, %v1491_v30  ;;  %v1497_v32 = vshll.u32 %v4384_v8, %v1491_v30  ;;  %v1500_v20 = vshll.u32 %v4385_v10, %v1491_v30 }
 0x277   :  { %v1643_v43 = vshrl.u32 %v1642_v57, 30  ;;  %v1495_v54 = vshrl.u32 %v4384_v8, %v1492_v58  ;;  %v1498_v9 = vshrl.u32 %v4385_v10, %v1492_v58  ;;  %v1501_v56 = vshrl.u32 %v4386_v12, %v1492_v58 }
 0x278   :  { %v1352_v17 = vmul.f32 %v1351_v22, %v1349_v61  ;;  %v1504_v21 = vshrl.u32 %v4387_v14, %v1492_v58  ;;  %v1507_v55 = vshrl.u32 %v4388_v23, %v1492_v58  ;;  %v5375_v37 = vand.u32 3, %v1362_v27 }
 0x279   :  { %v1644_v60 = vshll.u32 %v1643_v43, 30  ;;  %v1506_v31 = vshll.u32 %v4387_v14, %v1491_v30  ;;  %vm1583_vm7 = vcmp.lt.s32.totalorder %v5192_v51, 0  ;;  %v1496_v19 = vor.u32 %v1495_v54, %v1494_v49 }
 0x27a   :  { %v1353_v63 = vxor.u32 2147483648, %v1352_v17  ;;  %v1505_v5 = vor.u32 %v1504_v21, %v1503_v3  ;;  %v1499_v62 = vor.u32 %v1498_v9, %v1497_v32  ;;  %v1502_v18 = vor.u32 %v1501_v56, %v1500_v20 }
 0x27b   :  { %v5379_v48 = vsub.s32 %v1641_v44, %v1644_v60  ;;  %v1485_v13 = vor.u32 8388608, %v1484_v47  ;;  %v1508_v33 = vor.u32 %v1507_v55, %v1506_v31  ;;  %v1792_v59 = vand.u32 2139095040, %v5364_v42 }
 0x27c   :  { %v1354_v53 = vsel %vm1271_vm10, %v1353_v63, %v1352_v17  ;;  %v1493_v15 = vshrl.u32 %v4383_v4, %v1492_v58  ;;  %vm1512_vm8 = vcmp.lt.s32.totalorder %v1490_v41, 4  ;;  %vm5391_vm9 = vcmp.le.f32.partialorder %v1581_v35, 0.7853982 }
 0x27d   :  { %v1357_v40 = vsel %vm5309_vm2, %v5118_v0, %v1354_v53  ;;  %v1647_v24 = vsub.s32 0, %v5379_v48  ;;  %vm1509_vm10 = vcmp.lt.s32.totalorder %v1490_v41, 1  ;;  %vm1511_vm11 = vcmp.lt.s32.totalorder %v1490_v41, 3 }
 0x27e   :  { %4237 = vcosq.f32 %v1357_v40  ;;  %v1518_v36 = vsel %vm1512_vm8, %v1505_v5, 920167782  ;;  %v1514_v28 = vsel %vm1512_vm8, %v1502_v18, 2102212464  ;;  %v1517_v29 = vsel %vm1509_vm10, %v1496_v19, %v1499_v62 }
 0x27f   :  { %4239 = vsinq.f32 %v1357_v40  ;;  %v3894_v7 = vmin.u32 %v1647_v24, %v5379_v48  ;;  %v1667_v6 = vsub.s32 4, %v1643_v43  ;;  %v1519_v11 = vsel %vm1511_vm11, %v1502_v18, %v1518_v36 }
 0x280   :  { %v1521_v44 = vsel %vm1509_vm10, %v1499_v62, %v1502_v18  ;;  %v1522_v30 = vsel %vm1512_vm8, %v1508_v33, 1326507024  ;;  %vm1510_vm12 = vcmp.lt.s32.totalorder %v1490_v41, 2  ;;  %v1513_v57 = vsel %vm1509_vm10, %v1493_v15, %v1496_v19 }
 0x281   :  { %v1649_v39 = vclz %v3894_v7  ;;  %v1525_v35 = vshll.u32 %v1485_v13, 8  ;;  %v1515_v47 = vsel %vm1511_vm11, %v1499_v62, %v1514_v28  ;;  %v1520_v58 = vsel %vm1510_vm12, %v1517_v29, %v1519_v11  ;;  %v5419_v62 = vpop.f32.mrb[2].mxu1 }
 0x282   :  { %v1523_v61 = vsel %vm1511_vm11, %v1505_v5, %v1522_v30  ;;  %v1793_v22 = vshrl.u32 %v1792_v59, 23  ;;  %v1668_v17 = vsel %vm1583_vm7, %v1667_v6, %v1643_v43  ;;  %vm1365_vm13 = vcmp.eq.s32.totalorder %v5375_v37, 0 }
 0x283   :  { %v3895_v27 = vadd.s32 4294967294, %v1649_v39  ;;  %v1524_v54 = vsel %vm1510_vm12, %v1521_v44, %v1523_v61  ;;  %v5401_v9 = vmul.u32.u64.low %v1525_v35, %v1520_v58  ;;  %v5402_v3 = vmul.u32.u64.high %v1525_v35, %v1520_v58, %v5401_v9 }
 0x284   :  { %v5407_v56 = vmul.u32.u64.low %v1525_v35, %v1524_v54  ;;  %v5408_v21 = vmul.u32.u64.high %v1525_v35, %v1524_v54, %v5407_v56  ;;  %v3901_v55 = vadd.s32 4294967169, %v1793_v22  ;;  %vm1368_vm14 = vcmp.eq.s32.totalorder %v5375_v37, 2 }
 0x285   :  { %vm3896_vm15 = vcmp.lt.s32.totalorder %v3895_v27, 0  ;;  %v1516_v60 = vsel %vm1510_vm12, %v1513_v57, %v1515_v47  ;;  %v1637_v49 = vadd.s32 %v5320_v25, %v5329_v46  ;;  %v1789_v20 = vand.u32 2147483647, %v5364_v42 }
 0x286   :  { %v1652_v32 = vsel %vm3896_vm15, 0, %v3895_v27  ;;  %v1799_v63 = vadd.s32 1, %v3901_v55  ;;  %v1670_v31 = vsel %vm5391_vm9, 0, %v1668_v17  ;;  %v1535_v19 = vadd.s32 1, %v5402_v3 }
 0x287   :  { %v1653_v5 = vsub.s32 32, %v1652_v32  ;;  %v1657_v43 = vsub.s32 4294967266, %v1652_v32  ;;  %v1654_v41 = vshll.u32 %v5379_v48, %v1652_v32  ;;  %v1532_v53 = vmul.u32 %v1525_v35, %v1516_v60 }
 0x288   :  { %v4238_v18 = vpop.eup %4237  ;;  %vm1534_vm0 = vc.u32 %v5408_v21, %v5401_v9  ;;  %vm1800_vm1 = vcmp.gt.s32.totalorder %v1799_v63, 0  ;;  %v1674_v24 = vadd.s32 3, %v1670_v31  ;;  %v1796_v29 = vand.u32 8388607, %v1789_v20 }
 0x289   :  { %v4240_v25 = vpop.eup %4239  ;;  %v1369_v46 = vxor.u32 2147483648, %v4238_v18  ;;  %v1655_v13 = vshrl.u32 %v1637_v49, %v1653_v5  ;;  %v1658_v33 = vadd.s32 127, %v1657_v43  ;;  %v1536_v59 = vsel %vm1534_vm0, %v1535_v19, %v5402_v3 }
 0x28a   :  { %v1366_v40 = vxor.u32 2147483648, %v4240_v25  ;;  %v1537_v15 = vadd.s32 %v1536_v59, %v1532_v53  ;;  %v1801_v36 = vsel %vm1800_vm1, %v1799_v63, 0  ;;  %vm1364_vm2 = vcmp.lt.s32.totalorder %v5375_v37, 2 }
 0x28b   :  { %v1370_v7 = vsel %vm1368_vm14, %v1369_v46, %v4240_v25  ;;  %v1656_v28 = vor.u32 %v1655_v13, %v1654_v41  ;;  %v1659_v48 = vshll.u32 %v1658_v33, 23  ;;  %v1803_v44 = vand.u32 31, %v1801_v36 }
 0x28c   :  { %v1367_v6 = vsel %vm1365_vm13, %v4238_v18, %v1366_v40  ;;  %v1538_v11 = vadd.s32 536870912, %v1537_v15  ;;  %vm1361_vm3 = vweird.f32 %v5118_v0  ;;  %v5433_v35 = vand.u32 3, %v1674_v24 }
 0x28d   :  { %v1371_v30 = vsel %vm1364_vm2, %v1367_v6, %v1370_v7  ;;  %v1660_v39 = vor.u32 4788187, %v1659_v48  ;;  %vm1479_vm4 = vcmp.lt.s32.totalorder %v5247_v45, 0  ;;  %v1804_v58 = vsub.s32 32, %v1803_v44 }
 0x28e   :  { %v1372_v57 = vsel %vm1361_vm3, nan, %v1371_v30  ;;  %v1539_v47 = vshrl.u32 %v1538_v11, 30  ;;  %v1663_v22 = vcvt.s32.f32 %v1656_v28  ;;  %v1797_v27 = vor.u32 8388608, %v1796_v29 }
 0x28f   :  { %3773 = vst [vmem:[#allocation5 + $0x40] sm:$0xff] %v1372_v57  ;;  %v1661_v61 = vand.u32 2147483647, %v1660_v39  ;;  %v5438_v37 = vadd.f32 %v5360_v38, %v5012_v2  ;;  %v1802_v3 = vshrl.u32 %v1801_v36, 5  ;;  %v1806_v0 = vshll.u32 %v4383_v4, %v1803_v44 }
 0x290   :  { %v1540_v54 = vshll.u32 %v1539_v47, 30  ;;  %v1807_v17 = vshrl.u32 %v4384_v8, %v1804_v58  ;;  %v1810_v55 = vshrl.u32 %v4385_v10, %v1804_v58  ;;  %v1813_v60 = vshrl.u32 %v4386_v12, %v1804_v58 }
 0x291   :  { %v1664_v56 = vmul.f32 %v1663_v22, %v1661_v61  ;;  %v1816_v49 = vshrl.u32 %v4387_v14, %v1804_v58  ;;  %v1809_v63 = vshll.u32 %v4384_v8, %v1803_v44  ;;  %v1812_v2 = vshll.u32 %v4385_v10, %v1803_v44 }
 0x292   :  { %v5445_v32 = vsub.s32 %v1537_v15, %v1540_v54  ;;  %v1815_v5 = vshll.u32 %v4386_v12, %v1803_v44  ;;  %v1563_v31 = vsub.s32 4, %v1539_v47  ;;  %v1808_v19 = vor.u32 %v1807_v17, %v1806_v0 }
 0x293   :  { %v1665_v43 = vxor.u32 2147483648, %v1664_v56  ;;  %v1818_v18 = vshll.u32 %v4387_v14, %v1803_v44  ;;  %v1811_v53 = vor.u32 %v1810_v55, %v1809_v63  ;;  %v1814_v25 = vor.u32 %v1813_v60, %v1812_v2 }
 0x294   :  { %v1543_v41 = vsub.s32 0, %v5445_v32  ;;  %v1819_v46 = vshrl.u32 %v4388_v23, %v1804_v58  ;;  %v1817_v33 = vor.u32 %v1816_v49, %v1815_v5  ;;  %v1837_v59 = vshll.u32 %v1797_v27, 8 }
 0x295   :  { %v1666_v13 = vsel %vm1583_vm7, %v1665_v43, %v1664_v56  ;;  %v1685_v40 = vand.u32 2147483647, %v5438_v37  ;;  %vm5461_vm5 = vcmp.le.f32.partialorder %v1477_v1, 0.7853982  ;;  %vm1821_vm6 = vcmp.lt.s32.totalorder %v1802_v3, 1 }
 0x296   :  { %v1669_v24 = vsel %vm5391_vm9, %v5192_v51, %v1666_v13  ;;  %v3890_v36 = vmin.u32 %v1543_v41, %v5445_v32  ;;  %v1820_v7 = vor.u32 %v1819_v46, %v1818_v18  ;;  %v1564_v28 = vsel %vm1479_vm4, %v1563_v31, %v1539_v47 }
 0x297   :  { %4241 = vcosq.f32 %v1669_v24  ;;  %v1805_v48 = vshrl.u32 %v4383_v4, %v1804_v58  ;;  %vm1824_vm7 = vcmp.lt.s32.totalorder %v1802_v3, 4  ;;  %v1829_v6 = vsel %vm1821_vm6, %v1808_v19, %v1811_v53 }
 0x298   :  { %4243 = vsinq.f32 %v1669_v24  ;;  %v1545_v34 = vclz %v3890_v36  ;;  %v1826_v29 = vsel %vm1824_vm7, %v1814_v25, 2102212464  ;;  %vm1822_vm8 = vcmp.lt.s32.totalorder %v1802_v3, 2 }
 0x299   :  { %vm1823_vm9 = vcmp.lt.s32.totalorder %v1802_v3, 3  ;;  %v1830_v1 = vsel %vm1824_vm7, %v1817_v33, 920167782  ;;  %v1833_v11 = vsel %vm1821_vm6, %v1811_v53, %v1814_v25  ;;  %v1825_v30 = vsel %vm1821_vm6, %v1805_v48, %v1808_v19 }
 0x29a   :  { %v3891_v44 = vadd.s32 4294967294, %v1545_v34  ;;  %v1831_v39 = vsel %vm1823_vm9, %v1814_v25, %v1830_v1  ;;  %v1834_v57 = vsel %vm1824_vm7, %v1820_v7, 1326507024  ;;  %v1827_v61 = vsel %vm1823_vm9, %v1811_v53, %v1826_v29  ;;  %v5488_v25 = vpop.f32.mrb[3].mxu1 }
 0x29b   :  { %v1832_v22 = vsel %vm1822_vm8, %v1829_v6, %v1831_v39  ;;  %v1835_v27 = vsel %vm1823_vm9, %v1817_v33, %v1834_v57  ;;  %v1688_v47 = vand.u32 2139095040, %v5438_v37  ;;  %v1533_v49 = vadd.s32 %v5401_v9, %v5408_v21 }
 0x29c   :  { %vm3892_vm10 = vcmp.lt.s32.totalorder %v3891_v44, 0  ;;  %v1836_v58 = vsel %vm1822_vm8, %v1833_v11, %v1835_v27  ;;  %v5472_v54 = vmul.u32.u64.low %v1837_v59, %v1832_v22  ;;  %v5473_v0 = vmul.u32.u64.high %v1837_v59, %v1832_v22, %v5472_v54 }
 0x29d   :  { %v1548_v17 = vsel %vm3892_vm10, 0, %v3891_v44  ;;  %v5476_v56 = vmul.u32.u64.low %v1837_v59, %v1836_v58  ;;  %v5477_v55 = vmul.u32.u64.high %v1837_v59, %v1836_v58, %v5476_v56  ;;  %v1689_v60 = vshrl.u32 %v1688_v47, 23 }
 0x29e   :  { %v1549_v63 = vsub.s32 32, %v1548_v17  ;;  %v1553_v2 = vsub.s32 4294967266, %v1548_v17  ;;  %v1828_v5 = vsel %vm1822_vm8, %v1825_v30, %v1827_v61  ;;  %vm1676_vm11 = vcmp.lt.s32.totalorder %v5433_v35, 2 }
 0x29f   :  { %vm1677_vm12 = vcmp.eq.s32.totalorder %v5433_v35, 0  ;;  %v1566_v43 = vsel %vm5461_vm5, 0, %v1564_v28  ;;  %v3897_v31 = vadd.s32 4294967169, %v1689_v60  ;;  %v1550_v19 = vshll.u32 %v5445_v32, %v1548_v17 }
 0x2a0   :  { %v1551_v18 = vshrl.u32 %v1533_v49, %v1549_v63  ;;  %v1554_v41 = vadd.s32 127, %v1553_v2  ;;  %v1847_v53 = vadd.s32 1, %v5473_v0  ;;  %v1844_v21 = vmul.u32 %v1837_v59, %v1828_v5 }
 0x2a1   :  { %v4242_v9 = vpop.eup %4241  ;;  %vm1846_vm13 = vc.u32 %v5477_v55, %v5472_v54  ;;  %v1692_v3 = vand.u32 8388607, %v1685_v40  ;;  %v1695_v46 = vadd.s32 1, %v3897_v31  ;;  %vm1680_vm14 = vcmp.eq.s32.totalorder %v5433_v35, 2 }
 0x2a2   :  { %v4244_v13 = vpop.eup %4243  ;;  %v1681_v33 = vxor.u32 2147483648, %v4242_v9  ;;  %v1552_v24 = vor.u32 %v1551_v18, %v1550_v19  ;;  %v1555_v36 = vshll.u32 %v1554_v41, 23  ;;  %v1848_v32 = vsel %vm1846_vm13, %v1847_v53, %v5473_v0 }
 0x2a3   :  { %v1678_v7 = vxor.u32 2147483648, %v4244_v13  ;;  %v1849_v28 = vadd.s32 %v1848_v32, %v1844_v21  ;;  %vm1696_vm15 = vcmp.gt.s32.totalorder %v1695_v46, 0  ;;  %v1570_v34 = vadd.s32 3, %v1566_v43 }
 0x2a4   :  { %v1682_v48 = vsel %vm1680_vm14, %v1681_v33, %v4244_v13  ;;  %v1556_v59 = vor.u32 4788187, %v1555_v36  ;;  %v1697_v29 = vsel %vm1696_vm15, %v1695_v46, 0  ;;  %v1693_v11 = vor.u32 8388608, %v1692_v3 }
 0x2a5   :  { %v1679_v6 = vsel %vm1677_vm12, %v4242_v9, %v1678_v7  ;;  %v1850_v1 = vadd.s32 536870912, %v1849_v28  ;;  %v1699_v44 = vand.u32 31, %v1697_v29  ;;  %vm1673_vm0 = vweird.f32 %v5192_v51 }
 0x2a6   :  { %v1683_v30 = vsel %vm1676_vm11, %v1679_v6, %v1682_v48  ;;  %v1557_v39 = vand.u32 2147483647, %v1556_v59  ;;  %v1559_v57 = vcvt.s32.f32 %v1552_v24  ;;  %v5503_v47 = vadd.f32 %v5360_v38, %v5114_v52 }
 0x2a7   :  { %v1684_v61 = vsel %vm1673_vm0, nan, %v1683_v30  ;;  %v1851_v22 = vshrl.u32 %v1850_v1, 30  ;;  %v1700_v27 = vsub.s32 32, %v1699_v44  ;;  %v5505_v0 = vand.u32 3, %v1570_v34 }
 0x2a8   :  { %3776 = vst [vmem:[#allocation5 + $0x58] sm:$0xff] %v1684_v61  ;;  %v1560_v58 = vmul.f32 %v1559_v57, %v1557_v39  ;;  %v1702_v56 = vshll.u32 %v4383_v4, %v1699_v44  ;;  %v5509_v35 = vshll.u32 %v1693_v11, 8  ;;  %vm1791_vm1 = vcmp.lt.s32.totalorder %v5364_v42, 0 }
 0x2a9   :  { %v1852_v17 = vshll.u32 %v1851_v22, 30  ;;  %v1703_v51 = vshrl.u32 %v4384_v8, %v1700_v27  ;;  %v1706_v49 = vshrl.u32 %v4385_v10, %v1700_v27  ;;  %v1709_v63 = vshrl.u32 %v4386_v12, %v1700_v27 }
 0x2aa   :  { %v1561_v60 = vxor.u32 2147483648, %v1560_v58  ;;  %v1712_v2 = vshrl.u32 %v4387_v14, %v1700_v27  ;;  %v1698_v5 = vshrl.u32 %v1697_v29, 5  ;;  %v1705_v43 = vshll.u32 %v4384_v8, %v1699_v44 }
 0x2ab   :  { %v5515_v52 = vsub.s32 %v1849_v28, %v1852_v17  ;;  %v2000_v31 = vand.u32 2139095040, %v5503_v47  ;;  %v1704_v18 = vor.u32 %v1703_v51, %v1702_v56  ;;  %v1708_v41 = vshll.u32 %v4385_v10, %v1699_v44 }
 0x2ac   :  { %v1562_v19 = vsel %vm1479_vm4, %v1561_v60, %v1560_v58  ;;  %v1711_v53 = vshll.u32 %v4386_v12, %v1699_v44  ;;  %v1707_v3 = vor.u32 %v1706_v49, %v1705_v43  ;;  %v1714_v46 = vshll.u32 %v4387_v14, %v1699_v44 }
 0x2ad   :  { %v1565_v9 = vsel %vm5461_vm5, %v5247_v45, %v1562_v19  ;;  %v1855_v21 = vsub.s32 0, %v5515_v52  ;;  %v1710_v13 = vor.u32 %v1709_v63, %v1708_v41  ;;  %v1715_v24 = vshrl.u32 %v4388_v23, %v1700_v27 }
 0x2ae   :  { %4245 = vcosq.f32 %v1565_v9  ;;  %v1713_v33 = vor.u32 %v1712_v2, %v1711_v53  ;;  %vm5531_vm2 = vcmp.le.f32.partialorder %v1789_v20, 0.7853982  ;;  %v1875_v32 = vsub.s32 4, %v1851_v22 }
 0x2af   :  { %4247 = vsinq.f32 %v1565_v9  ;;  %v3902_v15 = vmin.u32 %v1855_v21, %v5515_v52  ;;  %v1701_v7 = vshrl.u32 %v4383_v4, %v1700_v27  ;;  %v1716_v28 = vor.u32 %v1715_v24, %v1714_v46 }
 0x2b0   :  { %vm1717_vm3 = vcmp.lt.s32.totalorder %v1698_v5, 1  ;;  %vm1718_vm4 = vcmp.lt.s32.totalorder %v1698_v5, 2  ;;  %vm1719_vm5 = vcmp.lt.s32.totalorder %v1698_v5, 3  ;;  %vm1720_vm6 = vcmp.lt.s32.totalorder %v1698_v5, 4  ;;  %v5556_v5 = vpop.f32.mrb[4].mxu1 }
 0x2b1   :  { %v1857_v48 = vclz %v3902_v15  ;;  %v1721_v59 = vsel %vm1717_vm3, %v1701_v7, %v1704_v18  ;;  %v1725_v34 = vsel %vm1717_vm3, %v1704_v18, %v1707_v3  ;;  %v1722_v29 = vsel %vm1720_vm6, %v1710_v13, 2102212464 }
 0x2b2   :  { %v1726_v6 = vsel %vm1720_vm6, %v1713_v33, 920167782  ;;  %v1729_v1 = vsel %vm1717_vm3, %v1707_v3, %v1710_v13  ;;  %v1730_v20 = vsel %vm1720_vm6, %v1716_v28, 1326507024  ;;  %vm1573_vm7 = vcmp.eq.s32.totalorder %v5505_v0, 0 }
 0x2b3   :  { %v3903_v11 = vadd.s32 4294967294, %v1857_v48  ;;  %v1723_v44 = vsel %vm1719_vm5, %v1707_v3, %v1722_v29  ;;  %v1727_v30 = vsel %vm1719_vm5, %v1710_v13, %v1726_v6  ;;  %v1731_v39 = vsel %vm1719_vm5, %v1713_v33, %v1730_v20 }
 0x2b4   :  { %vm1572_vm8 = vcmp.lt.s32.totalorder %v5505_v0, 2  ;;  %v1876_v57 = vsel %vm1791_vm1, %v1875_v32, %v1851_v22  ;;  %v1728_v61 = vsel %vm1718_vm4, %v1725_v34, %v1727_v30  ;;  %v1732_v27 = vsel %vm1718_vm4, %v1729_v1, %v1731_v39 }
 0x2b5   :  { %v2001_v58 = vshrl.u32 %v2000_v31, 23  ;;  %vm3904_vm9 = vcmp.lt.s32.totalorder %v3903_v11, 0  ;;  %v1724_v17 = vsel %vm1718_vm4, %v1721_v59, %v1723_v44  ;;  %vm1576_vm10 = vcmp.eq.s32.totalorder %v5505_v0, 2 }
 0x2b6   :  { %v5545_v56 = vmul.u32.u64.low %v5509_v35, %v1732_v27  ;;  %v5546_v51 = vmul.u32.u64.high %v5509_v35, %v1732_v27, %v5545_v56  ;;  %v1860_v60 = vsel %vm3904_vm9, 0, %v3903_v11  ;;  %v1845_v22 = vadd.s32 %v5472_v54, %v5477_v55 }
 0x2b7   :  { %v5549_v49 = vmul.u32.u64.low %v5509_v35, %v1728_v61  ;;  %v5550_v63 = vmul.u32.u64.high %v5509_v35, %v1728_v61, %v5549_v49  ;;  %v3909_v2 = vadd.s32 4294967169, %v2001_v58  ;;  %v1861_v43 = vsub.s32 32, %v1860_v60 }
 0x2b8   :  { %v1865_v31 = vsub.s32 4294967266, %v1860_v60  ;;  %v4246_v19 = vpop.eup %4245  ;;  %v1878_v18 = vsel %vm5531_vm2, 0, %v1876_v57  ;;  %v1740_v41 = vmul.u32 %v5509_v35, %v1724_v17  ;;  %v1997_v53 = vand.u32 2147483647, %v5503_v47 }
 0x2b9   :  { %v2007_v9 = vadd.s32 1, %v3909_v2  ;;  %v4248_v21 = vpop.eup %4247  ;;  %v1577_v3 = vxor.u32 2147483648, %v4246_v19  ;;  %v1862_v46 = vshll.u32 %v5515_v52, %v1860_v60  ;;  %v1863_v13 = vshrl.u32 %v1845_v22, %v1861_v43 }
 0x2ba   :  { %v1866_v33 = vadd.s32 127, %v1865_v31  ;;  %v1574_v54 = vxor.u32 2147483648, %v4248_v21  ;;  %vm1742_vm11 = vc.u32 %v5546_v51, %v5549_v49  ;;  %v1743_v55 = vadd.s32 1, %v5550_v63 }
 0x2bb   :  { %vm2008_vm12 = vcmp.gt.s32.totalorder %v2007_v9, 0  ;;  %v1578_v24 = vsel %vm1576_vm10, %v1577_v3, %v4248_v21  ;;  %v1864_v35 = vor.u32 %v1863_v13, %v1862_v46  ;;  %v1882_v28 = vadd.s32 3, %v1878_v18 }
 0x2bc   :  { %v1867_v15 = vshll.u32 %v1866_v33, 23  ;;  %v2009_v32 = vsel %vm2008_vm12, %v2007_v9, 0  ;;  %v1575_v7 = vsel %vm1573_vm7, %v4246_v19, %v1574_v54  ;;  %v1744_v52 = vsel %vm1742_vm11, %v1743_v55, %v5550_v63 }
 0x2bd   :  { %v2011_v48 = vand.u32 31, %v2009_v32  ;;  %vm1569_vm13 = vweird.f32 %v5247_v45  ;;  %v1579_v59 = vsel %vm1572_vm8, %v1575_v7, %v1578_v24  ;;  %v1745_v29 = vadd.s32 %v1744_v52, %v1740_v41 }
 0x2be   :  { %v1868_v34 = vor.u32 4788187, %v1867_v15  ;;  %v1580_v6 = vsel %vm1569_vm13, nan, %v1579_v59  ;;  %v1871_v11 = vcvt.s32.f32 %v1864_v35  ;;  %v5576_v30 = vadd.f32 %v5360_v38, %v5181_v26 }
 0x2bf   :  { %v2012_v1 = vsub.s32 32, %v2011_v48  ;;  %3775 = vst [vmem:[#allocation5 + $0x50] sm:$0xff] %v1580_v6  ;;  %v1746_v44 = vadd.s32 536870912, %v1745_v29  ;;  %v5578_v39 = vand.u32 3, %v1882_v28  ;;  %v2004_v45 = vand.u32 8388607, %v1997_v53 }
 0x2c0   :  { %v1869_v20 = vand.u32 2147483647, %v1868_v34  ;;  %v2014_v56 = vshll.u32 %v4383_v4, %v2011_v48  ;;  %v2017_v26 = vshll.u32 %v4384_v8, %v2011_v48  ;;  %v2023_v60 = vshll.u32 %v4386_v12, %v2011_v48 }
 0x2c1   :  { %v2015_v0 = vshrl.u32 %v4384_v8, %v2012_v1  ;;  %v2018_v57 = vshrl.u32 %v4385_v10, %v2012_v1  ;;  %v1747_v27 = vshrl.u32 %v1746_v44, 30  ;;  %v2021_v58 = vshrl.u32 %v4386_v12, %v2012_v1 }
 0x2c2   :  { %v1872_v61 = vmul.f32 %v1871_v11, %v1869_v20  ;;  %v2024_v17 = vshrl.u32 %v4387_v14, %v2012_v1  ;;  %v2027_v63 = vshrl.u32 %v4388_v23, %v2012_v1  ;;  %v2010_v43 = vshrl.u32 %v2009_v32, 5 }
 0x2c3   :  { %v1748_v22 = vshll.u32 %v1747_v27, 30  ;;  %v2020_v31 = vshll.u32 %v4385_v10, %v2011_v48  ;;  %v2016_v19 = vor.u32 %v2015_v0, %v2014_v56  ;;  %v2019_v18 = vor.u32 %v2018_v57, %v2017_v26 }
 0x2c4   :  { %v1873_v2 = vxor.u32 2147483648, %v1872_v61  ;;  %v2025_v41 = vor.u32 %v2024_v17, %v2023_v60  ;;  %v2026_v9 = vshll.u32 %v4387_v14, %v2011_v48  ;;  %v2005_v46 = vor.u32 8388608, %v2004_v45 }
 0x2c5   :  { %v5594_v3 = vsub.s32 %v1745_v29, %v1748_v22  ;;  %v2022_v13 = vor.u32 %v2021_v58, %v2020_v31  ;;  %v1771_v54 = vsub.s32 4, %v1747_v27  ;;  %v2013_v55 = vshrl.u32 %v4383_v4, %v2012_v1  ;;  %v5631_v31 = vpop.f32.mrb[5].mxu1 }
 0x2c6   :  { %v1874_v21 = vsel %vm1791_vm1, %v1873_v2, %v1872_v61  ;;  %v2028_v24 = vor.u32 %v2027_v63, %v2026_v9  ;;  %vm2029_vm14 = vcmp.lt.s32.totalorder %v2010_v43, 1  ;;  %vm2032_vm15 = vcmp.lt.s32.totalorder %v2010_v43, 4 }
 0x2c7   :  { %v1877_v33 = vsel %vm5531_vm2, %v5364_v42, %v1874_v21  ;;  %v1751_v35 = vsub.s32 0, %v5594_v3  ;;  %vm2031_vm0 = vcmp.lt.s32.totalorder %v2010_v43, 3  ;;  %v2037_v15 = vsel %vm2029_vm14, %v2016_v19, %v2019_v18 }
 0x2c8   :  { %4249 = vcosq.f32 %v1877_v33  ;;  %v2038_v32 = vsel %vm2032_vm15, %v2025_v41, 920167782  ;;  %vm2030_vm1 = vcmp.lt.s32.totalorder %v2010_v43, 2  ;;  %v2034_v28 = vsel %vm2032_vm15, %v2022_v13, 2102212464 }
 0x2c9   :  { %4251 = vsinq.f32 %v1877_v33  ;;  %v3898_v7 = vmin.u32 %v1751_v35, %v5594_v3  ;;  %v2039_v36 = vsel %vm2031_vm0, %v2022_v13, %v2038_v32  ;;  %v2041_v48 = vsel %vm2029_vm14, %v2019_v18, %v2022_v13 }
 0x2ca   :  { %v2040_v52 = vsel %vm2030_vm1, %v2037_v15, %v2039_v36  ;;  %v2042_v59 = vsel %vm2032_vm15, %v2028_v24, 1326507024  ;;  %v2045_v34 = vshll.u32 %v2005_v46, 8  ;;  %vm5607_vm2 = vcmp.le.f32.partialorder %v1685_v40, 0.7853982 }
 0x2cb   :  { %v1753_v6 = vclz %v3898_v7  ;;  %v2033_v1 = vsel %vm2029_vm14, %v2013_v55, %v2016_v19  ;;  %v2035_v20 = vsel %vm2031_vm0, %v2019_v18, %v2034_v28  ;;  %v2043_v11 = vsel %vm2031_vm0, %v2025_v41, %v2042_v59 }
 0x2cc   :  { %v5612_v44 = vmul.u32.u64.low %v2045_v34, %v2040_v52  ;;  %v5613_v45 = vmul.u32.u64.high %v2045_v34, %v2040_v52, %v5612_v44  ;;  %vm1687_vm3 = vcmp.lt.s32.totalorder %v5438_v37, 0  ;;  %v2044_v57 = vsel %vm2030_vm1, %v2041_v48, %v2043_v11 }
 0x2cd   :  { %v3899_v0 = vadd.s32 4294967294, %v1753_v6  ;;  %v1896_v61 = vand.u32 2139095040, %v5576_v30  ;;  %vm1881_vm4 = vweird.f32 %v5364_v42  ;;  %vm1884_vm5 = vcmp.lt.s32.totalorder %v5578_v39, 2 }
 0x2ce   :  { %v1772_v40 = vsel %vm1687_vm3, %v1771_v54, %v1747_v27  ;;  %v5622_v58 = vmul.u32.u64.low %v2045_v34, %v2044_v57  ;;  %v5623_v17 = vmul.u32.u64.high %v2045_v34, %v2044_v57, %v5622_v58  ;;  %vm1888_vm6 = vcmp.eq.s32.totalorder %v5578_v39, 2 }
 0x2cf   :  { %vm3900_vm7 = vcmp.lt.s32.totalorder %v3899_v0, 0  ;;  %v2036_v56 = vsel %vm2030_vm1, %v2033_v1, %v2035_v20  ;;  %v1897_v26 = vshrl.u32 %v1896_v61, 23  ;;  %v1741_v60 = vadd.s32 %v5549_v49, %v5546_v51 }
 0x2d0   :  { %v1756_v63 = vsel %vm3900_vm7, 0, %v3899_v0  ;;  %v2055_v2 = vadd.s32 1, %v5613_v45  ;;  %v1893_v22 = vand.u32 2147483647, %v5576_v30  ;;  %v1774_v41 = vsel %vm5607_vm2, 0, %v1772_v40 }
 0x2d1   :  { %v1757_v19 = vsub.s32 32, %v1756_v63  ;;  %v1761_v18 = vsub.s32 4294967266, %v1756_v63  ;;  %v3905_v9 = vadd.s32 4294967169, %v1897_v26  ;;  %v1758_v46 = vshll.u32 %v5594_v3, %v1756_v63 }
 0x2d2   :  { %v4250_v27 = vpop.eup %4249  ;;  %v2052_v13 = vmul.u32 %v2045_v34, %v2036_v56  ;;  %vm2054_vm8 = vc.u32 %v5623_v17, %v5612_v44  ;;  %vm1885_vm9 = vcmp.eq.s32.totalorder %v5578_v39, 0  ;;  %v1778_v28 = vadd.s32 3, %v1774_v41 }
 0x2d3   :  { %v4252_v43 = vpop.eup %4251  ;;  %v1889_v21 = vxor.u32 2147483648, %v4250_v27  ;;  %v1759_v49 = vshrl.u32 %v1741_v60, %v1757_v19  ;;  %v1762_v33 = vadd.s32 127, %v1761_v18  ;;  %v2056_v54 = vsel %vm2054_vm8, %v2055_v2, %v5613_v45 }
 0x2d4   :  { %v1886_v51 = vxor.u32 2147483648, %v4252_v43  ;;  %v2057_v24 = vadd.s32 %v2056_v54, %v2052_v13  ;;  %v1903_v35 = vadd.s32 1, %v3905_v9  ;;  %v1900_v52 = vand.u32 8388607, %v1893_v22 }
 0x2d5   :  { %v1890_v55 = vsel %vm1888_vm6, %v1889_v21, %v4252_v43  ;;  %v1760_v32 = vor.u32 %v1759_v49, %v1758_v46  ;;  %v1763_v7 = vshll.u32 %v1762_v33, 23  ;;  %v5649_v6 = vadd.f32 %v5360_v38, %v5261_v16 }
 0x2d6   :  { %v1887_v15 = vsel %vm1885_vm9, %v4250_v27, %v1886_v51  ;;  %v2058_v36 = vadd.s32 536870912, %v2057_v24  ;;  %vm1904_vm10 = vcmp.gt.s32.totalorder %v1903_v35, 0  ;;  %v5651_v45 = vand.u32 3, %v1778_v28 }
 0x2d7   :  { %v1891_v3 = vsel %vm1884_vm5, %v1887_v15, %v1890_v55  ;;  %v1764_v59 = vor.u32 4788187, %v1763_v7  ;;  %v1905_v34 = vsel %vm1904_vm10, %v1903_v35, 0  ;;  %v1767_v39 = vcvt.s32.f32 %v1760_v32 }
 0x2d8   :  { %v1892_v48 = vsel %vm1881_vm4, nan, %v1891_v3  ;;  %v2059_v1 = vshrl.u32 %v2058_v36, 30  ;;  %v1907_v20 = vand.u32 31, %v1905_v34  ;;  %vm1999_vm11 = vcmp.lt.s32.totalorder %v5503_v47, 0 }
 0x2d9   :  { %3778 = vst [vmem:[#allocation5 + $0x68] sm:$0xff] %v1892_v48  ;;  %v1765_v11 = vand.u32 2147483647, %v1764_v59  ;;  %v2053_v42 = vadd.s32 %v5612_v44, %v5623_v17  ;;  %v1901_v40 = vor.u32 8388608, %v1900_v52  ;;  %v2205_v58 = vand.u32 2147483647, %v5649_v6 }
 0x2da   :  { %v2060_v0 = vshll.u32 %v2059_v1, 30  ;;  %v1908_v57 = vsub.s32 32, %v1907_v20  ;;  %v5658_v16 = vshrl.u32 %v1905_v34, 5  ;;  %v2208_v60 = vand.u32 2139095040, %v5649_v6 }
 0x2db   :  { %v1768_v61 = vmul.f32 %v1767_v39, %v1765_v11  ;;  %v1910_v2 = vshll.u32 %v4383_v4, %v1907_v20  ;;  %v1913_v17 = vshll.u32 %v4384_v8, %v1907_v20  ;;  %v1916_v18 = vshll.u32 %v4385_v10, %v1907_v20 }
 0x2dc   :  { %v5656_v56 = vsub.s32 %v2057_v24, %v2060_v0  ;;  %v1911_v26 = vshrl.u32 %v4384_v8, %v1908_v57  ;;  %v1914_v27 = vshrl.u32 %v4385_v10, %v1908_v57  ;;  %v1917_v19 = vshrl.u32 %v4386_v12, %v1908_v57 }
 0x2dd   :  { %v1769_v63 = vxor.u32 2147483648, %v1768_v61  ;;  %v1920_v41 = vshrl.u32 %v4387_v14, %v1908_v57  ;;  %v2083_v43 = vsub.s32 4, %v2059_v1  ;;  %v1919_v46 = vshll.u32 %v4386_v12, %v1907_v20 }
 0x2de   :  { %v2063_v44 = vsub.s32 0, %v5656_v56  ;;  %v1912_v21 = vor.u32 %v1911_v26, %v1910_v2  ;;  %v1915_v49 = vor.u32 %v1914_v27, %v1913_v17  ;;  %v1918_v33 = vor.u32 %v1917_v19, %v1916_v18 }
 0x2df   :  { %v1770_v9 = vsel %vm1687_vm3, %v1769_v63, %v1768_v61  ;;  %v1921_v54 = vor.u32 %v1920_v41, %v1919_v46  ;;  %v1922_v55 = vshll.u32 %v4387_v14, %v1907_v20  ;;  %v1923_v24 = vshrl.u32 %v4388_v23, %v1908_v57 }
 0x2e0   :  { %v1773_v13 = vsel %vm5607_vm2, %v5438_v37, %v1770_v9  ;;  %v3910_v51 = vmin.u32 %v2063_v44, %v5656_v56  ;;  %v5678_v15 = vshll.u32 %v1901_v40, 8  ;;  %v2209_v32 = vshrl.u32 %v2208_v60, 23 }
 0x2e1   :  { %4253 = vcosq.f32 %v1773_v13  ;;  %v5682_v7 = vsel %vm1999_vm11, %v2083_v43, %v2059_v1  ;;  %v1909_v29 = vshrl.u32 %v4383_v4, %v1908_v57  ;;  %v1924_v28 = vor.u32 %v1923_v24, %v1922_v55 }
 0x2e2   :  { %4255 = vsinq.f32 %v1773_v13  ;;  %v2065_v35 = vclz %v3910_v51  ;;  %vm1925_vm12 = vcmp.lt.s32.totalorder %v5658_v16, 1  ;;  %vm5688_vm13 = vcmp.le.f32.partialorder %v1997_v53, 0.7853982 }
 0x2e3   :  { %vm1927_vm14 = vcmp.lt.s32.totalorder %v5658_v16, 3  ;;  %vm1928_vm15 = vcmp.lt.s32.totalorder %v5658_v16, 4  ;;  %v1933_v52 = vsel %vm1925_vm12, %v1912_v21, %v1915_v49  ;;  %v1937_v34 = vsel %vm1925_vm12, %v1915_v49, %v1918_v33 }
 0x2e4   :  { %v3911_v36 = vadd.s32 4294967294, %v2065_v35  ;;  %v1930_v48 = vsel %vm1928_vm15, %v1918_v33, 2102212464  ;;  %v1934_v59 = vsel %vm1928_vm15, %v1921_v54, 920167782  ;;  %vm1781_vm0 = vcmp.eq.s32.totalorder %v5651_v45, 0 }
 0x2e5   :  { %v1938_v1 = vsel %vm1928_vm15, %v1924_v28, 1326507024  ;;  %vm1926_vm2 = vcmp.lt.s32.totalorder %v5658_v16, 2  ;;  %v1935_v53 = vsel %vm1927_vm14, %v1918_v33, %v1934_v59  ;;  %vm1780_vm3 = vcmp.lt.s32.totalorder %v5651_v45, 2 }
 0x2e6   :  { %vm3912_vm1 = vcmp.lt.s32.totalorder %v3911_v36, 0  ;;  %v1939_v20 = vsel %vm1927_vm14, %v1921_v54, %v1938_v1  ;;  %v1929_v39 = vsel %vm1925_vm12, %v1909_v29, %v1912_v21  ;;  %v1936_v0 = vsel %vm1926_vm2, %v1933_v52, %v1935_v53 }
 0x2e7   :  { %v2068_v11 = vsel %vm3912_vm1, 0, %v3911_v36  ;;  %v1940_v57 = vsel %vm1926_vm2, %v1937_v34, %v1939_v20  ;;  %vm1777_vm4 = vweird.f32 %v5438_v37  ;;  %v1931_v26 = vsel %vm1927_vm14, %v1915_v49, %v1930_v48  ;;  %v5735_v49 = vpop.f32.mrb[6].mxu1 }
 0x2e8   :  { %v2069_v61 = vsub.s32 32, %v2068_v11  ;;  %v2073_v40 = vsub.s32 4294967266, %v2068_v11  ;;  %v3917_v60 = vadd.s32 4294967169, %v2209_v32  ;;  %v2070_v44 = vshll.u32 %v5656_v56, %v2068_v11 }
 0x2e9   :  { %v5715_v63 = vmul.u32.u64.low %v5678_v15, %v1940_v57  ;;  %v5716_v2 = vmul.u32.u64.high %v5678_v15, %v1940_v57, %v5715_v63  ;;  %v5719_v27 = vmul.u32.u64.low %v5678_v15, %v1936_v0  ;;  %v5720_v19 = vmul.u32.u64.high %v5678_v15, %v1936_v0, %v5719_v27 }
 0x2ea   :  { %v2071_v17 = vshrl.u32 %v2053_v42, %v2069_v61  ;;  %v2074_v18 = vadd.s32 127, %v2073_v40  ;;  %v2215_v41 = vadd.s32 1, %v3917_v60  ;;  %vm1784_vm5 = vcmp.eq.s32.totalorder %v5651_v45, 2 }
 0x2eb   :  { %v4254_v9 = vpop.eup %4253  ;;  %v1932_v43 = vsel %vm1926_vm2, %v1929_v39, %v1931_v26  ;;  %v5729_v21 = vand.u32 8388607, %v2205_v58  ;;  %v5733_v46 = vadd.f32 %v5360_v38, %v5324_v50  ;;  %v2086_v16 = vsel %vm5688_vm13, 0, %v5682_v7 }
 0x2ec   :  { %v4256_v13 = vpop.eup %4255  ;;  %v1785_v51 = vxor.u32 2147483648, %v4254_v9  ;;  %v2072_v56 = vor.u32 %v2071_v17, %v2070_v44  ;;  %v2075_v42 = vshll.u32 %v2074_v18, 23  ;;  %vm2216_vm6 = vcmp.gt.s32.totalorder %v2215_v41, 0 }
 0x2ed   :  { %v1782_v33 = vxor.u32 2147483648, %v4256_v13  ;;  %vm1950_vm7 = vc.u32 %v5716_v2, %v5719_v27  ;;  %v1951_v54 = vadd.s32 1, %v5720_v19  ;;  %v1948_v55 = vmul.u32 %v5678_v15, %v1932_v43 }
 0x2ee   :  { %v1786_v50 = vsel %vm1784_vm5, %v1785_v51, %v4256_v13  ;;  %v2076_v38 = vor.u32 4788187, %v2075_v42  ;;  %v2217_v24 = vsel %vm2216_vm6, %v2215_v41, 0  ;;  %v2213_v29 = vor.u32 8388608, %v5729_v21 }
 0x2ef   :  { %v1783_v35 = vsel %vm1781_vm0, %v4254_v9, %v1782_v33  ;;  %v1952_v32 = vsel %vm1950_vm7, %v1951_v54, %v5720_v19  ;;  %v2219_v7 = vand.u32 31, %v2217_v24  ;;  %v2079_v52 = vcvt.s32.f32 %v2072_v56 }
 0x2f0   :  { %v1787_v28 = vsel %vm1780_vm3, %v1783_v35, %v1786_v50  ;;  %v2077_v36 = vand.u32 2147483647, %v2076_v38  ;;  %v1953_v48 = vadd.s32 %v1952_v32, %v1948_v55  ;;  %v2090_v34 = vadd.s32 3, %v2086_v16 }
 0x2f1   :  { %v1788_v59 = vsel %vm1777_vm4, nan, %v1787_v28  ;;  %v2220_v15 = vsub.s32 32, %v2219_v7  ;;  %v2101_v1 = vand.u32 2147483647, %v5733_v46  ;;  %vm1895_vm8 = vcmp.lt.s32.totalorder %v5576_v30, 0 }
 0x2f2   :  { %3777 = vst [vmem:[#allocation5 + $0x60] sm:$0xff] %v1788_v59  ;;  %v2080_v53 = vmul.f32 %v2079_v52, %v2077_v36  ;;  %v1954_v20 = vadd.s32 536870912, %v1953_v48  ;;  %v5756_v11 = vshrl.u32 %v2217_v24, 5  ;;  %v2104_v45 = vand.u32 2139095040, %v5733_v46 }
 0x2f3   :  { %v2222_v39 = vshll.u32 %v4383_v4, %v2219_v7  ;;  %v2223_v0 = vshrl.u32 %v4384_v8, %v2220_v15  ;;  %v2225_v37 = vshll.u32 %v4384_v8, %v2219_v7  ;;  %v2226_v57 = vshrl.u32 %v4385_v10, %v2220_v15 }
 0x2f4   :  { %v2081_v61 = vxor.u32 2147483648, %v2080_v53  ;;  %v1955_v40 = vshrl.u32 %v1954_v20, 30  ;;  %v2229_v26 = vshrl.u32 %v4386_v12, %v2220_v15  ;;  %v2232_v60 = vshrl.u32 %v4387_v14, %v2220_v15 }
 0x2f5   :  { %vm5767_vm9 = vcmp.le.f32.partialorder %v1893_v22, 0.7853982  ;;  %v2228_v19 = vshll.u32 %v4385_v10, %v2219_v7  ;;  %v2231_v44 = vshll.u32 %v4386_v12, %v2219_v7  ;;  %v2234_v17 = vshll.u32 %v4387_v14, %v2219_v7 }
 0x2f6   :  { %v2235_v18 = vshrl.u32 %v4388_v23, %v2220_v15  ;;  %v2082_v41 = vsel %vm1999_vm11, %v2081_v61, %v2080_v53  ;;  %v1956_v9 = vshll.u32 %v1955_v40, 30  ;;  %v2224_v43 = vor.u32 %v2223_v0, %v2222_v39 }
 0x2f7   :  { %v2227_v21 = vor.u32 %v2226_v57, %v2225_v37  ;;  %v2085_v22 = vsel %vm5688_vm13, %v5503_v47, %v2082_v41  ;;  %v1979_v13 = vsub.s32 4, %v1955_v40  ;;  %v2233_v51 = vor.u32 %v2232_v60, %v2231_v44 }
 0x2f8   :  { %v2236_v56 = vor.u32 %v2235_v18, %v2234_v17  ;;  %4257 = vcosq.f32 %v2085_v22  ;;  %v5780_v42 = vand.u32 3, %v2090_v34  ;;  %v5782_v33 = vsub.s32 %v1953_v48, %v1956_v9 }
 0x2f9   :  { %v2230_v16 = vor.u32 %v2229_v26, %v2228_v19  ;;  %4259 = vsinq.f32 %v2085_v22  ;;  %v2221_v54 = vshrl.u32 %v4383_v4, %v2220_v15  ;;  %vm2237_vm10 = vcmp.lt.s32.totalorder %v5756_v11, 1 }
 0x2fa   :  { %v2105_v50 = vshrl.u32 %v2104_v45, 23  ;;  %v1959_v38 = vsub.s32 0, %v5782_v33  ;;  %vm2238_vm11 = vcmp.lt.s32.totalorder %v5756_v11, 2  ;;  %vm2240_vm12 = vcmp.lt.s32.totalorder %v5756_v11, 4 }
 0x2fb   :  { %v2245_v3 = vsel %vm2237_vm10, %v2224_v43, %v2227_v21  ;;  %v1980_v55 = vsel %vm1895_vm8, %v1979_v13, %v1955_v40  ;;  %vm2239_vm13 = vcmp.lt.s32.totalorder %v5756_v11, 3  ;;  %v2246_v24 = vsel %vm2240_vm12, %v2233_v51, 920167782 }
 0x2fc   :  { %v2250_v35 = vsel %vm2240_vm12, %v2236_v56, 1326507024  ;;  %v3906_v32 = vmin.u32 %v1959_v38, %v5782_v33  ;;  %v2242_v7 = vsel %vm2240_vm12, %v2230_v16, 2102212464  ;;  %v2247_v28 = vsel %vm2239_vm13, %v2230_v16, %v2246_v24  ;;  %v5822_v56 = vpop.f32.mrb[7].mxu1 }
 0x2fd   :  { %v2249_v36 = vsel %vm2237_vm10, %v2227_v21, %v2230_v16  ;;  %v2248_v52 = vsel %vm2238_vm11, %v2245_v3, %v2247_v28  ;;  %v2251_v48 = vsel %vm2239_vm13, %v2233_v51, %v2250_v35  ;;  %v2253_v59 = vshll.u32 %v2213_v29, 8 }
 0x2fe   :  { %v3913_v34 = vadd.s32 4294967169, %v2105_v50  ;;  %v1961_v15 = vclz %v3906_v32  ;;  %v1982_v53 = vsel %vm5767_vm9, 0, %v1980_v55  ;;  %v2241_v20 = vsel %vm2237_vm10, %v2221_v54, %v2224_v43 }
 0x2ff   :  { %v2243_v45 = vsel %vm2239_vm13, %v2227_v21, %v2242_v7  ;;  %v2252_v39 = vsel %vm2238_vm11, %v2249_v36, %v2251_v48  ;;  %v5805_v0 = vmul.u32.u64.low %v2253_v59, %v2248_v52  ;;  %v5806_v37 = vmul.u32.u64.high %v2253_v59, %v2248_v52, %v5805_v0 }
 0x300   :  { %v3907_v57 = vadd.s32 4294967294, %v1961_v15  ;;  %v5809_v61 = vmul.u32.u64.low %v2253_v59, %v2252_v39  ;;  %v5810_v40 = vmul.u32.u64.high %v2253_v59, %v2252_v39, %v5809_v61  ;;  %v2111_v29 = vadd.s32 1, %v3913_v34 }
 0x301   :  { %vm2092_vm14 = vcmp.lt.s32.totalorder %v5780_v42, 2  ;;  %vm2093_vm15 = vcmp.eq.s32.totalorder %v5780_v42, 0  ;;  %vm2096_vm0 = vcmp.eq.s32.totalorder %v5780_v42, 2  ;;  %v2108_v26 = vand.u32 8388607, %v2101_v1 }
 0x302   :  { %v4258_v60 = vpop.eup %4257  ;;  %v1949_v19 = vadd.s32 %v5719_v27, %v5716_v2  ;;  %vm3908_vm1 = vcmp.lt.s32.totalorder %v3907_v57, 0  ;;  %v2244_v44 = vsel %vm2238_vm11, %v2241_v20, %v2243_v45  ;;  %vm2112_vm2 = vcmp.gt.s32.totalorder %v2111_v29, 0 }
 0x303   :  { %v4260_v17 = vpop.eup %4259  ;;  %v2097_v18 = vxor.u32 2147483648, %v4258_v60  ;;  %v1964_v41 = vsel %vm3908_vm1, 0, %v3907_v57  ;;  %v1986_v9 = vadd.s32 3, %v1982_v53  ;;  %v2263_v43 = vadd.s32 1, %v5806_v37 }
 0x304   :  { %v2094_v21 = vxor.u32 2147483648, %v4260_v17  ;;  %v1965_v22 = vsub.s32 32, %v1964_v41  ;;  %v1969_v13 = vsub.s32 4294967266, %v1964_v41  ;;  %v2113_v51 = vsel %vm2112_vm2, %v2111_v29, 0 }
 0x305   :  { %v2098_v2 = vsel %vm2096_vm0, %v2097_v18, %v4260_v17  ;;  %v1966_v27 = vshll.u32 %v5782_v33, %v1964_v41  ;;  %v2260_v11 = vmul.u32 %v2253_v59, %v2244_v44  ;;  %vm2262_vm3 = vc.u32 %v5810_v40, %v5805_v0 }
 0x306   :  { %v2095_v16 = vsel %vm2093_vm15, %v4258_v60, %v2094_v21  ;;  %v1967_v54 = vshrl.u32 %v1949_v19, %v1965_v22  ;;  %v1970_v50 = vadd.s32 127, %v1969_v13  ;;  %v2264_v38 = vsel %vm2262_vm3, %v2263_v43, %v5806_v37  ;;  %v5852_v13 = vld [vmem:[%s7096_s2] ss:$0 sm:$0xff] }
 0x307   :  { %vm2089_vm4 = vweird.f32 %v5503_v47  ;;  %v2099_v3 = vsel %vm2092_vm14, %v2095_v16, %v2098_v2  ;;  %v2265_v55 = vadd.s32 %v2264_v38, %v2260_v11  ;;  %v2115_v24 = vand.u32 31, %v2113_v51 }
 0x308   :  { %v2100_v35 = vsel %vm2089_vm4, nan, %v2099_v3  ;;  %v1968_v33 = vor.u32 %v1967_v54, %v1966_v27  ;;  %v1971_v32 = vshll.u32 %v1970_v50, 23  ;;  %v5835_v52 = vand.u32 3, %v1986_v9 }
 0x309   :  { %3780 = vst [vmem:[#allocation5 + $0x78] sm:$0xff] %v2100_v35  ;;  %v2266_v7 = vadd.s32 536870912, %v2265_v55  ;;  %v2116_v28 = vsub.s32 32, %v2115_v24  ;;  %v2109_v48 = vor.u32 8388608, %v2108_v26  ;;  %v2114_v59 = vshrl.u32 %v2113_v51, 5 }
 0x30a   :  { %v1972_v36 = vor.u32 4788187, %v1971_v32  ;;  %v1975_v34 = vcvt.s32.f32 %v1968_v33  ;;  %v2127_v45 = vshll.u32 %v4386_v12, %v2115_v24  ;;  %v2118_v57 = vshll.u32 %v4383_v4, %v2115_v24 }
 0x30b   :  { %v2267_v15 = vshrl.u32 %v2266_v7, 30  ;;  %v2119_v47 = vshrl.u32 %v4384_v8, %v2116_v28  ;;  %v2122_v42 = vshrl.u32 %v4385_v10, %v2116_v28  ;;  %v2125_v20 = vshrl.u32 %v4386_v12, %v2116_v28 }
 0x30c   :  { %v1973_v53 = vand.u32 2147483647, %v1972_v36  ;;  %v2128_v39 = vshrl.u32 %v4387_v14, %v2116_v28  ;;  %v2121_v61 = vshll.u32 %v4384_v8, %v2115_v24  ;;  %v2124_v29 = vshll.u32 %v4385_v10, %v2115_v24 }
 0x30d   :  { %v2268_v37 = vshll.u32 %v2267_v15, 30  ;;  %v2130_v19 = vshll.u32 %v4387_v14, %v2115_v24  ;;  %v2131_v44 = vshrl.u32 %v4388_v23, %v2116_v28  ;;  %v2120_v18 = vor.u32 %v2119_v47, %v2118_v57 }
 0x30e   :  { %v1976_v26 = vmul.f32 %v1975_v34, %v1973_v53  ;;  %v2129_v60 = vor.u32 %v2128_v39, %v2127_v45  ;;  %v2123_v41 = vor.u32 %v2122_v42, %v2121_v61  ;;  %v2126_v9 = vor.u32 %v2125_v20, %v2124_v29 }
 0x30f   :  { %v5847_v17 = vsub.s32 %v2265_v55, %v2268_v37  ;;  %v2132_v21 = vor.u32 %v2131_v44, %v2130_v19  ;;  %v2149_v22 = vshll.u32 %v2109_v48, 8  ;;  %v5856_v51 = vadd.f32 %v5852_v13, %v5419_v62 }
 0x310   :  { %v1977_v43 = vxor.u32 2147483648, %v1976_v26  ;;  %vm2133_vm5 = vcmp.lt.s32.totalorder %v2114_v59, 1  ;;  %vm2136_vm6 = vcmp.lt.s32.totalorder %v2114_v59, 4  ;;  %v5861_v27 = vadd.f32 %v5852_v13, %v5488_v25 }
 0x311   :  { %v2271_v2 = vsub.s32 0, %v5847_v17  ;;  %v2117_v16 = vshrl.u32 %v4383_v4, %v2116_v28  ;;  %vm2135_vm7 = vcmp.lt.s32.totalorder %v2114_v59, 3  ;;  %v2142_v54 = vsel %vm2136_vm6, %v2129_v60, 920167782 }
 0x312   :  { %v1978_v11 = vsel %vm1895_vm8, %v1977_v43, %v1976_v26  ;;  %v2138_v38 = vsel %vm2136_vm6, %v2126_v9, 2102212464  ;;  %v2141_v3 = vsel %vm2133_vm5, %v2120_v18, %v2123_v41  ;;  %v2143_v25 = vsel %vm2135_vm7, %v2126_v9, %v2142_v54 }
 0x313   :  { %v1981_v62 = vsel %vm5767_vm9, %v5576_v30, %v1978_v11  ;;  %v3918_v50 = vmin.u32 %v2271_v2, %v5847_v17  ;;  %v2145_v55 = vsel %vm2133_vm5, %v2123_v41, %v2126_v9  ;;  %v2146_v24 = vsel %vm2136_vm6, %v2132_v21, 1326507024 }
 0x314   :  { %4261 = vcosq.f32 %v1981_v62  ;;  %v2291_v33 = vsub.s32 4, %v2267_v15  ;;  %vm2134_vm8 = vcmp.lt.s32.totalorder %v2114_v59, 2  ;;  %v2137_v32 = vsel %vm2133_vm5, %v2117_v16, %v2120_v18 }
 0x315   :  { %4263 = vsinq.f32 %v1981_v62  ;;  %v2273_v35 = vclz %v3918_v50  ;;  %v2139_v63 = vsel %vm2135_vm7, %v2123_v41, %v2138_v38  ;;  %v2144_v7 = vsel %vm2134_vm8, %v2141_v3, %v2143_v25  ;;  %v5903_v41 = vpop.f32.mrb[8].mxu1 }
 0x316   :  { %v2147_v28 = vsel %vm2135_vm7, %v2129_v60, %v2146_v24  ;;  %v5876_v34 = vmul.u32.u64.low %v2149_v22, %v2144_v7  ;;  %v5877_v47 = vmul.u32.u64.high %v2149_v22, %v2144_v7, %v5876_v34  ;;  %vm2207_vm9 = vcmp.lt.s32.totalorder %v5649_v6, 0 }
 0x317   :  { %v3919_v36 = vadd.s32 4294967294, %v2273_v35  ;;  %v2148_v48 = vsel %vm2134_vm8, %v2145_v55, %v2147_v28  ;;  %vm5885_vm10 = vcmp.le.f32.partialorder %v2205_v58, 0.7853982  ;;  %v2140_v45 = vsel %vm2134_vm8, %v2137_v32, %v2139_v63 }
 0x318   :  { %v5880_v42 = vmul.u32.u64.low %v2149_v22, %v2148_v48  ;;  %v5881_v53 = vmul.u32.u64.high %v2149_v22, %v2148_v48, %v5880_v42  ;;  %v2416_v59 = vand.u32 2139095040, %v5856_v51  ;;  %vm1988_vm12 = vcmp.lt.s32.totalorder %v5835_v52, 2 }
 0x319   :  { %vm3920_vm11 = vcmp.lt.s32.totalorder %v3919_v36, 0  ;;  %v2261_v39 = vadd.s32 %v5805_v0, %v5810_v40  ;;  %v2292_v57 = vsel %vm2207_vm9, %v2291_v33, %v2267_v15  ;;  %v2312_v61 = vand.u32 2139095040, %v5861_v27 }
 0x31a   :  { %v2276_v37 = vsel %vm3920_vm11, 0, %v3919_v36  ;;  %vm1985_vm13 = vweird.f32 %v5576_v30  ;;  %v2159_v26 = vadd.s32 1, %v5877_v47  ;;  %v2413_v60 = vand.u32 2147483647, %v5856_v51 }
 0x31b   :  { %v2277_v58 = vsub.s32 32, %v2276_v37  ;;  %v2281_v29 = vsub.s32 4294967266, %v2276_v37  ;;  %vm1992_vm14 = vcmp.eq.s32.totalorder %v5835_v52, 2  ;;  %v2156_v19 = vmul.u32 %v2149_v22, %v2140_v45 }
 0x31c   :  { %vm2158_vm15 = vc.u32 %v5881_v53, %v5876_v34  ;;  %v2417_v0 = vshrl.u32 %v2416_v59, 23  ;;  %v2278_v40 = vshll.u32 %v5847_v17, %v2276_v37  ;;  %v2294_v43 = vsel %vm5885_vm10, 0, %v2292_v57 }
 0x31d   :  { %v2279_v44 = vshrl.u32 %v2261_v39, %v2277_v58  ;;  %v2282_v15 = vadd.s32 127, %v2281_v29  ;;  %v2160_v18 = vsel %vm2158_vm15, %v2159_v26, %v5877_v47  ;;  %v2313_v11 = vshrl.u32 %v2312_v61, 23 }
 0x31e   :  { %v4262_v9 = vpop.eup %4261  ;;  %v2161_v21 = vadd.s32 %v2160_v18, %v2156_v19  ;;  %v3925_v2 = vadd.s32 4294967169, %v2417_v0  ;;  %v2420_v17 = vand.u32 8388607, %v2413_v60  ;;  %v2309_v25 = vand.u32 2147483647, %v5861_v27 }
 0x31f   :  { %v4264_v16 = vpop.eup %4263  ;;  %v1993_v22 = vxor.u32 2147483648, %v4262_v9  ;;  %v2280_v54 = vor.u32 %v2279_v44, %v2278_v40  ;;  %v2283_v62 = vshll.u32 %v2282_v15, 23  ;;  %vm1989_vm0 = vcmp.eq.s32.totalorder %v5835_v52, 0 }
 0x320   :  { %v1990_v50 = vxor.u32 2147483648, %v4264_v16  ;;  %v2162_v38 = vadd.s32 536870912, %v2161_v21  ;;  %v2423_v3 = vadd.s32 1, %v3925_v2  ;;  %v2298_v35 = vadd.s32 3, %v2294_v43 }
 0x321   :  { %v1994_v55 = vsel %vm1992_vm14, %v1993_v22, %v4264_v16  ;;  %v2284_v24 = vor.u32 4788187, %v2283_v62  ;;  %v3921_v63 = vadd.s32 4294967169, %v2313_v11  ;;  %v2287_v36 = vcvt.s32.f32 %v2280_v54 }
 0x322   :  { %v1991_v33 = vsel %vm1989_vm0, %v4262_v9, %v1990_v50  ;;  %v5913_v32 = vshrl.u32 %v2162_v38, 30  ;;  %vm2424_vm1 = vcmp.gt.s32.totalorder %v2423_v3, 0  ;;  %v2421_v45 = vor.u32 8388608, %v2420_v17 }
 0x323   :  { %v1995_v7 = vsel %vm1988_vm12, %v1991_v33, %v1994_v55  ;;  %v2285_v28 = vand.u32 2147483647, %v2284_v24  ;;  %v2425_v48 = vsel %vm2424_vm1, %v2423_v3, 0  ;;  %v5922_v59 = vand.u32 8388607, %v2309_v25 }
 0x324   :  { %v1996_v47 = vsel %vm1985_vm13, nan, %v1995_v7  ;;  %v2164_v42 = vshll.u32 %v5913_v32, 30  ;;  %v2427_v37 = vand.u32 31, %v2425_v48  ;;  %v5924_v57 = vand.u32 3, %v2298_v35 }
 0x325   :  { %3779 = vst [vmem:[#allocation5 + $0x70] sm:$0xff] %v1996_v47  ;;  %v2288_v39 = vmul.f32 %v2287_v36, %v2285_v28  ;;  %v2157_v52 = vadd.s32 %v5876_v34, %v5881_v53  ;;  %v5929_v29 = vshrl.u32 %v2425_v48, 5  ;;  %v2319_v26 = vadd.s32 1, %v3921_v63 }
 0x326   :  { %v5927_v61 = vsub.s32 %v2161_v21, %v2164_v42  ;;  %v2428_v30 = vsub.s32 32, %v2427_v37  ;;  %v2187_v0 = vsub.s32 4, %v5913_v32  ;;  %v5933_v40 = vshll.u32 %v2421_v45, 8 }
 0x327   :  { %v2289_v58 = vxor.u32 2147483648, %v2288_v39  ;;  %v2317_v44 = vor.u32 8388608, %v5922_v59  ;;  %v2430_v34 = vshll.u32 %v4383_v4, %v2427_v37  ;;  %vm2103_vm2 = vcmp.lt.s32.totalorder %v5733_v46, 0 }
 0x328   :  { %v2167_v19 = vsub.s32 0, %v5927_v61  ;;  %v2431_v53 = vshrl.u32 %v4384_v8, %v2428_v30  ;;  %v2434_v18 = vshrl.u32 %v4385_v10, %v2428_v30  ;;  %v2433_v21 = vshll.u32 %v4384_v8, %v2427_v37 }
 0x329   :  { %v2290_v15 = vsel %vm2207_vm9, %v2289_v58, %v2288_v39  ;;  %v2437_v2 = vshrl.u32 %v4386_v12, %v2428_v30  ;;  %v2436_v11 = vshll.u32 %v4385_v10, %v2427_v37  ;;  %vm2445_vm3 = vcmp.lt.s32.totalorder %v5929_v29, 1 }
 0x32a   :  { %v2293_v9 = vsel %vm5885_vm10, %v5649_v6, %v2290_v15  ;;  %v3914_v43 = vmin.u32 %v2167_v19, %v5927_v61  ;;  %vm2320_vm4 = vcmp.gt.s32.totalorder %v2319_v26, 0  ;;  %v2432_v22 = vor.u32 %v2431_v53, %v2430_v34  ;;  %v5991_v15 = vpop.f32.mrb[9].mxu1 }
 0x32b   :  { %4265 = vcosq.f32 %v2293_v9  ;;  %v2435_v54 = vor.u32 %v2434_v18, %v2433_v21  ;;  %v2429_v20 = vshrl.u32 %v4383_v4, %v2428_v30  ;;  %v2438_v62 = vor.u32 %v2437_v2, %v2436_v11 }
 0x32c   :  { %4267 = vsinq.f32 %v2293_v9  ;;  %v2169_v16 = vclz %v3914_v43  ;;  %v2439_v17 = vshll.u32 %v4386_v12, %v2427_v37  ;;  %v2440_v50 = vshrl.u32 %v4387_v14, %v2428_v30 }
 0x32d   :  { %vm5955_vm5 = vcmp.le.f32.partialorder %v2101_v1, 0.7853982  ;;  %v2442_v55 = vshll.u32 %v4387_v14, %v2427_v37  ;;  %v2443_v24 = vshrl.u32 %v4388_v23, %v2428_v30  ;;  %vm2448_vm6 = vcmp.lt.s32.totalorder %v5929_v29, 4 }
 0x32e   :  { %v3915_v3 = vadd.s32 4294967294, %v2169_v16  ;;  %vm2304_vm7 = vcmp.eq.s32.totalorder %v5924_v57, 2  ;;  %v2441_v35 = vor.u32 %v2440_v50, %v2439_v17  ;;  %vm2446_vm8 = vcmp.lt.s32.totalorder %v5929_v29, 2 }
 0x32f   :  { %vm2447_vm9 = vcmp.lt.s32.totalorder %v5929_v29, 3  ;;  %v2450_v1 = vsel %vm2448_vm6, %v2438_v62, 2102212464  ;;  %vm2301_vm10 = vcmp.eq.s32.totalorder %v5924_v57, 0  ;;  %v2444_v33 = vor.u32 %v2443_v24, %v2442_v55 }
 0x330   :  { %vm3916_vm11 = vcmp.lt.s32.totalorder %v3915_v3, 0  ;;  %v2449_v63 = vsel %vm2445_vm3, %v2429_v20, %v2432_v22  ;;  %v2453_v7 = vsel %vm2445_vm3, %v2432_v22, %v2435_v54  ;;  %vm2300_vm12 = vcmp.lt.s32.totalorder %v5924_v57, 2 }
 0x331   :  { %v2172_v28 = vsel %vm3916_vm11, 0, %v3915_v3  ;;  %v2451_v36 = vsel %vm2447_vm9, %v2435_v54, %v2450_v1  ;;  %v2454_v48 = vsel %vm2448_vm6, %v2441_v35, 920167782  ;;  %v2321_v47 = vsel %vm2320_vm4, %v2319_v26, 0 }
 0x332   :  { %vm2297_vm13 = vweird.f32 %v5649_v6  ;;  %v2173_v42 = vsub.s32 32, %v2172_v28  ;;  %v2177_v45 = vsub.s32 4294967266, %v2172_v28  ;;  %v2455_v39 = vsel %vm2447_vm9, %v2438_v62, %v2454_v48 }
 0x333   :  { %v2457_v37 = vsel %vm2445_vm3, %v2435_v54, %v2438_v62  ;;  %v2174_v58 = vshll.u32 %v5927_v61, %v2172_v28  ;;  %v2188_v30 = vsel %vm2103_vm2, %v2187_v0, %v5913_v32  ;;  %v2456_v19 = vsel %vm2446_vm8, %v2453_v7, %v2455_v39 }
 0x334   :  { %v2458_v26 = vsel %vm2448_vm6, %v2444_v33, 1326507024  ;;  %v2175_v34 = vshrl.u32 %v2157_v52, %v2173_v42  ;;  %v2178_v53 = vadd.s32 127, %v2177_v45  ;;  %v2323_v9 = vand.u32 31, %v2321_v47 }
 0x335   :  { %v2459_v18 = vsel %vm2447_vm9, %v2441_v35, %v2458_v26  ;;  %v4266_v43 = vpop.eup %4265  ;;  %v2452_v61 = vsel %vm2446_vm8, %v2449_v63, %v2451_v36  ;;  %v6000_v0 = vmul.u32.u64.low %v5933_v40, %v2456_v19  ;;  %v6001_v21 = vmul.u32.u64.high %v5933_v40, %v2456_v19, %v6000_v0 }
 0x336   :  { %v2460_v32 = vsel %vm2446_vm8, %v2457_v37, %v2459_v18  ;;  %v4268_v2 = vpop.eup %4267  ;;  %v2305_v11 = vxor.u32 2147483648, %v4266_v43  ;;  %v2176_v52 = vor.u32 %v2175_v34, %v2174_v58  ;;  %v2179_v16 = vshll.u32 %v2178_v53, 23 }
 0x337   :  { %v2324_v22 = vsub.s32 32, %v2323_v9  ;;  %v2302_v54 = vxor.u32 2147483648, %v4268_v2  ;;  %v2190_v20 = vsel %vm5955_vm5, 0, %v2188_v30  ;;  %v2468_v3 = vmul.u32 %v5933_v40, %v2452_v61 }
 0x338   :  { %v6007_v62 = vmul.u32.u64.low %v5933_v40, %v2460_v32  ;;  %v6008_v17 = vmul.u32.u64.high %v5933_v40, %v2460_v32, %v6007_v62  ;;  %v2306_v29 = vsel %vm2304_vm7, %v2305_v11, %v4268_v2  ;;  %v2180_v50 = vor.u32 4788187, %v2179_v16 }
 0x339   :  { %v6013_v55 = vshrl.u32 %v2321_v47, 5  ;;  %v2303_v24 = vsel %vm2301_vm10, %v4266_v43, %v2302_v54  ;;  %v2471_v35 = vadd.s32 1, %v6001_v21  ;;  %v2326_v1 = vshll.u32 %v4383_v4, %v2323_v9 }
 0x33a   :  { %v2327_v33 = vshrl.u32 %v4384_v8, %v2324_v22  ;;  %v2307_v63 = vsel %vm2300_vm12, %v2303_v24, %v2306_v29  ;;  %v2181_v7 = vand.u32 2147483647, %v2180_v50  ;;  %v2183_v28 = vcvt.s32.f32 %v2176_v52 }
 0x33b   :  { %v2330_v36 = vshrl.u32 %v4385_v10, %v2324_v22  ;;  %v2308_v40 = vsel %vm2297_vm13, nan, %v2307_v63  ;;  %vm2470_vm14 = vc.u32 %v6008_v17, %v6000_v0  ;;  %v2329_v48 = vshll.u32 %v4384_v8, %v2323_v9 }
 0x33c   :  { %v2332_v47 = vshll.u32 %v4385_v10, %v2323_v9  ;;  %3782 = vst [vmem:[#allocation5 + $0x88] sm:$0xff] %v2308_v40  ;;  %v2184_v42 = vmul.f32 %v2183_v28, %v2181_v7  ;;  %v2472_v45 = vsel %vm2470_vm14, %v2471_v35, %v6001_v21  ;;  %v2328_v57 = vor.u32 %v2327_v33, %v2326_v1 }
 0x33d   :  { %v2333_v39 = vshrl.u32 %v4386_v12, %v2324_v22  ;;  %v2473_v37 = vadd.s32 %v2472_v45, %v2468_v3  ;;  %v2331_v58 = vor.u32 %v2330_v36, %v2329_v48  ;;  %v2335_v30 = vshll.u32 %v4386_v12, %v2323_v9 }
 0x33e   :  { %v2336_v6 = vshrl.u32 %v4387_v14, %v2324_v22  ;;  %v2185_v19 = vxor.u32 2147483648, %v2184_v42  ;;  %v2338_v34 = vshll.u32 %v4387_v14, %v2323_v9  ;;  %v2339_v53 = vshrl.u32 %v4388_v23, %v2324_v22 }
 0x33f   :  { %v2334_v26 = vor.u32 %v2333_v39, %v2332_v47  ;;  %v2194_v18 = vadd.s32 3, %v2190_v20  ;;  %v2474_v43 = vadd.s32 536870912, %v2473_v37  ;;  %vm2341_vm15 = vcmp.lt.s32.totalorder %v6013_v55, 1 }
 0x340   :  { %v2337_v61 = vor.u32 %v2336_v6, %v2335_v30  ;;  %v2186_v32 = vsel %vm2103_vm2, %v2185_v19, %v2184_v42  ;;  %v2325_v21 = vshrl.u32 %v4383_v4, %v2324_v22  ;;  %v2340_v2 = vor.u32 %v2339_v53, %v2338_v34 }
 0x341   :  { %vm2342_vm0 = vcmp.lt.s32.totalorder %v6013_v55, 2  ;;  %v2189_v11 = vsel %vm5955_vm5, %v5733_v46, %v2186_v32  ;;  %v2475_v9 = vshrl.u32 %v2474_v43, 30  ;;  %vm2344_vm1 = vcmp.lt.s32.totalorder %v6013_v55, 4 }
 0x342   :  { %v2349_v52 = vsel %vm2341_vm15, %v2328_v57, %v2331_v58  ;;  %4269 = vcosq.f32 %v2189_v11  ;;  %vm2343_vm3 = vcmp.lt.s32.totalorder %v6013_v55, 3  ;;  %v2346_v16 = vsel %vm2344_vm1, %v2334_v26, 2102212464 }
 0x343   :  { %v2350_v54 = vsel %vm2344_vm1, %v2337_v61, 920167782  ;;  %4271 = vsinq.f32 %v2189_v11  ;;  %v2476_v22 = vshll.u32 %v2475_v9, 30  ;;  %v2353_v62 = vsel %vm2341_vm15, %v2331_v58, %v2334_v26  ;;  %v6100_v11 = vpop.f32.mrb[10].mxu1 }
 0x344   :  { %v2351_v20 = vsel %vm2343_vm3, %v2334_v26, %v2350_v54  ;;  %v2354_v29 = vsel %vm2344_vm1, %v2340_v2, 1326507024  ;;  %v2357_v50 = vshll.u32 %v2317_v44, 8  ;;  %v6055_v3 = vadd.f32 %v5852_v13, %v5556_v5 }
 0x345   :  { %v2352_v38 = vsel %vm2342_vm0, %v2349_v52, %v2351_v20  ;;  %v6057_v24 = vsub.s32 %v2473_v37, %v2476_v22  ;;  %v2499_v35 = vsub.s32 4, %v2475_v9  ;;  %v2345_v1 = vsel %vm2341_vm15, %v2325_v21, %v2328_v57 }
 0x346   :  { %v2355_v33 = vsel %vm2343_vm3, %v2337_v61, %v2354_v29  ;;  %v2347_v63 = vsel %vm2343_vm3, %v2331_v58, %v2346_v16  ;;  %v6063_v28 = vmul.u32.u64.low %v2357_v50, %v2352_v38  ;;  %v6064_v36 = vmul.u32.u64.high %v2357_v50, %v2352_v38, %v6063_v28 }
 0x347   :  { %v2356_v7 = vsel %vm2342_vm0, %v2353_v62, %v2355_v33  ;;  %v2195_v59 = vand.u32 3, %v2194_v18  ;;  %v2479_v44 = vsub.s32 0, %v6057_v24  ;;  %vm2415_vm2 = vcmp.lt.s32.totalorder %v5856_v51, 0 }
 0x348   :  { %v6068_v5 = vmul.u32.u64.low %v2357_v50, %v2356_v7  ;;  %v6069_v40 = vmul.u32.u64.high %v2357_v50, %v2356_v7, %v6068_v5  ;;  %v2624_v48 = vand.u32 2139095040, %v6055_v3  ;;  %vm2193_vm4 = vweird.f32 %v5733_v46 }
 0x349   :  { %v3926_v47 = vmin.u32 %v2479_v44, %v6057_v24  ;;  %v2500_v42 = vsel %vm2415_vm2, %v2499_v35, %v2475_v9  ;;  %v2348_v45 = vsel %vm2342_vm0, %v2345_v1, %v2347_v63  ;;  %v2621_v57 = vand.u32 2147483647, %v6055_v3 }
 0x34a   :  { %vm6082_vm5 = vcmp.le.f32.partialorder %v2413_v60, 0.7853982  ;;  %v2367_v37 = vadd.s32 1, %v6064_v36  ;;  %v2625_v58 = vshrl.u32 %v2624_v48, 23  ;;  %v6089_v30 = vadd.f32 %v5852_v13, %v5631_v31 }
 0x34b   :  { %vm2196_vm6 = vcmp.lt.s32.totalorder %v2195_v59, 2  ;;  %vm2197_vm7 = vcmp.eq.s32.totalorder %v2195_v59, 0  ;;  %vm2200_vm8 = vcmp.eq.s32.totalorder %v2195_v59, 2  ;;  %v2481_v55 = vclz %v3926_v47 }
 0x34c   :  { %v4270_v6 = vpop.eup %4269  ;;  %v2502_v19 = vsel %vm6082_vm5, 0, %v2500_v42  ;;  %v2364_v26 = vmul.u32 %v2357_v50, %v2348_v45  ;;  %vm2366_vm9 = vc.u32 %v6069_v40, %v6063_v28  ;;  %v3933_v60 = vadd.s32 4294967169, %v2625_v58 }
 0x34d   :  { %v4272_v34 = vpop.eup %4271  ;;  %v2201_v53 = vxor.u32 2147483648, %v4270_v6  ;;  %v3927_v18 = vadd.s32 4294967294, %v2481_v55  ;;  %v2368_v43 = vsel %vm2366_vm9, %v2367_v37, %v6064_v36  ;;  %v2628_v31 = vand.u32 8388607, %v2621_v57 }
 0x34e   :  { %v2198_v61 = vxor.u32 2147483648, %v4272_v34  ;;  %vm2311_vm10 = vcmp.lt.s32.totalorder %v5861_v27, 0  ;;  %v2369_v32 = vadd.s32 %v2368_v43, %v2364_v26  ;;  %v2631_v21 = vadd.s32 1, %v3933_v60 }
 0x34f   :  { %v2520_v2 = vand.u32 2139095040, %v6089_v30  ;;  %v2202_v9 = vsel %vm2200_vm8, %v2201_v53, %v4272_v34  ;;  %v2469_v52 = vadd.s32 %v6000_v0, %v6008_v17  ;;  %vm3928_vm11 = vcmp.lt.s32.totalorder %v3927_v18, 0 }
 0x350   :  { %v2506_v16 = vadd.s32 3, %v2502_v19  ;;  %v2199_v54 = vsel %vm2197_vm7, %v4270_v6, %v2198_v61  ;;  %v2484_v22 = vsel %vm3928_vm11, 0, %v3927_v18  ;;  %v2370_v20 = vadd.s32 536870912, %v2369_v32 }
 0x351   :  { %vm2632_vm12 = vcmp.gt.s32.totalorder %v2631_v21, 0  ;;  %v2203_v62 = vsel %vm2196_vm6, %v2199_v54, %v2202_v9  ;;  %v2485_v38 = vsub.s32 32, %v2484_v22  ;;  %v2489_v29 = vsub.s32 4294967266, %v2484_v22 }
 0x352   :  { %v2629_v50 = vor.u32 8388608, %v2628_v31  ;;  %v2204_v35 = vsel %vm2193_vm4, nan, %v2203_v62  ;;  %v2371_v1 = vshrl.u32 %v2370_v20, 30  ;;  %v2633_v33 = vsel %vm2632_vm12, %v2631_v21, 0 }
 0x353   :  { %v2521_v63 = vshrl.u32 %v2520_v2, 23  ;;  %3781 = vst [vmem:[#allocation5 + $0x80] sm:$0xff] %v2204_v35  ;;  %v2486_v0 = vshll.u32 %v6057_v24, %v2484_v22  ;;  %v2487_v17 = vshrl.u32 %v2469_v52, %v2485_v38  ;;  %v2490_v7 = vadd.s32 127, %v2489_v29 }
 0x354   :  { %vm6112_vm13 = vcmp.le.f32.partialorder %v2309_v25, 0.7853982  ;;  %v2635_v59 = vand.u32 31, %v2633_v33  ;;  %v6116_v44 = vand.u32 3, %v2506_v16  ;;  %v2372_v5 = vshll.u32 %v2371_v1, 30 }
 0x355   :  { %v2395_v46 = vsub.s32 4, %v2371_v1  ;;  %v2517_v48 = vand.u32 2147483647, %v6089_v30  ;;  %v2488_v47 = vor.u32 %v2487_v17, %v2486_v0  ;;  %v2491_v42 = vshll.u32 %v2490_v7, 23 }
 0x356   :  { %v2365_v24 = vadd.s32 %v6063_v28, %v6069_v40  ;;  %v2636_v45 = vsub.s32 32, %v2635_v59  ;;  %v6121_v37 = vsub.s32 %v2369_v32, %v2372_v5  ;;  %v2634_v58 = vshrl.u32 %v2633_v33, 5 }
 0x357   :  { %v6123_v25 = vshll.u32 %v2629_v50, 8  ;;  %v3929_v55 = vadd.s32 4294967169, %v2521_v63  ;;  %v2492_v6 = vor.u32 4788187, %v2491_v42  ;;  %v6127_v19 = vsel %vm2311_vm10, %v2395_v46, %v2371_v1 }
 0x358   :  { %v2638_v26 = vshll.u32 %v4383_v4, %v2635_v59  ;;  %v2641_v60 = vshll.u32 %v4384_v8, %v2635_v59  ;;  %v2375_v34 = vsub.s32 0, %v6121_v37  ;;  %v2639_v28 = vshrl.u32 %v4384_v8, %v2636_v45 }
 0x359   :  { %v2642_v40 = vshrl.u32 %v4385_v10, %v2636_v45  ;;  %v2644_v53 = vshll.u32 %v4385_v10, %v2635_v59  ;;  %v2493_v18 = vand.u32 2147483647, %v2492_v6  ;;  %v2495_v43 = vcvt.s32.f32 %v2488_v47 }
 0x35a   :  { %v2645_v31 = vshrl.u32 %v4386_v12, %v2636_v45  ;;  %v2648_v61 = vshrl.u32 %v4387_v14, %v2636_v45  ;;  %v3922_v32 = vmin.u32 %v2375_v34, %v6121_v37  ;;  %v2640_v21 = vor.u32 %v2639_v28, %v2638_v26 }
 0x35b   :  { %v2647_v2 = vshll.u32 %v4386_v12, %v2635_v59  ;;  %v6141_v9 = vand.u32 8388607, %v2517_v48  ;;  %v2496_v52 = vmul.f32 %v2495_v43, %v2493_v18  ;;  %v2643_v16 = vor.u32 %v2642_v40, %v2641_v60  ;;  %v6164_v18 = vpop.f32.mrb[11].mxu1 }
 0x35c   :  { %v2646_v54 = vor.u32 %v2645_v31, %v2644_v53  ;;  %v2527_v22 = vadd.s32 1, %v3929_v55  ;;  %v2377_v20 = vclz %v3922_v32  ;;  %v2398_v62 = vsel %vm6112_vm13, 0, %v6127_v19 }
 0x35d   :  { %v2637_v38 = vshrl.u32 %v4383_v4, %v2636_v45  ;;  %v2649_v29 = vor.u32 %v2648_v61, %v2647_v2  ;;  %v2497_v50 = vxor.u32 2147483648, %v2496_v52  ;;  %v2650_v35 = vshll.u32 %v4387_v14, %v2635_v59 }
 0x35e   :  { %v2651_v1 = vshrl.u32 %v4388_v23, %v2636_v45  ;;  %vm2653_vm14 = vcmp.lt.s32.totalorder %v2634_v58, 1  ;;  %v3923_v33 = vadd.s32 4294967294, %v2377_v20  ;;  %vm2655_vm15 = vcmp.lt.s32.totalorder %v2634_v58, 3 }
 0x35f   :  { %vm2656_vm0 = vcmp.lt.s32.totalorder %v2634_v58, 4  ;;  %v2657_v63 = vsel %vm2653_vm14, %v2637_v38, %v2640_v21  ;;  %v2498_v0 = vsel %vm2415_vm2, %v2497_v50, %v2496_v52  ;;  %v2661_v5 = vsel %vm2653_vm14, %v2640_v21, %v2643_v16 }
 0x360   :  { %v2652_v17 = vor.u32 %v2651_v1, %v2650_v35  ;;  %v2658_v7 = vsel %vm2656_vm0, %v2646_v54, 2102212464  ;;  %v2501_v59 = vsel %vm6082_vm5, %v5856_v51, %v2498_v0  ;;  %vm3924_vm1 = vcmp.lt.s32.totalorder %v3923_v33, 0 }
 0x361   :  { %v2659_v46 = vsel %vm2655_vm15, %v2643_v16, %v2658_v7  ;;  %v2662_v47 = vsel %vm2656_vm0, %v2649_v29, 920167782  ;;  %4273 = vcosq.f32 %v2501_v59  ;;  %v2380_v42 = vsel %vm3924_vm1, 0, %v3923_v33 }
 0x362   :  { %vm2654_vm3 = vcmp.lt.s32.totalorder %v2634_v58, 2  ;;  %v2663_v45 = vsel %vm2655_vm15, %v2646_v54, %v2662_v47  ;;  %4275 = vsinq.f32 %v2501_v59  ;;  %v2381_v55 = vsub.s32 32, %v2380_v42 }
 0x363   :  { %v2385_v6 = vsub.s32 4294967266, %v2380_v42  ;;  %v2660_v19 = vsel %vm2654_vm3, %v2657_v63, %v2659_v46  ;;  %v2382_v26 = vshll.u32 %v6121_v37, %v2380_v42  ;;  %v2664_v60 = vsel %vm2654_vm3, %v2661_v5, %v2663_v45 }
 0x364   :  { %v2665_v39 = vsel %vm2653_vm14, %v2643_v16, %v2646_v54  ;;  %v2666_v34 = vsel %vm2656_vm0, %v2652_v17, 1326507024  ;;  %v2383_v28 = vshrl.u32 %v2365_v24, %v2381_v55  ;;  %vm2528_vm2 = vcmp.gt.s32.totalorder %v2527_v22, 0 }
 0x365   :  { %v2386_v40 = vadd.s32 127, %v2385_v6  ;;  %v2667_v53 = vsel %vm2655_vm15, %v2649_v29, %v2666_v34  ;;  %v6167_v31 = vmul.u32.u64.low %v6123_v25, %v2664_v60  ;;  %v6168_v61 = vmul.u32.u64.high %v6123_v25, %v2664_v60, %v6167_v31 }
 0x366   :  { %v2668_v43 = vsel %vm2654_vm3, %v2665_v39, %v2667_v53  ;;  %v2529_v32 = vsel %vm2528_vm2, %v2527_v22, 0  ;;  %v2384_v37 = vor.u32 %v2383_v28, %v2382_v26  ;;  %vm2508_vm4 = vcmp.lt.s32.totalorder %v6116_v44, 2 }
 0x367   :  { %v2387_v21 = vshll.u32 %v2386_v40, 23  ;;  %v6172_v2 = vmul.u32.u64.low %v6123_v25, %v2668_v43  ;;  %v6173_v52 = vmul.u32.u64.high %v6123_v25, %v2668_v43, %v6172_v2  ;;  %v2531_v24 = vand.u32 31, %v2529_v32 }
 0x368   :  { %vm2505_vm5 = vweird.f32 %v5856_v51  ;;  %vm2509_vm6 = vcmp.eq.s32.totalorder %v6116_v44, 0  ;;  %vm2512_vm7 = vcmp.eq.s32.totalorder %v6116_v44, 2  ;;  %v2525_v16 = vor.u32 8388608, %v6141_v9 }
 0x369   :  { %v2388_v58 = vor.u32 4788187, %v2387_v21  ;;  %v2402_v54 = vadd.s32 3, %v2398_v62  ;;  %v2676_v22 = vmul.u32 %v6123_v25, %v2660_v19  ;;  %v2679_v20 = vadd.s32 1, %v6168_v61 }
 0x36a   :  { %v2532_v38 = vsub.s32 32, %v2531_v24  ;;  %v2391_v50 = vcvt.s32.f32 %v2384_v37  ;;  %vm2678_vm8 = vc.u32 %v6173_v52, %v6167_v31  ;;  %v2534_v35 = vshll.u32 %v4383_v4, %v2531_v24 }
 0x36b   :  { %v2389_v29 = vand.u32 2147483647, %v2388_v58  ;;  %v4274_v1 = vpop.eup %4273  ;;  %v2680_v33 = vsel %vm2678_vm8, %v2679_v20, %v6168_v61  ;;  %v2537_v9 = vshll.u32 %v4384_v8, %v2531_v24  ;;  %v2530_v46 = vshrl.u32 %v2529_v32, 5 }
 0x36c   :  { %v2535_v63 = vshrl.u32 %v4384_v8, %v2532_v38  ;;  %v2538_v62 = vshrl.u32 %v4385_v10, %v2532_v38  ;;  %v4276_v25 = vpop.eup %4275  ;;  %v2513_v0 = vxor.u32 2147483648, %v4274_v1  ;;  %v2681_v7 = vadd.s32 %v2680_v33, %v2676_v22 }
 0x36d   :  { %v2392_v17 = vmul.f32 %v2391_v50, %v2389_v29  ;;  %v2541_v5 = vshrl.u32 %v4386_v12, %v2532_v38  ;;  %v2510_v59 = vxor.u32 2147483648, %v4276_v25  ;;  %v2540_v42 = vshll.u32 %v4385_v10, %v2531_v24 }
 0x36e   :  { %v2536_v47 = vor.u32 %v2535_v63, %v2534_v35  ;;  %v2514_v45 = vsel %vm2512_vm7, %v2513_v0, %v4276_v25  ;;  %v2682_v6 = vadd.s32 536870912, %v2681_v7  ;;  %v2539_v19 = vor.u32 %v2538_v62, %v2537_v9 }
 0x36f   :  { %v2393_v55 = vxor.u32 2147483648, %v2392_v17  ;;  %v2511_v26 = vsel %vm2509_vm6, %v4274_v1, %v2510_v59  ;;  %v2543_v60 = vshll.u32 %v4386_v12, %v2531_v24  ;;  %v2544_v39 = vshrl.u32 %v4387_v14, %v2532_v38 }
 0x370   :  { %v2547_v34 = vshrl.u32 %v4388_v23, %v2532_v38  ;;  %v2515_v28 = vsel %vm2508_vm4, %v2511_v26, %v2514_v45  ;;  %v2683_v53 = vshrl.u32 %v2682_v6, 30  ;;  %v2542_v43 = vor.u32 %v2541_v5, %v2540_v42 }
 0x371   :  { %v2394_v40 = vsel %vm2311_vm10, %v2393_v55, %v2392_v17  ;;  %v2516_v61 = vsel %vm2505_vm5, nan, %v2515_v28  ;;  %v2545_v37 = vor.u32 %v2544_v39, %v2543_v60  ;;  %v2546_v21 = vshll.u32 %v4387_v14, %v2531_v24 }
 0x372   :  { %v2397_v32 = vsel %vm6112_vm13, %v5861_v27, %v2394_v40  ;;  %3784 = vst [vmem:[#allocation5 + $0x98] sm:$0xff] %v2516_v61  ;;  %v6208_v2 = vand.u32 3, %v2402_v54  ;;  %v2684_v44 = vshll.u32 %v2683_v53, 30  ;;  %v6210_v58 = vshll.u32 %v2525_v16, 8 }
 0x373   :  { %4277 = vcosq.f32 %v2397_v32  ;;  %v2548_v22 = vor.u32 %v2547_v34, %v2546_v21  ;;  %vm2549_vm9 = vcmp.lt.s32.totalorder %v2530_v46, 1  ;;  %vm2552_vm10 = vcmp.lt.s32.totalorder %v2530_v46, 4 }
 0x374   :  { %4279 = vsinq.f32 %v2397_v32  ;;  %v6212_v51 = vsub.s32 %v2681_v7, %v2684_v44  ;;  %v2554_v20 = vsel %vm2552_vm10, %v2542_v43, 2102212464  ;;  %v2557_v36 = vsel %vm2549_vm9, %v2536_v47, %v2539_v19 }
 0x375   :  { %v6217_v29 = vadd.f32 %v5852_v13, %v5735_v49  ;;  %v2707_v24 = vsub.s32 4, %v2683_v53  ;;  %v2533_v54 = vshrl.u32 %v4383_v4, %v2532_v38  ;;  %vm2551_vm11 = vcmp.lt.s32.totalorder %v2530_v46, 3 }
 0x376   :  { %v2558_v16 = vsel %vm2552_vm10, %v2545_v37, 920167782  ;;  %v2687_v50 = vsub.s32 0, %v6212_v51  ;;  %vm2550_vm12 = vcmp.lt.s32.totalorder %v2530_v46, 2  ;;  %v2561_v1 = vsel %vm2549_vm9, %v2539_v19, %v2542_v43 }
 0x377   :  { %v2559_v35 = vsel %vm2551_vm11, %v2542_v43, %v2558_v16  ;;  %v2553_v33 = vsel %vm2549_vm9, %v2533_v54, %v2536_v47  ;;  %v2555_v63 = vsel %vm2551_vm11, %v2539_v19, %v2554_v20  ;;  %v2562_v62 = vsel %vm2552_vm10, %v2548_v22, 1326507024 }
 0x378   :  { %v2560_v9 = vsel %vm2550_vm12, %v2557_v36, %v2559_v35  ;;  %vm2623_vm13 = vcmp.lt.s32.totalorder %v6055_v3, 0  ;;  %v3934_v49 = vmin.u32 %v2687_v50, %v6212_v51  ;;  %v2563_v25 = vsel %vm2551_vm11, %v2545_v37, %v2562_v62  ;;  %v6270_v36 = vpop.f32.mrb[12].mxu1 }
 0x379   :  { %vm2401_vm14 = vweird.f32 %v5861_v27  ;;  %vm6229_vm15 = vcmp.le.f32.partialorder %v2621_v57, 0.7853982  ;;  %v2564_v0 = vsel %vm2550_vm12, %v2561_v1, %v2563_v25  ;;  %vm2404_vm0 = vcmp.lt.s32.totalorder %v6208_v2, 2 }
 0x37a   :  { %v6235_v17 = vmul.u32.u64.low %v6210_v58, %v2560_v9  ;;  %v6236_v7 = vmul.u32.u64.high %v6210_v58, %v2560_v9, %v6235_v17  ;;  %v2689_v5 = vclz %v3934_v49  ;;  %v2708_v59 = vsel %vm2623_vm13, %v2707_v24, %v2683_v53 }
 0x37b   :  { %v2556_v47 = vsel %vm2550_vm12, %v2553_v33, %v2555_v63  ;;  %v6243_v42 = vmul.u32.u64.low %v6210_v58, %v2564_v0  ;;  %v6244_v57 = vmul.u32.u64.high %v6210_v58, %v2564_v0, %v6243_v42  ;;  %v2829_v45 = vand.u32 2147483647, %v6217_v29 }
 0x37c   :  { %v2832_v55 = vand.u32 2139095040, %v6217_v29  ;;  %vm2405_vm1 = vcmp.eq.s32.totalorder %v6208_v2, 0  ;;  %vm2408_vm3 = vcmp.eq.s32.totalorder %v6208_v2, 2  ;;  %v3935_v19 = vadd.s32 4294967294, %v2689_v5 }
 0x37d   :  { %v4278_v6 = vpop.eup %4277  ;;  %v6252_v26 = vadd.f32 %v5852_v13, %v5822_v56  ;;  %v2677_v39 = vadd.s32 %v6167_v31, %v6173_v52  ;;  %v2575_v34 = vadd.s32 1, %v6236_v7  ;;  %v2710_v53 = vsel %vm6229_vm15, 0, %v2708_v59 }
 0x37e   :  { %v4280_v46 = vpop.eup %4279  ;;  %v2409_v60 = vxor.u32 2147483648, %v4278_v6  ;;  %v2833_v28 = vshrl.u32 %v2832_v55, 23  ;;  %vm3936_vm2 = vcmp.lt.s32.totalorder %v3935_v19, 0  ;;  %v2572_v43 = vmul.u32 %v6210_v58, %v2556_v47 }
 0x37f   :  { %v2406_v40 = vxor.u32 2147483648, %v4280_v46  ;;  %v2692_v32 = vsel %vm3936_vm2, 0, %v3935_v19  ;;  %vm2574_vm4 = vc.u32 %v6244_v57, %v6235_v17  ;;  %v2836_v56 = vand.u32 8388607, %v2829_v45 }
 0x380   :  { %v2410_v61 = vsel %vm2408_vm3, %v2409_v60, %v4280_v46  ;;  %v2693_v52 = vsub.s32 32, %v2692_v32  ;;  %v2697_v37 = vsub.s32 4294967266, %v2692_v32  ;;  %v2728_v21 = vand.u32 2139095040, %v6252_v26 }
 0x381   :  { %v2407_v31 = vsel %vm2405_vm1, %v4278_v6, %v2406_v40  ;;  %v2694_v22 = vshll.u32 %v6212_v51, %v2692_v32  ;;  %v2576_v58 = vsel %vm2574_vm4, %v2575_v34, %v6236_v7  ;;  %v3941_v20 = vadd.s32 4294967169, %v2833_v28 }
 0x382   :  { %v2411_v44 = vsel %vm2404_vm0, %v2407_v31, %v2410_v61  ;;  %v2695_v54 = vshrl.u32 %v2677_v39, %v2693_v52  ;;  %v2698_v16 = vadd.s32 127, %v2697_v37  ;;  %v2577_v50 = vadd.s32 %v2576_v58, %v2572_v43 }
 0x383   :  { %v2412_v24 = vsel %vm2401_vm14, nan, %v2411_v44  ;;  %v2839_v35 = vadd.s32 1, %v3941_v20  ;;  %v2714_v63 = vadd.s32 3, %v2710_v53  ;;  %v2837_v9 = vor.u32 8388608, %v2836_v56 }
 0x384   :  { %3783 = vst [vmem:[#allocation5 + $0x90] sm:$0xff] %v2412_v24  ;;  %v2696_v1 = vor.u32 %v2695_v54, %v2694_v22  ;;  %v2699_v33 = vshll.u32 %v2698_v16, 23  ;;  %v2578_v2 = vadd.s32 536870912, %v2577_v50  ;;  %v2729_v25 = vshrl.u32 %v2728_v21, 23 }
 0x385   :  { %vm2840_vm5 = vcmp.gt.s32.totalorder %v2839_v35, 0  ;;  %v6276_v27 = vadd.f32 %v5852_v13, %v5903_v41  ;;  %v6278_v59 = vand.u32 3, %v2714_v63  ;;  %vm2519_vm6 = vcmp.lt.s32.totalorder %v6089_v30, 0 }
 0x386   :  { %v2700_v51 = vor.u32 4788187, %v2699_v33  ;;  %v2579_v62 = vshrl.u32 %v2578_v2, 30  ;;  %v2841_v49 = vsel %vm2840_vm5, %v2839_v35, 0  ;;  %v2703_v5 = vcvt.s32.f32 %v2696_v1  ;;  %v6322_v2 = vpop.f32.mrb[13].mxu1 }
 0x387   :  { %v2843_v0 = vand.u32 31, %v2841_v49  ;;  %v6282_v42 = vadd.s32 %v6235_v17, %v6244_v57  ;;  %v6284_v6 = vshll.u32 %v2837_v9, 8  ;;  %v2725_v19 = vand.u32 2147483647, %v6252_v26 }
 0x388   :  { %v2701_v7 = vand.u32 2147483647, %v2700_v51  ;;  %v2580_v47 = vshll.u32 %v2579_v62, 30  ;;  %v6289_v13 = vshrl.u32 %v2841_v49, 5  ;;  %v3937_v41 = vadd.s32 4294967169, %v2729_v25 }
 0x389   :  { %v2844_v55 = vsub.s32 32, %v2843_v0  ;;  %v2603_v39 = vsub.s32 4, %v2579_v62  ;;  %v2846_v34 = vshll.u32 %v4383_v4, %v2843_v0  ;;  %v2849_v53 = vshll.u32 %v4384_v8, %v2843_v0 }
 0x38a   :  { %v2704_v46 = vmul.f32 %v2703_v5, %v2701_v7  ;;  %v6287_v60 = vsub.s32 %v2577_v50, %v2580_v47  ;;  %v2852_v32 = vshll.u32 %v4385_v10, %v2843_v0  ;;  %v2855_v56 = vshll.u32 %v4386_v12, %v2843_v0 }
 0x38b   :  { %v2847_v28 = vshrl.u32 %v4384_v8, %v2844_v55  ;;  %v2850_v40 = vshrl.u32 %v4385_v10, %v2844_v55  ;;  %v2853_v43 = vshrl.u32 %v4386_v12, %v2844_v55  ;;  %v2856_v31 = vshrl.u32 %v4387_v14, %v2844_v55 }
 0x38c   :  { %v2705_v17 = vxor.u32 2147483648, %v2704_v46  ;;  %v2583_v57 = vsub.s32 0, %v6287_v60  ;;  %v2858_v44 = vshll.u32 %v4387_v14, %v2843_v0  ;;  %v2859_v24 = vshrl.u32 %v4388_v23, %v2844_v55 }
 0x38d   :  { %v2848_v61 = vor.u32 %v2847_v28, %v2846_v34  ;;  %v2851_v21 = vor.u32 %v2850_v40, %v2849_v53  ;;  %v2854_v58 = vor.u32 %v2853_v43, %v2852_v32  ;;  %v2857_v20 = vor.u32 %v2856_v31, %v2855_v56 }
 0x38e   :  { %v2706_v52 = vsel %vm2623_vm13, %v2705_v17, %v2704_v46  ;;  %v3930_v37 = vmin.u32 %v2583_v57, %v6287_v60  ;;  %v2732_v16 = vand.u32 8388607, %v2725_v19  ;;  %v2735_v50 = vadd.s32 1, %v3937_v41 }
 0x38f   :  { %v2709_v22 = vsel %vm6229_vm15, %v6055_v3, %v2706_v52  ;;  %vm6312_vm7 = vcmp.le.f32.partialorder %v2517_v48, 0.7853982  ;;  %v2604_v38 = vsel %vm2519_vm6, %v2603_v39, %v2579_v62  ;;  %v2845_v1 = vshrl.u32 %v4383_v4, %v2844_v55 }
 0x390   :  { %4281 = vcosq.f32 %v2709_v22  ;;  %v2585_v54 = vclz %v3930_v37  ;;  %v2860_v33 = vor.u32 %v2859_v24, %v2858_v44  ;;  %vm2861_vm8 = vcmp.lt.s32.totalorder %v6289_v13, 1 }
 0x391   :  { %4283 = vsinq.f32 %v2709_v22  ;;  %vm2863_vm9 = vcmp.lt.s32.totalorder %v6289_v13, 3  ;;  %vm2864_vm10 = vcmp.lt.s32.totalorder %v6289_v13, 4  ;;  %v2869_v48 = vsel %vm2861_vm8, %v2848_v61, %v2851_v21 }
 0x392   :  { %v3931_v63 = vadd.s32 4294967294, %v2585_v54  ;;  %v2866_v9 = vsel %vm2864_vm10, %v2854_v58, 2102212464  ;;  %v2870_v51 = vsel %vm2864_vm10, %v2857_v20, 920167782  ;;  %v2873_v49 = vsel %vm2861_vm8, %v2851_v21, %v2854_v58 }
 0x393   :  { %vm2862_vm12 = vcmp.lt.s32.totalorder %v6289_v13, 2  ;;  %v2871_v62 = vsel %vm2863_vm9, %v2854_v58, %v2870_v51  ;;  %v2874_v25 = vsel %vm2864_vm10, %v2860_v33, 1326507024  ;;  %v2865_v7 = vsel %vm2861_vm8, %v2845_v1, %v2848_v61 }
 0x394   :  { %vm3932_vm11 = vcmp.lt.s32.totalorder %v3931_v63, 0  ;;  %v2872_v5 = vsel %vm2862_vm12, %v2869_v48, %v2871_v62  ;;  %v2875_v47 = vsel %vm2863_vm9, %v2857_v20, %v2874_v25  ;;  %vm2716_vm13 = vcmp.lt.s32.totalorder %v6278_v59, 2 }
 0x395   :  { %v2588_v0 = vsel %vm3932_vm11, 0, %v3931_v63  ;;  %v2867_v41 = vsel %vm2863_vm9, %v2851_v21, %v2866_v9  ;;  %v2876_v39 = vsel %vm2862_vm12, %v2873_v49, %v2875_v47  ;;  %vm2713_vm14 = vweird.f32 %v6055_v3 }
 0x396   :  { %v2589_v55 = vsub.s32 32, %v2588_v0  ;;  %v2593_v46 = vsub.s32 4294967266, %v2588_v0  ;;  %v6338_v34 = vmul.u32.u64.low %v6284_v6, %v2876_v39  ;;  %v6339_v28 = vmul.u32.u64.high %v6284_v6, %v2876_v39, %v6338_v34 }
 0x397   :  { %v6342_v40 = vmul.u32.u64.low %v6284_v6, %v2872_v5  ;;  %v6343_v17 = vmul.u32.u64.high %v6284_v6, %v2872_v5, %v6342_v40  ;;  %v2590_v57 = vshll.u32 %v6287_v60, %v2588_v0  ;;  %vm2736_vm15 = vcmp.gt.s32.totalorder %v2735_v50, 0 }
 0x398   :  { %v2591_v53 = vshrl.u32 %v6282_v42, %v2589_v55  ;;  %v2594_v43 = vadd.s32 127, %v2593_v46  ;;  %vm2717_vm0 = vcmp.eq.s32.totalorder %v6278_v59, 0  ;;  %v2868_v61 = vsel %vm2862_vm12, %v2865_v7, %v2867_v41 }
 0x399   :  { %v2733_v32 = vor.u32 8388608, %v2732_v16  ;;  %v2737_v56 = vsel %vm2736_vm15, %v2735_v50, 0  ;;  %v2606_v21 = vsel %vm6312_vm7, 0, %v2604_v38  ;;  %vm2720_vm1 = vcmp.eq.s32.totalorder %v6278_v59, 2 }
 0x39a   :  { %v4282_v31 = vpop.eup %4281  ;;  %v2592_v52 = vor.u32 %v2591_v53, %v2590_v57  ;;  %v2595_v37 = vshll.u32 %v2594_v43, 23  ;;  %v2739_v44 = vand.u32 31, %v2737_v56  ;;  %vm2886_vm3 = vc.u32 %v6339_v28, %v6342_v40 }
 0x39b   :  { %v4284_v22 = vpop.eup %4283  ;;  %v2721_v42 = vxor.u32 2147483648, %v4282_v31  ;;  %v2887_v60 = vadd.s32 1, %v6343_v17  ;;  %v2884_v20 = vmul.u32 %v6284_v6, %v2868_v61  ;;  %v2610_v16 = vadd.s32 3, %v2606_v21 }
 0x39c   :  { %v2718_v13 = vxor.u32 2147483648, %v4284_v22  ;;  %v2596_v58 = vor.u32 4788187, %v2595_v37  ;;  %v2740_v24 = vsub.s32 32, %v2739_v44  ;;  %v6359_v38 = vshll.u32 %v2733_v32, 8 }
 0x39d   :  { %v2722_v54 = vsel %vm2720_vm1, %v2721_v42, %v4284_v22  ;;  %v2888_v50 = vsel %vm2886_vm3, %v2887_v60, %v6343_v17  ;;  %v2599_v63 = vcvt.s32.f32 %v2592_v52  ;;  %v2742_v51 = vshll.u32 %v4383_v4, %v2739_v44 }
 0x39e   :  { %v2719_v1 = vsel %vm2717_vm0, %v4282_v31, %v2718_v13  ;;  %v2597_v33 = vand.u32 2147483647, %v2596_v58  ;;  %v2889_v9 = vadd.s32 %v2888_v50, %v2884_v20  ;;  %v2743_v6 = vshrl.u32 %v4384_v8, %v2740_v24 }
 0x39f   :  { %v2723_v48 = vsel %vm2716_vm13, %v2719_v1, %v2722_v54  ;;  %v2746_v49 = vshrl.u32 %v4385_v10, %v2740_v24  ;;  %v2749_v7 = vshrl.u32 %v4386_v12, %v2740_v24  ;;  %v2738_v5 = vshrl.u32 %v2737_v56, 5 }
 0x3a0   :  { %v2724_v62 = vsel %vm2713_vm14, nan, %v2723_v48  ;;  %v2600_v25 = vmul.f32 %v2599_v63, %v2597_v33  ;;  %v2890_v0 = vadd.s32 536870912, %v2889_v9  ;;  %v2745_v47 = vshll.u32 %v4384_v8, %v2739_v44 }
 0x3a1   :  { %3786 = vst [vmem:[#allocation5 + $0xa8] sm:$0xff] %v2724_v62  ;;  %v2748_v59 = vshll.u32 %v4385_v10, %v2739_v44  ;;  %v2752_v55 = vshrl.u32 %v4387_v14, %v2740_v24  ;;  %v2744_v39 = vor.u32 %v2743_v6, %v2742_v51  ;;  %v2751_v34 = vshll.u32 %v4386_v12, %v2739_v44 }
 0x3a2   :  { %v2601_v46 = vxor.u32 2147483648, %v2600_v25  ;;  %v2891_v41 = vshrl.u32 %v2890_v0, 30  ;;  %v2747_v17 = vor.u32 %v2746_v49, %v2745_v47  ;;  %v2754_v57 = vshll.u32 %v4387_v14, %v2739_v44 }
 0x3a3   :  { %v2750_v3 = vor.u32 %v2749_v7, %v2748_v59  ;;  %v2755_v53 = vshrl.u32 %v4388_v23, %v2740_v24  ;;  %v6379_v61 = vand.u32 3, %v2610_v16  ;;  %v2753_v56 = vor.u32 %v2752_v55, %v2751_v34 }
 0x3a4   :  { %v2602_v43 = vsel %vm2519_vm6, %v2601_v46, %v2600_v25  ;;  %v2892_v32 = vshll.u32 %v2891_v41, 30  ;;  %v2741_v52 = vshrl.u32 %v4383_v4, %v2740_v24  ;;  %v3040_v21 = vand.u32 2139095040, %v6276_v27 }
 0x3a5   :  { %v2605_v31 = vsel %vm6312_vm7, %v6089_v30, %v2602_v43  ;;  %v2756_v37 = vor.u32 %v2755_v53, %v2754_v57  ;;  %vm2757_vm2 = vcmp.lt.s32.totalorder %v2738_v5, 1  ;;  %vm2760_vm4 = vcmp.lt.s32.totalorder %v2738_v5, 4 }
 0x3a6   :  { %4285 = vcosq.f32 %v2605_v31  ;;  %v6386_v44 = vsub.s32 %v2889_v9, %v2892_v32  ;;  %vm2758_vm5 = vcmp.lt.s32.totalorder %v2738_v5, 2  ;;  %v2762_v22 = vsel %vm2760_vm4, %v2750_v3, 2102212464 }
 0x3a7   :  { %4287 = vsinq.f32 %v2605_v31  ;;  %v2765_v42 = vsel %vm2757_vm2, %v2744_v39, %v2747_v17  ;;  %v2915_v13 = vsub.s32 4, %v2891_v41  ;;  %vm2759_vm6 = vcmp.lt.s32.totalorder %v2738_v5, 3 }
 0x3a8   :  { %v2895_v60 = vsub.s32 0, %v6386_v44  ;;  %v2766_v35 = vsel %vm2760_vm4, %v2753_v56, 920167782  ;;  %v2761_v58 = vsel %vm2757_vm2, %v2741_v52, %v2744_v39  ;;  %v2769_v24 = vsel %vm2757_vm2, %v2747_v17, %v2750_v3 }
 0x3a9   :  { %v2767_v20 = vsel %vm2759_vm6, %v2750_v3, %v2766_v35  ;;  %v2770_v54 = vsel %vm2760_vm4, %v2756_v37, 1326507024  ;;  %v2763_v50 = vsel %vm2759_vm6, %v2747_v17, %v2762_v22  ;;  %v3041_v51 = vshrl.u32 %v3040_v21, 23 }
 0x3aa   :  { %v3942_v16 = vmin.u32 %v2895_v60, %v6386_v44  ;;  %v2768_v1 = vsel %vm2758_vm5, %v2765_v42, %v2767_v20  ;;  %v2771_v33 = vsel %vm2759_vm6, %v2753_v56, %v2770_v54  ;;  %vm2831_vm7 = vcmp.lt.s32.totalorder %v6217_v29, 0  ;;  %v6445_v54 = vpop.f32.mrb[14].mxu1 }
 0x3ab   :  { %v2772_v63 = vsel %vm2758_vm5, %v2769_v24, %v2771_v33  ;;  %v6393_v9 = vmul.u32.u64.low %v6359_v38, %v2768_v1  ;;  %v6394_v48 = vmul.u32.u64.high %v6359_v38, %v2768_v1, %v6393_v9  ;;  %v3037_v49 = vand.u32 2147483647, %v6276_v27 }
 0x3ac   :  { %v2897_v6 = vclz %v3942_v16  ;;  %vm2609_vm8 = vweird.f32 %v6089_v30  ;;  %v2916_v62 = vsel %vm2831_vm7, %v2915_v13, %v2891_v41  ;;  %v3949_v7 = vadd.s32 4294967169, %v3041_v51 }
 0x3ad   :  { %v6403_v25 = vmul.u32.u64.low %v6359_v38, %v2772_v63  ;;  %v6404_v0 = vmul.u32.u64.high %v6359_v38, %v2772_v63, %v6403_v25  ;;  %vm2612_vm9 = vcmp.lt.s32.totalorder %v6379_v61, 2  ;;  %vm6409_vm10 = vcmp.le.f32.partialorder %v2829_v45, 0.7853982 }
 0x3ae   :  { %v3943_v59 = vadd.s32 4294967294, %v2897_v6  ;;  %v2764_v55 = vsel %vm2758_vm5, %v2761_v58, %v2763_v50  ;;  %vm2613_vm11 = vcmp.eq.s32.totalorder %v6379_v61, 0  ;;  %vm2616_vm12 = vcmp.eq.s32.totalorder %v6379_v61, 2 }
 0x3af   :  { %v2783_v46 = vadd.s32 1, %v6394_v48  ;;  %v3047_v41 = vadd.s32 1, %v3949_v7  ;;  %v2885_v34 = vadd.s32 %v6342_v40, %v6339_v28  ;;  %v2918_v45 = vsel %vm6409_vm10, 0, %v2916_v62  ;;  %v6429_v28 = vld [vmem:[%s7096_s2] ss:$0 sm:$0xff] }
 0x3b0   :  { %v4286_v39 = vpop.eup %4285  ;;  %vm3944_vm13 = vcmp.lt.s32.totalorder %v3943_v59, 0  ;;  %v3044_v17 = vand.u32 8388607, %v3037_v49  ;;  %v2780_v53 = vmul.u32 %v6359_v38, %v2764_v55  ;;  %vm2782_vm14 = vc.u32 %v6404_v0, %v6393_v9 }
 0x3b1   :  { %v4288_v5 = vpop.eup %4287  ;;  %v2617_v3 = vxor.u32 2147483648, %v4286_v39  ;;  %v2900_v57 = vsel %vm3944_vm13, 0, %v3943_v59  ;;  %v6433_v40 = vadd.f32 %v6429_v28, %v5991_v15  ;;  %v2784_v52 = vsel %vm2782_vm14, %v2783_v46, %v6394_v48 }
 0x3b2   :  { %v2614_v43 = vxor.u32 2147483648, %v4288_v5  ;;  %v2901_v32 = vsub.s32 32, %v2900_v57  ;;  %v2905_v56 = vsub.s32 4294967266, %v2900_v57  ;;  %v2902_v38 = vshll.u32 %v6386_v44, %v2900_v57 }
 0x3b3   :  { %v2618_v31 = vsel %vm2616_vm12, %v2617_v3, %v4288_v5  ;;  %vm3048_vm15 = vcmp.gt.s32.totalorder %v3047_v41, 0  ;;  %v2785_v42 = vadd.s32 %v2784_v52, %v2780_v53  ;;  %v2922_v13 = vadd.s32 3, %v2918_v45 }
 0x3b4   :  { %v2615_v37 = vsel %vm2613_vm11, %v4286_v39, %v2614_v43  ;;  %v2903_v21 = vshrl.u32 %v2885_v34, %v2901_v32  ;;  %v2906_v22 = vadd.s32 127, %v2905_v56  ;;  %v3045_v15 = vor.u32 8388608, %v3044_v17 }
 0x3b5   :  { %v2619_v60 = vsel %vm2612_vm9, %v2615_v37, %v2618_v31  ;;  %v3049_v35 = vsel %vm3048_vm15, %v3047_v41, 0  ;;  %v2786_v24 = vadd.s32 536870912, %v2785_v42  ;;  %v2936_v50 = vand.u32 2139095040, %v6433_v40 }
 0x3b6   :  { %v2620_v58 = vsel %vm2609_vm8, nan, %v2619_v60  ;;  %v2904_v20 = vor.u32 %v2903_v21, %v2902_v38  ;;  %v2907_v44 = vshll.u32 %v2906_v22, 23  ;;  %v3051_v16 = vand.u32 31, %v3049_v35 }
 0x3b7   :  { %3785 = vst [vmem:[#allocation5 + $0xa0] sm:$0xff] %v2620_v58  ;;  %v6448_v33 = vshrl.u32 %v2786_v24, 30  ;;  %v6450_v61 = vand.u32 3, %v2922_v13  ;;  %v6452_v48 = vshll.u32 %v3045_v15, 8  ;;  %v2933_v62 = vand.u32 2147483647, %v6433_v40 }
 0x3b8   :  { %v2908_v1 = vor.u32 4788187, %v2907_v44  ;;  %v3052_v63 = vsub.s32 32, %v3051_v16  ;;  %v2911_v30 = vcvt.s32.f32 %v2904_v20  ;;  %v2937_v55 = vshrl.u32 %v2936_v50, 23  ;;  %v6480_v15 = vpop.f32.mrb[15].mxu1 }
 0x3b9   :  { %v2788_v6 = vshll.u32 %v6448_v33, 30  ;;  %v3054_v39 = vshll.u32 %v4383_v4, %v3051_v16  ;;  %v2781_v45 = vadd.s32 %v6393_v9, %v6404_v0  ;;  %v3050_v17 = vshrl.u32 %v3049_v35, 5 }
 0x3ba   :  { %v2909_v51 = vand.u32 2147483647, %v2908_v1  ;;  %v3055_v25 = vshrl.u32 %v4384_v8, %v3052_v63  ;;  %v3058_v7 = vshrl.u32 %v4385_v10, %v3052_v63  ;;  %v3061_v59 = vshrl.u32 %v4386_v12, %v3052_v63 }
 0x3bb   :  { %v6459_v41 = vsub.s32 %v2785_v42, %v2788_v6  ;;  %v3064_v34 = vshrl.u32 %v4387_v14, %v3052_v63  ;;  %v3057_v5 = vshll.u32 %v4384_v8, %v3051_v16  ;;  %v3060_v3 = vshll.u32 %v4385_v10, %v3051_v16 }
 0x3bc   :  { %v2912_v46 = vmul.f32 %v2911_v30, %v2909_v51  ;;  %v3056_v43 = vor.u32 %v3055_v25, %v3054_v39  ;;  %v3063_v32 = vshll.u32 %v4386_v12, %v3051_v16  ;;  %vm2727_vm0 = vcmp.lt.s32.totalorder %v6252_v26, 0 }
 0x3bd   :  { %v2791_v53 = vsub.s32 0, %v6459_v41  ;;  %v3059_v56 = vor.u32 %v3058_v7, %v3057_v5  ;;  %v3062_v31 = vor.u32 %v3061_v59, %v3060_v3  ;;  %v3066_v38 = vshll.u32 %v4387_v14, %v3051_v16 }
 0x3be   :  { %v2913_v57 = vxor.u32 2147483648, %v2912_v46  ;;  %v3067_v52 = vshrl.u32 %v4388_v23, %v3052_v63  ;;  %v3065_v37 = vor.u32 %v3064_v34, %v3063_v32  ;;  %v3945_v21 = vadd.s32 4294967169, %v2937_v55 }
 0x3bf   :  { %v3938_v0 = vmin.u32 %v2791_v53, %v6459_v41  ;;  %v2811_v42 = vsub.s32 4, %v6448_v33  ;;  %v3053_v60 = vshrl.u32 %v4383_v4, %v3052_v63  ;;  %vm3069_vm1 = vcmp.lt.s32.totalorder %v3050_v17, 1 }
 0x3c0   :  { %v2914_v9 = vsel %vm2831_vm7, %v2913_v57, %v2912_v46  ;;  %v3068_v13 = vor.u32 %v3067_v52, %v3066_v38  ;;  %vm3072_vm3 = vcmp.lt.s32.totalorder %v3050_v17, 4  ;;  %vm6484_vm2 = vcmp.le.f32.partialorder %v2725_v19, 0.7853982 }
 0x3c1   :  { %v2917_v22 = vsel %vm6409_vm10, %v6217_v29, %v2914_v9  ;;  %v2793_v35 = vclz %v3938_v0  ;;  %vm3070_vm4 = vcmp.lt.s32.totalorder %v3050_v17, 2  ;;  %v3074_v47 = vsel %vm3072_vm3, %v3062_v31, 2102212464 }
 0x3c2   :  { %4289 = vcosq.f32 %v2917_v22  ;;  %v3077_v20 = vsel %vm3069_vm1, %v3056_v43, %v3059_v56  ;;  %vm3071_vm5 = vcmp.lt.s32.totalorder %v3050_v17, 3  ;;  %v3078_v24 = vsel %vm3072_vm3, %v3065_v37, 920167782 }
 0x3c3   :  { %4291 = vsinq.f32 %v2917_v22  ;;  %v3939_v44 = vadd.s32 4294967294, %v2793_v35  ;;  %v3081_v16 = vsel %vm3069_vm1, %v3059_v56, %v3062_v31  ;;  %v3073_v50 = vsel %vm3069_vm1, %v3053_v60, %v3056_v43 }
 0x3c4   :  { %v3079_v1 = vsel %vm3071_vm5, %v3062_v31, %v3078_v24  ;;  %v3082_v63 = vsel %vm3072_vm3, %v3068_v13, 1326507024  ;;  %v2943_v51 = vadd.s32 1, %v3945_v21  ;;  %v3075_v30 = vsel %vm3071_vm5, %v3059_v56, %v3074_v47 }
 0x3c5   :  { %vm3940_vm6 = vcmp.lt.s32.totalorder %v3939_v44, 0  ;;  %v3080_v6 = vsel %vm3070_vm4, %v3077_v20, %v3079_v1  ;;  %v3083_v25 = vsel %vm3071_vm5, %v3065_v37, %v3082_v63  ;;  %v2812_v34 = vsel %vm2727_vm0, %v2811_v42, %v6448_v33 }
 0x3c6   :  { %v2796_v19 = vsel %vm3940_vm6, 0, %v3939_v44  ;;  %v3084_v7 = vsel %vm3070_vm4, %v3081_v16, %v3083_v25  ;;  %v6491_v59 = vmul.u32.u64.low %v6452_v48, %v3080_v6  ;;  %v6492_v55 = vmul.u32.u64.high %v6452_v48, %v3080_v6, %v6491_v59 }
 0x3c7   :  { %v2797_v46 = vsub.s32 32, %v2796_v19  ;;  %v2801_v39 = vsub.s32 4294967266, %v2796_v19  ;;  %vm2944_vm7 = vcmp.gt.s32.totalorder %v2943_v51, 0  ;;  %vm2921_vm8 = vweird.f32 %v6217_v29 }
 0x3c8   :  { %v3076_v5 = vsel %vm3070_vm4, %v3073_v50, %v3075_v30  ;;  %v6501_v3 = vmul.u32.u64.low %v6452_v48, %v3084_v7  ;;  %v6502_v57 = vmul.u32.u64.high %v6452_v48, %v3084_v7, %v6501_v3  ;;  %v2945_v53 = vsel %vm2944_vm7, %v2943_v51, 0 }
 0x3c9   :  { %v2798_v43 = vshll.u32 %v6459_v41, %v2796_v19  ;;  %v2799_v32 = vshrl.u32 %v2781_v45, %v2797_v46  ;;  %v2802_v56 = vadd.s32 127, %v2801_v39  ;;  %v2947_v31 = vand.u32 31, %v2945_v53 }
 0x3ca   :  { %vm2924_vm9 = vcmp.lt.s32.totalorder %v6450_v61, 2  ;;  %vm2925_vm10 = vcmp.eq.s32.totalorder %v6450_v61, 0  ;;  %v3095_v33 = vadd.s32 1, %v6492_v55  ;;  %v6510_v17 = vand.u32 8388607, %v2933_v62 }
 0x3cb   :  { %vm2928_vm11 = vcmp.eq.s32.totalorder %v6450_v61, 2  ;;  %v2800_v52 = vor.u32 %v2799_v32, %v2798_v43  ;;  %v2803_v9 = vshll.u32 %v2802_v56, 23  ;;  %v2814_v41 = vsel %vm6484_vm2, 0, %v2812_v34 }
 0x3cc   :  { %v4290_v38 = vpop.eup %4289  ;;  %v3092_v37 = vmul.u32 %v6452_v48, %v3076_v5  ;;  %vm3094_vm12 = vc.u32 %v6502_v57, %v6491_v59  ;;  %v2948_v21 = vsub.s32 32, %v2947_v31  ;;  %v6521_v13 = vadd.f32 %v6429_v28, %v6100_v11 }
 0x3cd   :  { %v4292_v45 = vpop.eup %4291  ;;  %v2929_v0 = vxor.u32 2147483648, %v4290_v38  ;;  %v2804_v42 = vor.u32 4788187, %v2803_v9  ;;  %v3096_v60 = vsel %vm3094_vm12, %v3095_v33, %v6492_v55  ;;  %v2818_v47 = vadd.s32 3, %v2814_v41 }
 0x3ce   :  { %v2926_v22 = vxor.u32 2147483648, %v4292_v45  ;;  %v3097_v20 = vadd.s32 %v3096_v60, %v3092_v37  ;;  %v2941_v44 = vor.u32 8388608, %v6510_v17  ;;  %v2807_v16 = vcvt.s32.f32 %v2800_v52 }
 0x3cf   :  { %v2930_v35 = vsel %vm2928_vm11, %v2929_v0, %v4292_v45  ;;  %v2805_v24 = vand.u32 2147483647, %v2804_v42  ;;  %v6526_v50 = vshrl.u32 %v2945_v53, 5  ;;  %v2951_v51 = vshrl.u32 %v4384_v8, %v2948_v21 }
 0x3d0   :  { %v2927_v48 = vsel %vm2925_vm10, %v4290_v38, %v2926_v22  ;;  %v3098_v63 = vadd.s32 536870912, %v3097_v20  ;;  %v2954_v11 = vshrl.u32 %v4385_v10, %v2948_v21  ;;  %v2950_v25 = vshll.u32 %v4383_v4, %v2947_v31 }
 0x3d1   :  { %v2931_v1 = vsel %vm2924_vm9, %v2927_v48, %v2930_v35  ;;  %v2808_v6 = vmul.f32 %v2807_v16, %v2805_v24  ;;  %v2957_v19 = vshrl.u32 %v4386_v12, %v2948_v21  ;;  %v2953_v55 = vshll.u32 %v4384_v8, %v2947_v31 }
 0x3d2   :  { %v2932_v30 = vsel %vm2921_vm8, nan, %v2931_v1  ;;  %v3099_v7 = vshrl.u32 %v3098_v63, 30  ;;  %v2956_v61 = vshll.u32 %v4385_v10, %v2947_v31  ;;  %v2960_v46 = vshrl.u32 %v4387_v14, %v2948_v21 }
 0x3d3   :  { %3788 = vst [vmem:[#allocation5 + $0xb8] sm:$0xff] %v2932_v30  ;;  %v2809_v39 = vxor.u32 2147483648, %v2808_v6  ;;  %v2959_v34 = vshll.u32 %v4386_v12, %v2947_v31  ;;  %v2962_v5 = vshll.u32 %v4387_v14, %v2947_v31  ;;  %v2963_v29 = vshrl.u32 %v4388_v23, %v2948_v21 }
 0x3d4   :  { %v6542_v3 = vand.u32 3, %v2818_v47  ;;  %v3100_v53 = vshll.u32 %v3099_v7, 30  ;;  %v2952_v43 = vor.u32 %v2951_v51, %v2950_v25  ;;  %v2955_v32 = vor.u32 %v2954_v11, %v2953_v55 }
 0x3d5   :  { %v2810_v56 = vsel %vm2727_vm0, %v2809_v39, %v2808_v6  ;;  %vm3039_vm13 = vcmp.lt.s32.totalorder %v6276_v27, 0  ;;  %v2958_v33 = vor.u32 %v2957_v19, %v2956_v61  ;;  %v2961_v17 = vor.u32 %v2960_v46, %v2959_v34 }
 0x3d6   :  { %v2964_v38 = vor.u32 %v2963_v29, %v2962_v5  ;;  %v2813_v52 = vsel %vm6484_vm2, %v6252_v26, %v2810_v56  ;;  %v6550_v31 = vsub.s32 %v3097_v20, %v3100_v53  ;;  %v2949_v9 = vshrl.u32 %v4383_v4, %v2948_v21 }
 0x3d7   :  { %v3248_v41 = vand.u32 2139095040, %v6521_v13  ;;  %4293 = vcosq.f32 %v2813_v52  ;;  %vm2965_vm14 = vcmp.lt.s32.totalorder %v6526_v50, 1  ;;  %vm2966_vm15 = vcmp.lt.s32.totalorder %v6526_v50, 2 }
 0x3d8   :  { %vm2967_vm0 = vcmp.lt.s32.totalorder %v6526_v50, 3  ;;  %4295 = vsinq.f32 %v2813_v52  ;;  %v3103_v45 = vsub.s32 0, %v6550_v31  ;;  %vm2968_vm1 = vcmp.lt.s32.totalorder %v6526_v50, 4 }
 0x3d9   :  { %v2973_v58 = vsel %vm2965_vm14, %v2952_v43, %v2955_v32  ;;  %v2970_v0 = vsel %vm2968_vm1, %v2958_v33, 2102212464  ;;  %v2974_v37 = vsel %vm2968_vm1, %v2961_v17, 920167782  ;;  %v2977_v21 = vsel %vm2965_vm14, %v2955_v32, %v2958_v33 }
 0x3da   :  { %v2978_v22 = vsel %vm2968_vm1, %v2964_v38, 1326507024  ;;  %v3950_v42 = vmin.u32 %v3103_v45, %v6550_v31  ;;  %v3123_v60 = vsub.s32 4, %v3099_v7  ;;  %v2975_v35 = vsel %vm2967_vm0, %v2958_v33, %v2974_v37 }
 0x3db   :  { %v2979_v47 = vsel %vm2967_vm0, %v2961_v17, %v2978_v22  ;;  %v2976_v20 = vsel %vm2966_vm15, %v2973_v58, %v2975_v35  ;;  %v2981_v24 = vshll.u32 %v2941_v44, 8  ;;  %v3249_v16 = vshrl.u32 %v3248_v41, 23 }
 0x3dc   :  { %v2980_v48 = vsel %vm2966_vm15, %v2977_v21, %v2979_v47  ;;  %vm6574_vm3 = vcmp.le.f32.partialorder %v3037_v49, 0.7853982  ;;  %v3105_v63 = vclz %v3950_v42  ;;  %v2969_v51 = vsel %vm2965_vm14, %v2949_v9, %v2952_v43 }
 0x3dd   :  { %v2971_v11 = vsel %vm2967_vm0, %v2955_v32, %v2970_v0  ;;  %v6582_v30 = vmul.u32.u64.low %v2981_v24, %v2980_v48  ;;  %v6583_v6 = vmul.u32.u64.high %v2981_v24, %v2980_v48, %v6582_v30  ;;  %vm2817_vm2 = vweird.f32 %v6252_v26 }
 0x3de   :  { %v6585_v25 = vmul.u32.u64.low %v2981_v24, %v2976_v20  ;;  %v6586_v19 = vmul.u32.u64.high %v2981_v24, %v2976_v20, %v6585_v25  ;;  %v3951_v49 = vadd.s32 4294967294, %v3105_v63  ;;  %v3124_v44 = vsel %vm3039_vm13, %v3123_v60, %v3099_v7 }
 0x3df   :  { %v3957_v55 = vadd.s32 4294967169, %v3249_v16  ;;  %v6594_v61 = vadd.f32 %v6429_v28, %v6164_v18  ;;  %vm2820_vm4 = vcmp.lt.s32.totalorder %v6542_v3, 2  ;;  %vm2821_vm5 = vcmp.eq.s32.totalorder %v6542_v3, 0 }
 0x3e0   :  { %vm2824_vm6 = vcmp.eq.s32.totalorder %v6542_v3, 2  ;;  %v2972_v46 = vsel %vm2966_vm15, %v2969_v51, %v2971_v11  ;;  %v3093_v39 = vadd.s32 %v6491_v59, %v6502_v57  ;;  %vm3952_vm7 = vcmp.lt.s32.totalorder %v3951_v49, 0 }
 0x3e1   :  { %v3245_v7 = vand.u32 2147483647, %v6521_v13  ;;  %v3255_v34 = vadd.s32 1, %v3957_v55  ;;  %v4294_v5 = vpop.eup %4293  ;;  %v3108_v29 = vsel %vm3952_vm7, 0, %v3951_v49  ;;  %v3126_v18 = vsel %vm6574_vm3, 0, %v3124_v44 }
 0x3e2   :  { %vm2990_vm8 = vc.u32 %v6583_v6, %v6585_v25  ;;  %v2991_v53 = vadd.s32 1, %v6586_v19  ;;  %v4296_v43 = vpop.eup %4295  ;;  %v2825_v50 = vxor.u32 2147483648, %v4294_v5  ;;  %v3109_v32 = vsub.s32 32, %v3108_v29 }
 0x3e3   :  { %v3113_v56 = vsub.s32 4294967266, %v3108_v29  ;;  %v2988_v33 = vmul.u32 %v2981_v24, %v2972_v46  ;;  %v2822_v59 = vxor.u32 2147483648, %v4296_v43  ;;  %v3110_v57 = vshll.u32 %v6550_v31, %v3108_v29 }
 0x3e4   :  { %v2992_v17 = vsel %vm2990_vm8, %v2991_v53, %v6586_v19  ;;  %vm3256_vm9 = vcmp.gt.s32.totalorder %v3255_v34, 0  ;;  %v2826_v38 = vsel %vm2824_vm6, %v2825_v50, %v4296_v43  ;;  %v3111_v52 = vshrl.u32 %v3093_v39, %v3109_v32 }
 0x3e5   :  { %v3114_v9 = vadd.s32 127, %v3113_v56  ;;  %v2993_v41 = vadd.s32 %v2992_v17, %v2988_v33  ;;  %v2823_v45 = vsel %vm2821_vm5, %v4294_v5, %v2822_v59  ;;  %v3130_v58 = vadd.s32 3, %v3126_v18 }
 0x3e6   :  { %v3252_v0 = vand.u32 8388607, %v3245_v7  ;;  %v3257_v37 = vsel %vm3256_vm9, %v3255_v34, 0  ;;  %v2827_v31 = vsel %vm2820_vm4, %v2823_v45, %v2826_v38  ;;  %v3112_v21 = vor.u32 %v3111_v52, %v3110_v57 }
 0x3e7   :  { %v3115_v22 = vshll.u32 %v3114_v9, 23  ;;  %v2994_v42 = vadd.s32 536870912, %v2993_v41  ;;  %v2828_v60 = vsel %vm2817_vm2, nan, %v2827_v31  ;;  %v3259_v35 = vand.u32 31, %v3257_v37 }
 0x3e8   :  { %v3144_v47 = vand.u32 2139095040, %v6594_v61  ;;  %3787 = vst [vmem:[#allocation5 + $0xb0] sm:$0xff] %v2828_v60  ;;  %v6622_v24 = vand.u32 3, %v3130_v58  ;;  %v3141_v63 = vand.u32 2147483647, %v6594_v61  ;;  %v3119_v3 = vcvt.s32.f32 %v3112_v21 }
 0x3e9   :  { %v3116_v20 = vor.u32 4788187, %v3115_v22  ;;  %v2995_v48 = vshrl.u32 %v2994_v42, 30  ;;  %v3260_v16 = vsub.s32 32, %v3259_v35  ;;  %vm2935_vm10 = vcmp.lt.s32.totalorder %v6433_v40, 0 }
 0x3ea   :  { %v3253_v30 = vor.u32 8388608, %v3252_v0  ;;  %v3145_v44 = vshrl.u32 %v3144_v47, 23  ;;  %v3262_v39 = vshll.u32 %v4383_v4, %v3259_v35  ;;  %v3258_v29 = vshrl.u32 %v3257_v37, 5 }
 0x3eb   :  { %v3117_v51 = vand.u32 2147483647, %v3116_v20  ;;  %v2996_v11 = vshll.u32 %v2995_v48, 30  ;;  %v3263_v26 = vshrl.u32 %v4384_v8, %v3260_v16  ;;  %v3266_v19 = vshrl.u32 %v4385_v10, %v3260_v16 }
 0x3ec   :  { %v3269_v49 = vshrl.u32 %v4386_v12, %v3260_v16  ;;  %v3272_v34 = vshrl.u32 %v4387_v14, %v3260_v16  ;;  %v3019_v5 = vsub.s32 4, %v2995_v48  ;;  %v3265_v18 = vshll.u32 %v4384_v8, %v3259_v35 }
 0x3ed   :  { %v3120_v55 = vmul.f32 %v3119_v3, %v3117_v51  ;;  %v6629_v46 = vsub.s32 %v2993_v41, %v2996_v11  ;;  %v3268_v53 = vshll.u32 %v4385_v10, %v3259_v35  ;;  %v3264_v32 = vor.u32 %v3263_v26, %v3262_v39 }
 0x3ee   :  { %v3271_v56 = vshll.u32 %v4386_v12, %v3259_v35  ;;  %v3267_v33 = vor.u32 %v3266_v19, %v3265_v18  ;;  %v3274_v57 = vshll.u32 %v4387_v14, %v3259_v35  ;;  %v3275_v17 = vshrl.u32 %v4388_v23, %v3260_v16 }
 0x3ef   :  { %v3121_v43 = vxor.u32 2147483648, %v3120_v55  ;;  %v2999_v50 = vsub.s32 0, %v6629_v46  ;;  %v3270_v59 = vor.u32 %v3269_v49, %v3268_v53  ;;  %vm6643_vm11 = vcmp.le.f32.partialorder %v2933_v62, 0.7853982 }
 0x3f0   :  { %v3273_v41 = vor.u32 %v3272_v34, %v3271_v56  ;;  %v6648_v45 = vshll.u32 %v3253_v30, 8  ;;  %v3261_v0 = vshrl.u32 %v4383_v4, %v3260_v16  ;;  %v3276_v37 = vor.u32 %v3275_v17, %v3274_v57 }
 0x3f1   :  { %v3122_v38 = vsel %vm3039_vm13, %v3121_v43, %v3120_v55  ;;  %v3946_v9 = vmin.u32 %v2999_v50, %v6629_v46  ;;  %v3953_v31 = vadd.s32 4294967169, %v3145_v44  ;;  %vm3277_vm12 = vcmp.lt.s32.totalorder %v3258_v29, 1 }
 0x3f2   :  { %v3125_v58 = vsel %vm6574_vm3, %v6276_v27, %v3122_v38  ;;  %vm3280_vm13 = vcmp.lt.s32.totalorder %v3258_v29, 4  ;;  %v3020_v62 = vsel %vm2935_vm10, %v3019_v5, %v2995_v48  ;;  %v3285_v42 = vsel %vm3277_vm12, %v3264_v32, %v3267_v33 }
 0x3f3   :  { %4297 = vcosq.f32 %v3125_v58  ;;  %v3001_v21 = vclz %v3946_v9  ;;  %v3282_v22 = vsel %vm3280_vm13, %v3270_v59, 2102212464  ;;  %vm3279_vm14 = vcmp.lt.s32.totalorder %v3258_v29, 3 }
 0x3f4   :  { %4299 = vsinq.f32 %v3125_v58  ;;  %v3286_v35 = vsel %vm3280_vm13, %v3273_v41, 920167782  ;;  %v3289_v47 = vsel %vm3277_vm12, %v3267_v33, %v3270_v59  ;;  %vm3278_vm15 = vcmp.lt.s32.totalorder %v3258_v29, 2 }
 0x3f5   :  { %v3947_v60 = vadd.s32 4294967294, %v3001_v21  ;;  %v3281_v1 = vsel %vm3277_vm12, %v3261_v0, %v3264_v32  ;;  %v3287_v20 = vsel %vm3279_vm14, %v3270_v59, %v3286_v35  ;;  %v3290_v16 = vsel %vm3280_vm13, %v3276_v37, 1326507024 }
 0x3f6   :  { %v3283_v51 = vsel %vm3279_vm14, %v3267_v33, %v3282_v22  ;;  %v3288_v3 = vsel %vm3278_vm15, %v3285_v42, %v3287_v20  ;;  %v3291_v11 = vsel %vm3279_vm14, %v3273_v41, %v3290_v16  ;;  %v2989_v49 = vadd.s32 %v6585_v25, %v6583_v6 }
 0x3f7   :  { %vm3948_vm0 = vcmp.lt.s32.totalorder %v3947_v60, 0  ;;  %v3292_v26 = vsel %vm3278_vm15, %v3289_v47, %v3291_v11  ;;  %v6659_v48 = vmul.u32.u64.low %v6648_v45, %v3288_v3  ;;  %v6660_v19 = vmul.u32.u64.high %v6648_v45, %v3288_v3, %v6659_v48 }
 0x3f8   :  { %v3004_v30 = vsel %vm3948_vm0, 0, %v3947_v60  ;;  %v3151_v39 = vadd.s32 1, %v3953_v31  ;;  %vm3129_vm1 = vweird.f32 %v6276_v27  ;;  %v3022_v34 = vsel %vm6643_vm11, 0, %v3020_v62 }
 0x3f9   :  { %v3005_v44 = vsub.s32 32, %v3004_v30  ;;  %v3009_v55 = vsub.s32 4294967266, %v3004_v30  ;;  %v3284_v5 = vsel %vm3278_vm15, %v3281_v1, %v3283_v51  ;;  %v3006_v43 = vshll.u32 %v6629_v46, %v3004_v30 }
 0x3fa   :  { %v6670_v18 = vmul.u32.u64.low %v6648_v45, %v3292_v26  ;;  %v6671_v53 = vmul.u32.u64.high %v6648_v45, %v3292_v26, %v6670_v18  ;;  %vm3152_vm3 = vcmp.gt.s32.totalorder %v3151_v39, 0  ;;  %vm3132_vm2 = vcmp.lt.s32.totalorder %v6622_v24, 2 }
 0x3fb   :  { %v3007_v50 = vshrl.u32 %v2989_v49, %v3005_v44  ;;  %v3010_v32 = vadd.s32 127, %v3009_v55  ;;  %v3303_v6 = vadd.s32 1, %v6660_v19  ;;  %v3153_v25 = vsel %vm3152_vm3, %v3151_v39, 0 }
 0x3fc   :  { %v6678_v56 = vadd.f32 %v6429_v28, %v6270_v36  ;;  %v3026_v57 = vadd.s32 3, %v3022_v34  ;;  %v3155_v17 = vand.u32 31, %v3153_v25  ;;  %v3300_v46 = vmul.u32 %v6648_v45, %v3284_v5 }
 0x3fd   :  { %v4298_v29 = vpop.eup %4297  ;;  %v3008_v33 = vor.u32 %v3007_v50, %v3006_v43  ;;  %v3011_v59 = vshll.u32 %v3010_v32, 23  ;;  %vm3302_vm4 = vc.u32 %v6671_v53, %v6659_v48  ;;  %v3148_v41 = vand.u32 8388607, %v3141_v63 }
 0x3fe   :  { %v4300_v38 = vpop.eup %4299  ;;  %v3137_v9 = vxor.u32 2147483648, %v4298_v29  ;;  %vm3136_vm5 = vcmp.eq.s32.totalorder %v6622_v24, 2  ;;  %v3304_v0 = vsel %vm3302_vm4, %v3303_v6, %v6660_v19  ;;  %vm3133_vm6 = vcmp.eq.s32.totalorder %v6622_v24, 0 }
 0x3ff   :  { %v3134_v58 = vxor.u32 2147483648, %v4300_v38  ;;  %v3012_v36 = vor.u32 4788187, %v3011_v59  ;;  %v3305_v31 = vadd.s32 %v3304_v0, %v3300_v46  ;;  %v3156_v21 = vsub.s32 32, %v3155_v17 }
 0x400   :  { %v3138_v37 = vsel %vm3136_vm5, %v3137_v9, %v4300_v38  ;;  %v3015_v45 = vcvt.s32.f32 %v3008_v33  ;;  %v6688_v42 = vand.u32 3, %v3026_v57  ;;  %v3149_v47 = vor.u32 8388608, %v3148_v41 }
 0x401   :  { %v3135_v62 = vsel %vm3133_vm6, %v4298_v29, %v3134_v58  ;;  %v3013_v22 = vand.u32 2147483647, %v3012_v36  ;;  %v3306_v35 = vadd.s32 536870912, %v3305_v31  ;;  %v3159_v1 = vshrl.u32 %v4384_v8, %v3156_v21 }
 0x402   :  { %v3139_v60 = vsel %vm3132_vm2, %v3135_v62, %v3138_v37  ;;  %v3162_v51 = vshrl.u32 %v4385_v10, %v3156_v21  ;;  %v3456_v3 = vand.u32 2139095040, %v6678_v56  ;;  %v3158_v30 = vshll.u32 %v4383_v4, %v3155_v17 }
 0x403   :  { %v3140_v20 = vsel %vm3129_vm1, nan, %v3139_v60  ;;  %v3016_v16 = vmul.f32 %v3015_v45, %v3013_v22  ;;  %v3307_v11 = vshrl.u32 %v3306_v35, 30  ;;  %v3165_v26 = vshrl.u32 %v4386_v12, %v3156_v21 }
 0x404   :  { %3790 = vst [vmem:[#allocation5 + $0xc8] sm:$0xff] %v3140_v20  ;;  %v3168_v24 = vshrl.u32 %v4387_v14, %v3156_v21  ;;  %v3154_v49 = vshrl.u32 %v3153_v25, 5  ;;  %v3161_v44 = vshll.u32 %v4384_v8, %v3155_v17  ;;  %v3167_v27 = vshll.u32 %v4386_v12, %v3155_v17 }
 0x405   :  { %v3017_v19 = vxor.u32 2147483648, %v3016_v16  ;;  %v3308_v55 = vshll.u32 %v3307_v11, 30  ;;  %v3160_v39 = vor.u32 %v3159_v1, %v3158_v30  ;;  %v3164_v34 = vshll.u32 %v4385_v10, %v3155_v17 }
 0x406   :  { %v3171_v5 = vshrl.u32 %v4388_v23, %v3156_v21  ;;  %vm3247_vm7 = vcmp.lt.s32.totalorder %v6521_v13, 0  ;;  %v3163_v43 = vor.u32 %v3162_v51, %v3161_v44  ;;  %v3169_v50 = vor.u32 %v3168_v24, %v3167_v27 }
 0x407   :  { %v3018_v18 = vsel %vm2935_vm10, %v3017_v19, %v3016_v16  ;;  %v3170_v32 = vshll.u32 %v4387_v14, %v3155_v17  ;;  %v6711_v25 = vsub.s32 %v3305_v31, %v3308_v55  ;;  %v3166_v29 = vor.u32 %v3165_v26, %v3164_v34 }
 0x408   :  { %v3021_v6 = vsel %vm6643_vm11, %v6433_v40, %v3018_v18  ;;  %v3189_v33 = vshll.u32 %v3149_v47, 8  ;;  %v3157_v59 = vshrl.u32 %v4383_v4, %v3156_v21  ;;  %v3457_v38 = vshrl.u32 %v3456_v3, 23 }
 0x409   :  { %4301 = vcosq.f32 %v3021_v6  ;;  %v3172_v57 = vor.u32 %v3171_v5, %v3170_v32  ;;  %v3311_v9 = vsub.s32 0, %v6711_v25  ;;  %vm3173_vm8 = vcmp.lt.s32.totalorder %v3154_v49, 1 }
 0x40a   :  { %4303 = vsinq.f32 %v3021_v6  ;;  %vm3176_vm9 = vcmp.lt.s32.totalorder %v3154_v49, 4  ;;  %v3331_v46 = vsub.s32 4, %v3307_v11  ;;  %vm3175_vm10 = vcmp.lt.s32.totalorder %v3154_v49, 3 }
 0x40b   :  { %v3181_v17 = vsel %vm3173_vm8, %v3160_v39, %v3163_v43  ;;  %v3182_v52 = vsel %vm3176_vm9, %v3169_v50, 920167782  ;;  %v3958_v41 = vmin.u32 %v3311_v9, %v6711_v25  ;;  %vm3174_vm11 = vcmp.lt.s32.totalorder %v3154_v49, 2 }
 0x40c   :  { %v3178_v58 = vsel %vm3176_vm9, %v3166_v29, 2102212464  ;;  %v3183_v36 = vsel %vm3175_vm10, %v3166_v29, %v3182_v52  ;;  %v3185_v37 = vsel %vm3173_vm8, %v3163_v43, %v3166_v29  ;;  %v3186_v31 = vsel %vm3176_vm9, %v3172_v57, 1326507024 }
 0x40d   :  { %v3184_v0 = vsel %vm3174_vm11, %v3181_v17, %v3183_v36  ;;  %v3965_v21 = vadd.s32 4294967169, %v3457_v38  ;;  %vm6722_vm12 = vcmp.le.f32.partialorder %v3245_v7, 0.7853982  ;;  %v3313_v22 = vclz %v3958_v41 }
 0x40e   :  { %v3177_v45 = vsel %vm3173_vm8, %v3157_v59, %v3160_v39  ;;  %v3453_v60 = vand.u32 2147483647, %v6678_v56  ;;  %v3179_v35 = vsel %vm3175_vm10, %v3163_v43, %v3178_v58  ;;  %v3187_v47 = vsel %vm3175_vm10, %v3169_v50, %v3186_v31 }
 0x40f   :  { %v6730_v1 = vmul.u32.u64.low %v3189_v33, %v3184_v0  ;;  %v6731_v20 = vmul.u32.u64.high %v3189_v33, %v3184_v0, %v6730_v1  ;;  %v3959_v16 = vadd.s32 4294967294, %v3313_v22  ;;  %v3332_v7 = vsel %vm3247_vm7, %v3331_v46, %v3307_v11 }
 0x410   :  { %v3188_v51 = vsel %vm3174_vm11, %v3185_v37, %v3187_v47  ;;  %v3463_v3 = vadd.s32 1, %v3965_v21  ;;  %vm3029_vm13 = vcmp.eq.s32.totalorder %v6688_v42, 0  ;;  %vm3032_vm14 = vcmp.eq.s32.totalorder %v6688_v42, 2 }
 0x411   :  { %v6739_v30 = vmul.u32.u64.low %v3189_v33, %v3188_v51  ;;  %v6740_v26 = vmul.u32.u64.high %v3189_v33, %v3188_v51, %v6739_v30  ;;  %vm3960_vm15 = vcmp.lt.s32.totalorder %v3959_v16, 0  ;;  %v3180_v24 = vsel %vm3174_vm11, %v3177_v45, %v3179_v35 }
 0x412   :  { %v3460_v19 = vand.u32 8388607, %v3453_v60  ;;  %vm3464_vm0 = vcmp.gt.s32.totalorder %v3463_v3, 0  ;;  %v3301_v11 = vadd.s32 %v6659_v48, %v6671_v53  ;;  %v3316_v27 = vsel %vm3960_vm15, 0, %v3959_v16 }
 0x413   :  { %v4302_v44 = vpop.eup %4301  ;;  %v3334_v55 = vsel %vm6722_vm12, 0, %v3332_v7  ;;  %v3199_v39 = vadd.s32 1, %v6731_v20  ;;  %v3317_v18 = vsub.s32 32, %v3316_v27  ;;  %v3321_v43 = vsub.s32 4294967266, %v3316_v27 }
 0x414   :  { %v4304_v34 = vpop.eup %4303  ;;  %v3033_v5 = vxor.u32 2147483648, %v4302_v44  ;;  %v3465_v49 = vsel %vm3464_vm0, %v3463_v3, 0  ;;  %v3318_v32 = vshll.u32 %v6711_v25, %v3316_v27  ;;  %v3196_v6 = vmul.u32 %v3189_v33, %v3180_v24 }
 0x415   :  { %v3030_v50 = vxor.u32 2147483648, %v4304_v34  ;;  %vm3198_vm1 = vc.u32 %v6740_v26, %v6730_v1  ;;  %v3319_v53 = vshrl.u32 %v3301_v11, %v3317_v18  ;;  %v3322_v29 = vadd.s32 127, %v3321_v43 }
 0x416   :  { %v3034_v48 = vsel %vm3032_vm14, %v3033_v5, %v4304_v34  ;;  %v3200_v59 = vsel %vm3198_vm1, %v3199_v39, %v6731_v20  ;;  %vm3028_vm3 = vcmp.lt.s32.totalorder %v6688_v42, 2  ;;  %v3467_v9 = vand.u32 31, %v3465_v49 }
 0x417   :  { %v3031_v57 = vsel %vm3029_vm13, %v4302_v44, %v3030_v50  ;;  %v3201_v38 = vadd.s32 %v3200_v59, %v3196_v6  ;;  %vm3025_vm2 = vweird.f32 %v6433_v40  ;;  %v3320_v33 = vor.u32 %v3319_v53, %v3318_v32 }
 0x418   :  { %v3035_v25 = vsel %vm3028_vm3, %v3031_v57, %v3034_v48  ;;  %v3323_v46 = vshll.u32 %v3322_v29, 23  ;;  %v3338_v52 = vadd.s32 3, %v3334_v55  ;;  %v3468_v58 = vsub.s32 32, %v3467_v9 }
 0x419   :  { %v3036_v17 = vsel %vm3025_vm2, nan, %v3035_v25  ;;  %v3202_v41 = vadd.s32 536870912, %v3201_v38  ;;  %v3327_v0 = vcvt.s32.f32 %v3320_v33  ;;  %v3461_v37 = vor.u32 8388608, %v3460_v19 }
 0x41a   :  { %3789 = vst [vmem:[#allocation5 + $0xc0] sm:$0xff] %v3036_v17  ;;  %v3324_v36 = vor.u32 4788187, %v3323_v46  ;;  %v3470_v31 = vshll.u32 %v4383_v4, %v3467_v9  ;;  %v3471_v42 = vshrl.u32 %v4384_v8, %v3468_v58  ;;  %v3473_v22 = vshll.u32 %v4384_v8, %v3467_v9 }
 0x41b   :  { %v6761_v21 = vshrl.u32 %v3202_v41, 30  ;;  %v3474_v40 = vshrl.u32 %v4385_v10, %v3468_v58  ;;  %v3477_v35 = vshrl.u32 %v4386_v12, %v3468_v58  ;;  %v3479_v47 = vshll.u32 %v4386_v12, %v3467_v9 }
 0x41c   :  { %v3325_v45 = vand.u32 2147483647, %v3324_v36  ;;  %v3480_v20 = vshrl.u32 %v4387_v14, %v3468_v58  ;;  %v6769_v16 = vand.u32 3, %v3338_v52  ;;  %v3466_v51 = vshrl.u32 %v3465_v49, 5 }
 0x41d   :  { %v3204_v7 = vshll.u32 %v6761_v21, 30  ;;  %v3476_v3 = vshll.u32 %v4385_v10, %v3467_v9  ;;  %v3472_v24 = vor.u32 %v3471_v42, %v3470_v31  ;;  %v3475_v19 = vor.u32 %v3474_v40, %v3473_v22 }
 0x41e   :  { %v3328_v30 = vmul.f32 %v3327_v0, %v3325_v45  ;;  %v3481_v44 = vor.u32 %v3480_v20, %v3479_v47  ;;  %v3482_v55 = vshll.u32 %v4387_v14, %v3467_v9  ;;  %v3483_v39 = vshrl.u32 %v4388_v23, %v3468_v58 }
 0x41f   :  { %v6773_v11 = vsub.s32 %v3201_v38, %v3204_v7  ;;  %v3478_v27 = vor.u32 %v3477_v35, %v3476_v3  ;;  %v3501_v5 = vshll.u32 %v3461_v37, 8  ;;  %v6779_v18 = vadd.f32 %v6429_v28, %v6322_v2 }
 0x420   :  { %v3329_v34 = vxor.u32 2147483648, %v3328_v30  ;;  %v6783_v43 = vadd.f32 %v6429_v28, %v6445_v54  ;;  %v3484_v50 = vor.u32 %v3483_v39, %v3482_v55  ;;  %vm3485_vm4 = vcmp.lt.s32.totalorder %v3466_v51, 1 }
 0x421   :  { %v3207_v49 = vsub.s32 0, %v6773_v11  ;;  %vm3488_vm5 = vcmp.lt.s32.totalorder %v3466_v51, 4  ;;  %v3469_v6 = vshrl.u32 %v4383_v4, %v3468_v58  ;;  %vm3487_vm6 = vcmp.lt.s32.totalorder %v3466_v51, 3 }
 0x422   :  { %v3330_v32 = vsel %vm3247_vm7, %v3329_v34, %v3328_v30  ;;  %v3494_v48 = vsel %vm3488_vm5, %v3481_v44, 920167782  ;;  %v3490_v28 = vsel %vm3488_vm5, %v3478_v27, 2102212464  ;;  %v3493_v54 = vsel %vm3485_vm4, %v3472_v24, %v3475_v19 }
 0x423   :  { %v3333_v2 = vsel %vm6722_vm12, %v6521_v13, %v3330_v32  ;;  %v3954_v53 = vmin.u32 %v3207_v49, %v6773_v11  ;;  %v3495_v29 = vsel %vm3487_vm6, %v3478_v27, %v3494_v48  ;;  %v3497_v59 = vsel %vm3485_vm4, %v3475_v19, %v3478_v27 }
 0x424   :  { %4305 = vcosq.f32 %v3333_v2  ;;  %v3498_v57 = vsel %vm3488_vm5, %v3484_v50, 1326507024  ;;  %v3227_v9 = vsub.s32 4, %v6761_v21  ;;  %vm3486_vm7 = vcmp.lt.s32.totalorder %v3466_v51, 2 }
 0x425   :  { %4307 = vsinq.f32 %v3333_v2  ;;  %v3209_v38 = vclz %v3954_v53  ;;  %v3489_v25 = vsel %vm3485_vm4, %v3469_v6, %v3472_v24  ;;  %v3491_v62 = vsel %vm3487_vm6, %v3475_v19, %v3490_v28 }
 0x426   :  { %v3496_v33 = vsel %vm3486_vm7, %v3493_v54, %v3495_v29  ;;  %v3499_v46 = vsel %vm3487_vm6, %v3481_v44, %v3498_v57  ;;  %vm3143_vm8 = vcmp.lt.s32.totalorder %v6594_v61, 0  ;;  %vm6810_vm9 = vcmp.le.f32.partialorder %v3141_v63, 0.7853982 }
 0x427   :  { %v3955_v17 = vadd.s32 4294967294, %v3209_v38  ;;  %v3500_v52 = vsel %vm3486_vm7, %v3497_v59, %v3499_v46  ;;  %v6800_v41 = vmul.u32.u64.low %v3501_v5, %v3496_v33  ;;  %v6801_v58 = vmul.u32.u64.high %v3501_v5, %v3496_v33, %v6800_v41 }
 0x428   :  { %v6805_v36 = vmul.u32.u64.low %v3501_v5, %v3500_v52  ;;  %v6806_v0 = vmul.u32.u64.high %v3501_v5, %v3500_v52, %v6805_v36  ;;  %v3492_v31 = vsel %vm3486_vm7, %v3489_v25, %v3491_v62  ;;  %v3352_v42 = vand.u32 2139095040, %v6779_v18 }
 0x429   :  { %vm3956_vm10 = vcmp.lt.s32.totalorder %v3955_v17, 0  ;;  %vm3340_vm11 = vcmp.lt.s32.totalorder %v6769_v16, 2  ;;  %v3197_v22 = vadd.s32 %v6730_v1, %v6740_v26  ;;  %v3349_v45 = vand.u32 2147483647, %v6779_v18 }
 0x42a   :  { %v3212_v40 = vsel %vm3956_vm10, 0, %v3955_v17  ;;  %v3664_v35 = vand.u32 2139095040, %v6783_v43  ;;  %vm3337_vm12 = vweird.f32 %v6521_v13  ;;  %v3228_v20 = vsel %vm3143_vm8, %v3227_v9, %v6761_v21 }
 0x42b   :  { %v3213_v63 = vsub.s32 32, %v3212_v40  ;;  %v3217_v47 = vsub.s32 4294967266, %v3212_v40  ;;  %v3511_v7 = vadd.s32 1, %v6801_v58  ;;  %vm3344_vm13 = vcmp.eq.s32.totalorder %v6769_v16, 2 }
 0x42c   :  { %v3508_v51 = vmul.u32 %v3501_v5, %v3492_v31  ;;  %vm3510_vm14 = vc.u32 %v6806_v0, %v6800_v41  ;;  %v3353_v1 = vshrl.u32 %v3352_v42, 23  ;;  %v3214_v26 = vshll.u32 %v6773_v11, %v3212_v40  ;;  %v4333_v31 = vld [vmem:[%s7096_s2] ss:$0 sm:$0xff]  ;;  %s4389_s2 = smov [#allocation5]  }
 0x42d   :  { %v3215_v3 = vshrl.u32 %v3197_v22, %v3213_v63  ;;  %v3218_v30 = vadd.s32 127, %v3217_v47  ;;  %v3512_v24 = vsel %vm3510_vm14, %v3511_v7, %v6801_v58  ;;  %v3230_v44 = vsel %vm6810_vm9, 0, %v3228_v20  ;;  %s3802_s9 = sshll.u32 %s4389_s2, 4  ;;  %s3803_s9 = int_to_ptr.vmem [resolvable:$true] %s3802_s9 }
 0x42e   :  { %v4306_v19 = vpop.eup %4305  ;;  %v3513_v21 = vadd.s32 %v3512_v24, %v3508_v51  ;;  %v3961_v27 = vadd.s32 4294967169, %v3353_v1  ;;  %v3665_v55 = vshrl.u32 %v3664_v35, 23  ;;  %v3356_v50 = vand.u32 8388607, %v3349_v45  ;;  %s4356_s10 = scalar_lea.vmem %s3803_s9, 4096  ;;  %p4361_p9 = scmp.lt.s32.totalorder %s3803_s9, %s3803_s9 }
 0x42f   :  { %v4308_v39 = vpop.eup %4307  ;;  %v3345_v34 = vxor.u32 2147483648, %v4306_v19  ;;  %v3216_v5 = vor.u32 %v3215_v3, %v3214_v26  ;;  %v3219_v49 = vshll.u32 %v3218_v30, 23  ;;  %v3661_v48 = vand.u32 2147483647, %v6783_v43  ;;  %p4357_p8 = scmp.ne.s32.totalorder %s3803_s9, %s4356_s10  ;;  %p4362_p10 = scmp.lt.s32.totalorder %s4356_s10, %s4356_s10 }
 0x430   :  { %v3342_v32 = vxor.u32 2147483648, %v4308_v39  ;;  %v3514_v11 = vadd.s32 536870912, %v3513_v21  ;;  %v3359_v6 = vadd.s32 1, %v3961_v27  ;;  %vm3341_vm15 = vcmp.eq.s32.totalorder %v6769_v16, 0 }
 0x431   :  { %v3346_v2 = vsel %vm3344_vm13, %v3345_v34, %v4308_v39  ;;  %v3220_v53 = vor.u32 4788187, %v3219_v49  ;;  %v3234_v28 = vadd.s32 3, %v3230_v44  ;;  %v3973_v59 = vadd.s32 4294967169, %v3665_v55  ;;  %p4363_p11 = por %p4362_p10, %p4361_p9 }
 0x432   :  { %v3343_v54 = vsel %vm3341_vm15, %v4306_v19, %v3342_v32  ;;  %v6838_v29 = vshrl.u32 %v3514_v11, 30  ;;  %vm3360_vm0 = vcmp.gt.s32.totalorder %v3359_v6, 0  ;;  %v3223_v9 = vcvt.s32.f32 %v3216_v5 }
 0x433   :  { %v3347_v57 = vsel %vm3340_vm11, %v3343_v54, %v3346_v2  ;;  %v3221_v38 = vand.u32 2147483647, %v3220_v53  ;;  %v3361_v25 = vsel %vm3360_vm0, %v3359_v6, 0  ;;  %v3357_v46 = vor.u32 8388608, %v3356_v50  ;;  %p4364_p12 = pnand %p4363_p11, %p4357_p8 }
 0x434   :  { %v3348_v62 = vsel %vm3337_vm12, nan, %v3347_v57  ;;  %v3516_v33 = vshll.u32 %v6838_v29, 30  ;;  %v6847_v17 = vand.u32 8388607, %v3661_v48  ;;  %v3363_v58 = vand.u32 31, %v3361_v25 }
 0x435   :  { %3792 = vst [vmem:[#allocation5 + $0xd8] sm:$0xff] %v3348_v62  ;;  %v3224_v52 = vmul.f32 %v3223_v9, %v3221_v38  ;;  %v6849_v36 = vand.u32 3, %v3234_v28  ;;  %v6857_v13 = vadd.f32 %v4333_v31, %v6480_v15  ;;  %v6859_v22 = vshrl.u32 %v3361_v25, 5 }
 0x436   :  { %v6851_v16 = vsub.s32 %v3513_v21, %v3516_v33  ;;  %v3364_v40 = vsub.s32 32, %v3363_v58  ;;  %v3671_v35 = vadd.s32 1, %v3973_v59  ;;  %v3509_v63 = vadd.s32 %v6800_v41, %v6806_v0 }
 0x437   :  { %v3225_v42 = vxor.u32 2147483648, %v3224_v52  ;;  %v6864_v20 = vshll.u32 %v3357_v46, 8  ;;  %v3669_v7 = vor.u32 8388608, %v6847_v17  ;;  %v3366_v15 = vshll.u32 %v4383_v4, %v3363_v58 }
 0x438   :  { %v3519_v47 = vsub.s32 0, %v6851_v16  ;;  %v3367_v1 = vshrl.u32 %v4384_v8, %v3364_v40  ;;  %v3370_v26 = vshrl.u32 %v4385_v10, %v3364_v40  ;;  %v3369_v0 = vshll.u32 %v4384_v8, %v3363_v58 }
 0x439   :  { %v3226_v51 = vsel %vm3143_vm8, %v3225_v42, %v3224_v52  ;;  %v3373_v30 = vshrl.u32 %v4386_v12, %v3364_v40  ;;  %v3372_v24 = vshll.u32 %v4385_v10, %v3363_v58  ;;  %vm3381_vm1 = vcmp.lt.s32.totalorder %v6859_v22, 1 }
 0x43a   :  { %v3229_v3 = vsel %vm6810_vm9, %v6594_v61, %v3226_v51  ;;  %v3966_v41 = vmin.u32 %v3519_v47, %v6851_v16  ;;  %vm3672_vm3 = vcmp.gt.s32.totalorder %v3671_v35, 0  ;;  %v3368_v44 = vor.u32 %v3367_v1, %v3366_v15 }
 0x43b   :  { %4309 = vcosq.f32 %v3229_v3  ;;  %v3371_v21 = vor.u32 %v3370_v26, %v3369_v0  ;;  %v3365_v27 = vshrl.u32 %v4383_v4, %v3364_v40  ;;  %v3374_v37 = vor.u32 %v3373_v30, %v3372_v24 }
 0x43c   :  { %4311 = vsinq.f32 %v3229_v3  ;;  %v3521_v19 = vclz %v3966_v41  ;;  %v3375_v55 = vshll.u32 %v4386_v12, %v3363_v58  ;;  %v3376_v39 = vshrl.u32 %v4387_v14, %v3364_v40 }
 0x43d   :  { %vm3455_vm2 = vcmp.lt.s32.totalorder %v6678_v56, 0  ;;  %v3378_v5 = vshll.u32 %v4387_v14, %v3363_v58  ;;  %v3379_v49 = vshrl.u32 %v4388_v23, %v3364_v40  ;;  %vm3384_vm4 = vcmp.lt.s32.totalorder %v6859_v22, 4 }
 0x43e   :  { %v3967_v34 = vadd.s32 4294967294, %v3521_v19  ;;  %vm3240_vm5 = vcmp.eq.s32.totalorder %v6849_v36, 2  ;;  %v3377_v50 = vor.u32 %v3376_v39, %v3375_v55  ;;  %vm3382_vm6 = vcmp.lt.s32.totalorder %v6859_v22, 2 }
 0x43f   :  { %vm3383_vm7 = vcmp.lt.s32.totalorder %v6859_v22, 3  ;;  %v3386_v32 = vsel %vm3384_vm4, %v3374_v37, 2102212464  ;;  %vm3237_vm8 = vcmp.eq.s32.totalorder %v6849_v36, 0  ;;  %v3380_v11 = vor.u32 %v3379_v49, %v3378_v5 }
 0x440   :  { %vm3968_vm9 = vcmp.lt.s32.totalorder %v3967_v34, 0  ;;  %v3385_v6 = vsel %vm3381_vm1, %v3365_v27, %v3368_v44  ;;  %v3389_v2 = vsel %vm3381_vm1, %v3368_v44, %v3371_v21  ;;  %vm3236_vm10 = vcmp.lt.s32.totalorder %v6849_v36, 2 }
 0x441   :  { %v3524_v53 = vsel %vm3968_vm9, 0, %v3967_v34  ;;  %v3387_v28 = vsel %vm3383_vm7, %v3371_v21, %v3386_v32  ;;  %v3390_v54 = vsel %vm3384_vm4, %v3377_v50, 920167782  ;;  %v3673_v59 = vsel %vm3672_vm3, %v3671_v35, 0 }
 0x442   :  { %vm3233_vm11 = vweird.f32 %v6594_v61  ;;  %v3525_v57 = vsub.s32 32, %v3524_v53  ;;  %v3529_v38 = vsub.s32 4294967266, %v3524_v53  ;;  %v3391_v9 = vsel %vm3383_vm7, %v3374_v37, %v3390_v54 }
 0x443   :  { %v3393_v25 = vsel %vm3381_vm1, %v3371_v21, %v3374_v37  ;;  %v3526_v62 = vshll.u32 %v6851_v16, %v3524_v53  ;;  %v3539_v33 = vsub.s32 4, %v6838_v29  ;;  %v3392_v46 = vsel %vm3382_vm6, %v3389_v2, %v3391_v9 }
 0x444   :  { %v3394_v52 = vsel %vm3384_vm4, %v3380_v11, 1326507024  ;;  %v3527_v58 = vshrl.u32 %v3509_v63, %v3525_v57  ;;  %v3530_v31 = vadd.s32 127, %v3529_v38  ;;  %v3675_v40 = vand.u32 31, %v3673_v59 }
 0x445   :  { %v3395_v42 = vsel %vm3383_vm7, %v3377_v50, %v3394_v52  ;;  %v4310_v35 = vpop.eup %4309  ;;  %v3388_v47 = vsel %vm3382_vm6, %v3385_v6, %v3387_v28  ;;  %v6921_v51 = vmul.u32.u64.low %v6864_v20, %v3392_v46  ;;  %v6922_v15 = vmul.u32.u64.high %v6864_v20, %v3392_v46, %v6921_v51 }
 0x446   :  { %v3396_v16 = vsel %vm3382_vm6, %v3393_v25, %v3395_v42  ;;  %v4312_v1 = vpop.eup %4311  ;;  %v3241_v26 = vxor.u32 2147483648, %v4310_v35  ;;  %vm6927_vm12 = vcmp.le.f32.partialorder %v3453_v60, 0.7853982  ;;  %v3528_v3 = vor.u32 %v3527_v58, %v3526_v62 }
 0x447   :  { %v3531_v41 = vshll.u32 %v3530_v31, 23  ;;  %v3676_v0 = vsub.s32 32, %v3675_v40  ;;  %v3238_v30 = vxor.u32 2147483648, %v4312_v1  ;;  %v3540_v22 = vsel %vm3455_vm2, %v3539_v33, %v6838_v29 }
 0x448   :  { %v6935_v24 = vmul.u32.u64.low %v6864_v20, %v3396_v16  ;;  %v6936_v19 = vmul.u32.u64.high %v6864_v20, %v3396_v16, %v6935_v24  ;;  %v3242_v44 = vsel %vm3240_vm5, %v3241_v26, %v4312_v1  ;;  %v3404_v60 = vmul.u32 %v6864_v20, %v3388_v47 }
 0x449   :  { %v3532_v21 = vor.u32 4788187, %v3531_v41  ;;  %v6941_v27 = vshrl.u32 %v3673_v59, 5  ;;  %v3239_v37 = vsel %vm3237_vm8, %v4310_v35, %v3238_v30  ;;  %v3407_v55 = vadd.s32 1, %v6922_v15 }
 0x44a   :  { %v3678_v39 = vshll.u32 %v4383_v4, %v3675_v40  ;;  %v3679_v29 = vshrl.u32 %v4384_v8, %v3676_v0  ;;  %v3243_v34 = vsel %vm3236_vm10, %v3239_v37, %v3242_v44  ;;  %v3535_v49 = vcvt.s32.f32 %v3528_v3 }
 0x44b   :  { %v3533_v5 = vand.u32 2147483647, %v3532_v21  ;;  %v3682_v50 = vshrl.u32 %v4385_v10, %v3676_v0  ;;  %v3244_v20 = vsel %vm3233_vm11, nan, %v3243_v34  ;;  %vm3406_vm13 = vc.u32 %v6936_v19, %v6921_v51 }
 0x44c   :  { %v3681_v32 = vshll.u32 %v4384_v8, %v3675_v40  ;;  %v3684_v11 = vshll.u32 %v4385_v10, %v3675_v40  ;;  %3791 = vst [vmem:[#allocation5 + $0xd0] sm:$0xff] %v3244_v20  ;;  %v3408_v2 = vsel %vm3406_vm13, %v3407_v55, %v6922_v15  ;;  %v3680_v36 = vor.u32 %v3679_v29, %v3678_v39 }
 0x44d   :  { %v3536_v6 = vmul.f32 %v3535_v49, %v3533_v5  ;;  %v3685_v53 = vshrl.u32 %v4386_v12, %v3676_v0  ;;  %v3409_v28 = vadd.s32 %v3408_v2, %v3404_v60  ;;  %v3687_v59 = vshll.u32 %v4386_v12, %v3675_v40 }
 0x44e   :  { %v3683_v54 = vor.u32 %v3682_v50, %v3681_v32  ;;  %v3688_v61 = vshrl.u32 %v4387_v14, %v3676_v0  ;;  %v3690_v9 = vshll.u32 %v4387_v14, %v3675_v40  ;;  %v3691_v25 = vshrl.u32 %v4388_v23, %v3676_v0 }
 0x44f   :  { %v3537_v57 = vxor.u32 2147483648, %v3536_v6  ;;  %v3686_v38 = vor.u32 %v3685_v53, %v3684_v11  ;;  %v3542_v62 = vsel %vm6927_vm12, 0, %v3540_v22  ;;  %v3410_v33 = vadd.s32 536870912, %v3409_v28 }
 0x450   :  { %v3689_v46 = vor.u32 %v3688_v61, %v3687_v59  ;;  %vm3693_vm14 = vcmp.lt.s32.totalorder %v6941_v27, 1  ;;  %v3677_v58 = vshrl.u32 %v4383_v4, %v3676_v0  ;;  %v3692_v31 = vor.u32 %v3691_v25, %v3690_v9 }
 0x451   :  { %v3538_v52 = vsel %vm3455_vm2, %v3537_v57, %v3536_v6  ;;  %vm3694_vm15 = vcmp.lt.s32.totalorder %v6941_v27, 2  ;;  %v6973_v40 = vshrl.u32 %v3410_v33, 30  ;;  %vm3696_vm0 = vcmp.lt.s32.totalorder %v6941_v27, 4 }
 0x452   :  { %v3541_v42 = vsel %vm6927_vm12, %v6678_v56, %v3538_v52  ;;  %v3701_v35 = vsel %vm3693_vm14, %v3680_v36, %v3683_v54  ;;  %vm3695_vm1 = vcmp.lt.s32.totalorder %v6941_v27, 3  ;;  %v3698_v47 = vsel %vm3696_vm0, %v3686_v38, 2102212464 }
 0x453   :  { %4313 = vcosq.f32 %v3541_v42  ;;  %v3702_v16 = vsel %vm3696_vm0, %v3689_v46, 920167782  ;;  %v3412_v15 = vshll.u32 %v6973_v40, 30  ;;  %v3705_v26 = vsel %vm3693_vm14, %v3683_v54, %v3686_v38 }
 0x454   :  { %4315 = vsinq.f32 %v3541_v42  ;;  %v3703_v1 = vsel %vm3695_vm1, %v3686_v38, %v3702_v16  ;;  %v3546_v63 = vadd.s32 3, %v3542_v62  ;;  %v3706_v41 = vsel %vm3696_vm0, %v3692_v31, 1326507024 }
 0x455   :  { %v3704_v3 = vsel %vm3694_vm15, %v3701_v35, %v3703_v1  ;;  %v3709_v0 = vshll.u32 %v3669_v7, 8  ;;  %v3413_v30 = vsub.s32 %v3409_v28, %v3412_v15  ;;  %v3697_v22 = vsel %vm3693_vm14, %v3677_v58, %v3680_v36 }
 0x456   :  { %v3707_v24 = vsel %vm3695_vm1, %v3689_v46, %v3706_v41  ;;  %v3699_v44 = vsel %vm3695_vm1, %v3683_v54, %v3698_v47  ;;  %v3547_v34 = vand.u32 3, %v3546_v63  ;;  %v3560_v17 = vand.u32 2139095040, %v6857_v13 }
 0x457   :  { %v3708_v21 = vsel %vm3694_vm15, %v3705_v26, %v3707_v24  ;;  %v6990_v60 = vmul.u32.u64.low %v3709_v0, %v3704_v3  ;;  %v6991_v37 = vmul.u32.u64.high %v3709_v0, %v3704_v3, %v6990_v60  ;;  %v3415_v55 = vsub.s32 0, %v3413_v30 }
 0x458   :  { %v6994_v39 = vmul.u32.u64.low %v3709_v0, %v3708_v21  ;;  %v6995_v29 = vmul.u32.u64.high %v3709_v0, %v3708_v21, %v6994_v39  ;;  %v3700_v5 = vsel %vm3694_vm15, %v3697_v22, %v3699_v44  ;;  %v3561_v50 = vshrl.u32 %v3560_v17, 23 }
 0x459   :  { %v3962_v7 = vmin.u32 %v3415_v55, %v3413_v30  ;;  %v3719_v49 = vadd.s32 1, %v6991_v37  ;;  %vm3545_vm3 = vweird.f32 %v6678_v56  ;;  %vm3548_vm2 = vcmp.lt.s32.totalorder %v3547_v34, 2 }
 0x45a   :  { %v3716_v11 = vmul.u32 %v3709_v0, %v3700_v5  ;;  %vm3718_vm4 = vc.u32 %v6995_v29, %v6990_v60  ;;  %v3969_v6 = vadd.s32 4294967169, %v3561_v50  ;;  %vm3552_vm5 = vcmp.eq.s32.totalorder %v3547_v34, 2 }
 0x45b   :  { %v3417_v20 = vclz %v3962_v7  ;;  %v3720_v27 = vsel %vm3718_vm4, %v3719_v49, %v6991_v37  ;;  %v3557_v59 = vand.u32 2147483647, %v6857_v13  ;;  %vm3549_vm6 = vcmp.eq.s32.totalorder %v3547_v34, 0 }
 0x45c   :  { %v3721_v54 = vadd.s32 %v3720_v27, %v3716_v11  ;;  %v3567_v61 = vadd.s32 1, %v3969_v6  ;;  %v3405_v38 = vadd.s32 %v6921_v51, %v6936_v19  ;;  %v3435_v58 = vsub.s32 4, %v6973_v40 }
 0x45d   :  { %v4314_v32 = vpop.eup %4313  ;;  %v3963_v53 = vadd.s32 4294967294, %v3417_v20  ;;  %v3564_v35 = vand.u32 8388607, %v3557_v59  ;;  %vm7019_vm9 = vcmp.le.f32.partialorder %v3349_v45, 0.7853982  ;;  %vm3351_vm10 = vcmp.lt.s32.totalorder %v6779_v18, 0 }
 0x45e   :  { %v4316_v2 = vpop.eup %4315  ;;  %v3553_v36 = vxor.u32 2147483648, %v4314_v32  ;;  %v3722_v62 = vadd.s32 536870912, %v3721_v54  ;;  %vm3568_vm8 = vcmp.gt.s32.totalorder %v3567_v61, 0  ;;  %vm3441_vm1 = vweird.f32 %v6779_v18 }
 0x45f   :  { %v3550_v28 = vxor.u32 2147483648, %v4316_v2  ;;  %vm3964_vm7 = vcmp.lt.s32.totalorder %v3963_v53, 0  ;;  %v3569_v51 = vsel %vm3568_vm8, %v3567_v61, 0  ;;  %v3565_v22 = vor.u32 8388608, %v3564_v35 }
 0x460   :  { %v3554_v57 = vsel %vm3552_vm5, %v3553_v36, %v4316_v2  ;;  %v3420_v25 = vsel %vm3964_vm7, 0, %v3963_v53  ;;  %v7012_v42 = vshrl.u32 %v3722_v62, 30  ;;  %v3571_v15 = vand.u32 31, %v3569_v51 }
 0x461   :  { %v3551_v9 = vsel %vm3549_vm6, %v4314_v32, %v3550_v28  ;;  %v3421_v46 = vsub.s32 32, %v3420_v25  ;;  %v3425_v52 = vsub.s32 4294967266, %v3420_v25  ;;  %v3422_v19 = vshll.u32 %v3413_v30, %v3420_v25 }
 0x462   :  { %v3555_v33 = vsel %vm3548_vm2, %v3551_v9, %v3554_v57  ;;  %v3724_v1 = vshll.u32 %v7012_v42, 30  ;;  %v3572_v3 = vsub.s32 32, %v3571_v15  ;;  %v3436_v30 = vsel %vm3351_vm10, %v3435_v58, %v6973_v40 }
 0x463   :  { %v3556_v31 = vsel %vm3545_vm3, nan, %v3555_v33  ;;  %v3423_v47 = vshrl.u32 %v3405_v38, %v3421_v46  ;;  %v3426_v16 = vadd.s32 127, %v3425_v52  ;;  %v3570_v24 = vshrl.u32 %v3569_v51, 5 }
 0x464   :  { %3794 = vst [vmem:[#allocation5 + $0xe8] sm:$0xff] %v3556_v31  ;;  %v3725_v41 = vsub.s32 %v3721_v54, %v3724_v1  ;;  %v3575_v21 = vshrl.u32 %v4384_v8, %v3572_v3  ;;  %v3578_v37 = vshrl.u32 %v4385_v10, %v3572_v3  ;;  %v3580_v45 = vshll.u32 %v4385_v10, %v3571_v15 }
 0x465   :  { %v3424_v26 = vor.u32 %v3423_v47, %v3422_v19  ;;  %v3427_v63 = vshll.u32 %v3426_v16, 23  ;;  %v3581_v34 = vshrl.u32 %v4386_v12, %v3572_v3  ;;  %v3584_v17 = vshrl.u32 %v4387_v14, %v3572_v3 }
 0x466   :  { %v3727_v44 = vsub.s32 0, %v3725_v41  ;;  %v3574_v5 = vshll.u32 %v4383_v4, %v3571_v15  ;;  %v3577_v40 = vshll.u32 %v4384_v8, %v3571_v15  ;;  %v3583_v49 = vshll.u32 %v4386_v12, %v3571_v15 }
 0x467   :  { %v3428_v0 = vor.u32 4788187, %v3427_v63  ;;  %v3431_v39 = vcvt.s32.f32 %v3424_v26  ;;  %v3438_v20 = vsel %vm7019_vm9, 0, %v3436_v30  ;;  %v3717_v10 = vadd.s32 %v6990_v60, %v6995_v29 }
 0x468   :  { %v3974_v7 = vmin.u32 %v3727_v44, %v3725_v41  ;;  %v3582_v32 = vor.u32 %v3581_v34, %v3580_v45  ;;  %v3576_v6 = vor.u32 %v3575_v21, %v3574_v5  ;;  %v3579_v2 = vor.u32 %v3578_v37, %v3577_v40 }
 0x469   :  { %v3429_v55 = vand.u32 2147483647, %v3428_v0  ;;  %v3585_v36 = vor.u32 %v3584_v17, %v3583_v49  ;;  %v3586_v27 = vshll.u32 %v4387_v14, %v3571_v15  ;;  %v3587_v28 = vshrl.u32 %v4388_v23, %v3572_v3 }
 0x46a   :  { %v3729_v11 = vclz %v3974_v7  ;;  %v3605_v8 = vshll.u32 %v3565_v22, 8  ;;  %v3573_v12 = vshrl.u32 %v4383_v4, %v3572_v3  ;;  %vm3589_vm11 = vcmp.lt.s32.totalorder %v3570_v24, 1 }
 0x46b   :  { %v3432_v50 = vmul.f32 %v3431_v39, %v3429_v55  ;;  %vm3592_vm12 = vcmp.lt.s32.totalorder %v3570_v24, 4  ;;  %v3588_v60 = vor.u32 %v3587_v28, %v3586_v27  ;;  %vm3591_vm13 = vcmp.lt.s32.totalorder %v3570_v24, 3 }
 0x46c   :  { %v3975_v54 = vadd.s32 4294967294, %v3729_v11  ;;  %v3594_v29 = vsel %vm3592_vm12, %v3582_v32, 2102212464  ;;  %v3597_v14 = vsel %vm3589_vm11, %v3576_v6, %v3579_v2  ;;  %v3598_v23 = vsel %vm3592_vm12, %v3585_v36, 920167782 }
 0x46d   :  { %v3433_v53 = vxor.u32 2147483648, %v3432_v50  ;;  %vm3590_vm15 = vcmp.lt.s32.totalorder %v3570_v24, 2  ;;  %v3599_v38 = vsel %vm3591_vm13, %v3582_v32, %v3598_v23  ;;  %v3593_v62 = vsel %vm3589_vm11, %v3573_v12, %v3576_v6 }
 0x46e   :  { %vm3976_vm14 = vcmp.lt.s32.totalorder %v3975_v54, 0  ;;  %v3595_v33 = vsel %vm3591_vm13, %v3579_v2, %v3594_v29  ;;  %v3600_v46 = vsel %vm3590_vm15, %v3597_v14, %v3599_v38  ;;  %v3601_v52 = vsel %vm3589_vm11, %v3579_v2, %v3582_v32 }
 0x46f   :  { %v3434_v61 = vsel %vm3351_vm10, %v3433_v53, %v3432_v50  ;;  %v3732_v4 = vsel %vm3976_vm14, 0, %v3975_v54  ;;  %v3602_v58 = vsel %vm3592_vm12, %v3588_v60, 1326507024  ;;  %v3442_v47 = vadd.s32 3, %v3438_v20 }
 0x470   :  { %v3437_v57 = vsel %vm7019_vm9, %v6779_v18, %v3434_v61  ;;  %v3733_v9 = vsub.s32 32, %v3732_v4  ;;  %v3737_v25 = vsub.s32 4294967266, %v3732_v4  ;;  %v3734_v31 = vshll.u32 %v3725_v41, %v3732_v4 }
 0x471   :  { %4317 = vcosq.f32 %v3437_v57  ;;  %v3603_v19 = vsel %vm3591_vm13, %v3585_v36, %v3602_v58  ;;  %v7058_v15 = vmul.u32.u64.low %v3605_v8, %v3600_v46  ;;  %v7059_v1 = vmul.u32.u64.high %v3605_v8, %v3600_v46, %v7058_v15 }
 0x472   :  { %4319 = vsinq.f32 %v3437_v57  ;;  %v3735_v35 = vshrl.u32 %v3717_v10, %v3733_v9  ;;  %v3738_v51 = vadd.s32 127, %v3737_v25  ;;  %v3604_v16 = vsel %vm3590_vm15, %v3601_v52, %v3603_v19 }
 0x473   :  { %v7061_v3 = vmul.u32.u64.low %v3605_v8, %v3604_v16  ;;  %v7062_v56 = vmul.u32.u64.high %v3605_v8, %v3604_v16, %v7061_v3  ;;  %v3596_v0 = vsel %vm3590_vm15, %v3593_v62, %v3595_v33  ;;  %v3443_v22 = vand.u32 3, %v3442_v47 }
 0x474   :  { %v3736_v26 = vor.u32 %v3735_v35, %v3734_v31  ;;  %v3739_v63 = vshll.u32 %v3738_v51, 23  ;;  %v3615_v41 = vadd.s32 1, %v7059_v1  ;;  %v3612_v37 = vmul.u32 %v3605_v8, %v3596_v0 }
 0x475   :  { %vm3614_vm0 = vc.u32 %v7062_v56, %v7058_v15  ;;  %v3747_v7 = vsub.s32 4, %v7012_v42  ;;  %vm3448_vm3 = vcmp.eq.s32.totalorder %v3443_v22, 2  ;;  %vm3445_vm2 = vcmp.eq.s32.totalorder %v3443_v22, 0 }
 0x476   :  { %v3740_v30 = vor.u32 4788187, %v3739_v63  ;;  %v3743_v21 = vcvt.s32.f32 %v3736_v26  ;;  %v3616_v55 = vsel %vm3614_vm0, %v3615_v41, %v7059_v1  ;;  %vm3444_vm4 = vcmp.lt.s32.totalorder %v3443_v22, 2 }
 0x477   :  { %v3617_v5 = vadd.s32 %v3616_v55, %v3612_v37  ;;  %vm3662_vm5 = vcmp.le.f32.partialorder %v3661_v48, 0.7853982  ;;  %vm3663_vm6 = vcmp.lt.s32.totalorder %v6783_v43, 0  ;;  %v3613_v38 = vadd.s32 %v7058_v15, %v7062_v56 }
 0x478   :  { %v3741_v44 = vand.u32 2147483647, %v3740_v30  ;;  %v3748_v11 = vsel %vm3663_vm6, %v3747_v7, %v7012_v42  ;;  %vm3753_vm11 = vweird.f32 %v6783_v43  ;;  %vm3559_vm12 = vcmp.lt.s32.totalorder %v6857_v13, 0 }
 0x479   :  { %v3618_v50 = vadd.s32 536870912, %v3617_v5  ;;  %v3750_v53 = vsel %vm3662_vm5, 0, %v3748_v11  ;;  %vm3558_vm13 = vcmp.le.f32.partialorder %v3557_v59, 0.7853982 }
 0x47a   :  { %v3744_v17 = vmul.f32 %v3743_v21, %v3741_v44  ;;  %v3754_v28 = vadd.s32 3, %v3750_v53 }
 0x47b   :  { %v4318_v45 = vpop.eup %4317  ;;  %v3619_v6 = vshrl.u32 %v3618_v50, 30 }
 0x47c   :  { %v4320_v39 = vpop.eup %4319  ;;  %v3449_v34 = vxor.u32 2147483648, %v4318_v45  ;;  %v3745_v49 = vxor.u32 2147483648, %v3744_v17  ;;  %v3755_v48 = vand.u32 3, %v3754_v28 }
 0x47d   :  { %v3446_v24 = vxor.u32 2147483648, %v4320_v39  ;;  %v3620_v36 = vshll.u32 %v3619_v6, 30  ;;  %v3643_v1 = vsub.s32 4, %v3619_v6 }
 0x47e   :  { %v3450_v40 = vsel %vm3448_vm3, %v3449_v34, %v4320_v39  ;;  %v3746_v32 = vsel %vm3663_vm6, %v3745_v49, %v3744_v17  ;;  %vm3760_vm7 = vcmp.eq.s32.totalorder %v3755_v48, 2  ;;  %vm3756_vm9 = vcmp.lt.s32.totalorder %v3755_v48, 2 }
 0x47f   :  { %v3447_v20 = vsel %vm3445_vm2, %v4318_v45, %v3446_v24  ;;  %v3749_v18 = vsel %vm3662_vm5, %v6783_v43, %v3746_v32  ;;  %v3621_v27 = vsub.s32 %v3617_v5, %v3620_v36  ;;  %vm3757_vm10 = vcmp.eq.s32.totalorder %v3755_v48, 0 }
 0x480   :  { %v3451_v10 = vsel %vm3444_vm4, %v3447_v20, %v3450_v40  ;;  %4321 = vcosq.f32 %v3749_v18  ;;  %v3644_v15 = vsel %vm3559_vm12, %v3643_v1, %v3619_v6 }
 0x481   :  { %v3452_v2 = vsel %vm3441_vm1, nan, %v3451_v10  ;;  %4323 = vsinq.f32 %v3749_v18  ;;  %v3623_v8 = vsub.s32 0, %v3621_v27  ;;  %v3646_v3 = vsel %vm3558_vm13, 0, %v3644_v15 }
 0x482   :  { %3793 = vst [vmem:[#allocation5 + $0xe0] sm:$0xff] %v3452_v2  ;;  %v3650_v56 = vadd.s32 3, %v3646_v3  ;;  %vm3649_vm1 = vweird.f32 %v6857_v13 }
 0x483   :  { %v3970_v54 = vmin.u32 %v3623_v8, %v3621_v27 }
 0x484   :  { %v3651_v0 = vand.u32 3, %v3650_v56 }
 0x485   :  { %v3625_v12 = vclz %v3970_v54 }
 0x486   :  { %vm3656_vm14 = vcmp.eq.s32.totalorder %v3651_v0, 2  ;;  %vm3653_vm15 = vcmp.eq.s32.totalorder %v3651_v0, 0  ;;  %vm3652_vm0 = vcmp.lt.s32.totalorder %v3651_v0, 2 }
 0x487   :  { %v3971_v60 = vadd.s32 4294967294, %v3625_v12 }
 0x489   :  { %vm3972_vm8 = vcmp.lt.s32.totalorder %v3971_v60, 0 }
 0x48a   :  { %v4322_v61 = vpop.eup %4321  ;;  %v3628_v23 = vsel %vm3972_vm8, 0, %v3971_v60 }
 0x48b   :  { %v4324_v29 = vpop.eup %4323  ;;  %v3761_v57 = vxor.u32 2147483648, %v4322_v61  ;;  %v3629_v9 = vsub.s32 32, %v3628_v23  ;;  %v3633_v25 = vsub.s32 4294967266, %v3628_v23  ;;  %v3630_v46 = vshll.u32 %v3621_v27, %v3628_v23 }
 0x48c   :  { %v3758_v42 = vxor.u32 2147483648, %v4324_v29 }
 0x48d   :  { %v3762_v14 = vsel %vm3760_vm7, %v3761_v57, %v4324_v29  ;;  %v3631_v52 = vshrl.u32 %v3613_v38, %v3629_v9  ;;  %v3634_v58 = vadd.s32 127, %v3633_v25 }
 0x48e   :  { %v3759_v4 = vsel %vm3757_vm10, %v4322_v61, %v3758_v42 }
 0x48f   :  { %v3763_v62 = vsel %vm3756_vm9, %v3759_v4, %v3762_v14  ;;  %v3632_v31 = vor.u32 %v3631_v52, %v3630_v46  ;;  %v3635_v35 = vshll.u32 %v3634_v58, 23 }
 0x490   :  { %v3764_v33 = vsel %vm3753_vm11, nan, %v3763_v62 }
 0x491   :  { %3796 = vst [vmem:[#allocation5 + $0xf8] sm:$0xff] %v3764_v33  ;;  %v3636_v51 = vor.u32 4788187, %v3635_v35  ;;  %v3639_v47 = vcvt.s32.f32 %v3632_v31 }
 0x493   :  { %v3637_v19 = vand.u32 2147483647, %v3636_v51 }
 0x495   :  { %v3640_v16 = vmul.f32 %v3639_v47, %v3637_v19 }
 0x497   :  { %v3641_v26 = vxor.u32 2147483648, %v3640_v16 }
 0x499   :  { %v3642_v43 = vsel %vm3559_vm12, %v3641_v26, %v3640_v16 }
 0x49a   :  { %v3645_v63 = vsel %vm3558_vm13, %v6857_v13, %v3642_v43 }
 0x49b   :  { %4325 = vcosq.f32 %v3645_v63 }
 0x49c   :  { %4327 = vsinq.f32 %v3645_v63 }
 0x4a5   :  { %v4326_v30 = vpop.eup %4325 }
 0x4a6   :  { %v4328_v22 = vpop.eup %4327  ;;  %v3657_v41 = vxor.u32 2147483648, %v4326_v30 }
 0x4a7   :  { %v3654_v44 = vxor.u32 2147483648, %v4328_v22 }
 0x4a8   :  { %v3658_v21 = vsel %vm3656_vm14, %v3657_v41, %v4328_v22 }
 0x4a9   :  { %v3655_v59 = vsel %vm3653_vm15, %v4326_v30, %v3654_v44 }
 0x4aa   :  { %v3659_v37 = vsel %vm3652_vm0, %v3655_v59, %v3658_v21 }
 0x4ab   :  { %v3660_v45 = vsel %vm3649_vm1, nan, %v3659_v37 }
 0x4ac   :  { %3795 = vst [vmem:[#allocation5 + $0xf0] sm:$0xff] %v3660_v45 }
 0x4ad   :  { %4367 = shalt.err (!%p4364_p12)
}
 0x4ae   :  { %s4368_s13 = scalar_lea.hbm %s7097_s3, 4096 }
 0x4af   :  { %p4369_p13 = scmp.ne.s32.totalorder %s7097_s3, %s4368_s13  ;;  %p4372_p0 = scmp.lt.u32.totalorder %s4368_s13, %s7097_s3 }
 0x4b1   :  { %p4374_p1 = pnand %p4372_p0, %p4369_p13 }
 0x4b3   :  { %4377 = shalt.err (!%p4374_p1)
}
 0x4b4   :  { %s4390_s18 = smov 128   ;;  %s4391_s19 = smov 8  }
 0x4b5   :  { %3808 = dma.vmem_to_hbm [thread:$0]  %s3803_s9, 4096, %s7097_s3, [#allocation4], %s4390_s18, %s4390_s18, %s4391_s19  }
 0x4b6   :  { %4380 = dma.done.wait [#allocation4], 4096  }
 0x4b7   :  { %4381 = vsyncadd [#allocation4], 4294963200 }
 0x4b8   :  { %3812 = vsyncpa [#allocation3], 1 }
 0x4b9   :  { %3813 = vsyncpa [#allocation4], 1 }

</bundles_post_ra>
